<compile_context>
chip_gen: v6e
topology: v6e:2x2x1
jax: 0.10.0
libtpu: 0.0.40
codegen_flags: <defaults>
</compile_context>

<pallas_src>
import functools

import jax
import jax.numpy as jnp
from jax.experimental import pallas as pl
from jax.experimental.pallas import tpu as pltpu


# --------------------------------------------------------------------------------------
# Kernel
# --------------------------------------------------------------------------------------
def _attention_kernel(x_ref, wq_ref, wk_ref, wv_ref, wproj_ref, bproj_ref, o_ref,
                      q_scr, k_scr, v_scr, attn_scr,
                      *, num_heads: int, scale: float, kv_tile: int):
    Bblk, N, C = x_ref.shape
    _, Nq, _ = q_scr.shape
    Dh = C // num_heads
    rows_kv = Bblk * N
    rows_q = Bblk * Nq
    num_kv_tiles = N // kv_tile

    # ---- projections: bf16 MXU matmuls, f32 accumulate, results parked in bf16 scratch ----
    xb = x_ref[...].astype(jnp.bfloat16)                      # (Bblk, N, C)
    x2 = xb.reshape(rows_kv, C)                                # leading-dim merge (layout-preserving)
    k_scr[...] = jnp.dot(x2, wk_ref[...], preferred_element_type=jnp.float32
                         ).astype(jnp.bfloat16).reshape(Bblk, N, C)
    v_scr[...] = jnp.dot(x2, wv_ref[...], preferred_element_type=jnp.float32
                         ).astype(jnp.bfloat16).reshape(Bblk, N, C)

    # Q only for this query tile; softmax scale folded in (O(rows*C) muls, not O(H*N^2)).
    if Nq == N:
        xq = x2
    else:
        q_start = pl.multiple_of(pl.program_id(1) * Nq, Nq)
        xq = x_ref[:, pl.ds(q_start, Nq), :].astype(jnp.bfloat16).reshape(rows_q, C)
    q_scr[...] = ((jnp.dot(xq, wq_ref[...], preferred_element_type=jnp.float32) * scale)
                  .astype(jnp.bfloat16).reshape(Bblk, Nq, C))

    # ---- per-head attention; heads are static lane slices of the projection columns ----
    # (same column ordering as torch's reshape(B, N, 3, H, Dh) + permute)
    # TODO(synk): for Dh == 64 process head pairs (full 128-lane slices) or do a one-time
    #             head-major relayout to avoid the repeated sub-vreg lane selects.
    for h in range(num_heads):
        sl = slice(h * Dh, (h + 1) * Dh)
        q_h = q_scr[:, :, sl]                                  # (Bblk, Nq, Dh) bf16

        if num_kv_tiles == 1:
            # short-sequence fast path: plain (stabilized) softmax over the whole key axis
            s = jnp.einsum('bnd,bmd->bnm', q_h, k_scr[:, :, sl],
                           preferred_element_type=jnp.float32)          # (Bblk, Nq, N) f32
            s = s - jnp.max(s, axis=-1, keepdims=True)
            p = jnp.exp(s)
            inv_l = pl.reciprocal(jnp.sum(p, axis=-1, keepdims=True), approx=True)
            out_h = inv_l * jnp.einsum('bnm,bmd->bnd', p.astype(jnp.bfloat16),
                                       v_scr[:, :, sl],
                                       preferred_element_type=jnp.float32)
        else:
            # flash-style running softmax over key tiles: only a (Bblk, Nq, kv_tile)
            # score/prob pair is live at any time.
            def kv_step(kt, carry):
                m_p, l_p, acc_p = carry
                ks = pl.multiple_of(kt * kv_tile, kv_tile)
                k_t = k_scr[:, pl.ds(ks, kv_tile), sl]
                v_t = v_scr[:, pl.ds(ks, kv_tile), sl]
                s = jnp.einsum('bnd,bmd->bnm', q_h, k_t,
                               preferred_element_type=jnp.float32)
                m_n = jnp.maximum(m_p, jnp.max(s, axis=-1, keepdims=True))
                alpha = jnp.exp(m_p - m_n)
                p = jnp.exp(s - m_n)
                l_n = alpha * l_p + jnp.sum(p, axis=-1, keepdims=True)
                acc_n = alpha * acc_p + jnp.einsum('bnm,bmd->bnd', p.astype(jnp.bfloat16),
                                                   v_t, preferred_element_type=jnp.float32)
                return m_n, l_n, acc_n

            m0 = jnp.full((Bblk, Nq, 1), -jnp.inf, jnp.float32)
            l0 = jnp.zeros((Bblk, Nq, 1), jnp.float32)
            a0 = jnp.zeros((Bblk, Nq, Dh), jnp.float32)
            _, l_f, acc_f = jax.lax.fori_loop(0, num_kv_tiles, kv_step, (m0, l0, a0))
            out_h = acc_f * pl.reciprocal(l_f, approx=True)

        # attn_drop is Dropout(0.0) -> identity.  Per-head write into the bf16 scratch slab
        # replaces the previous list + concatenate (bounded live set, no lane-interleave ops).
        attn_scr[:, sl] = out_h.reshape(rows_q, Dh).astype(jnp.bfloat16)

    # ---- output projection (+ bias); proj_drop(0.0) -> identity ----
    y = jnp.dot(attn_scr[...], wproj_ref[...], preferred_element_type=jnp.float32) + bproj_ref[...]
    o_ref[...] = y.reshape(Bblk, Nq, C).astype(o_ref.dtype)


# --------------------------------------------------------------------------------------
# Tiling / VMEM heuristics
# --------------------------------------------------------------------------------------
def _pick_tile(n: int, target: int, align: int = 8) -> int:
    """Largest divisor of n that is <= target and (a multiple of `align` or n itself)."""
    if n <= target:
        return n
    best = 1
    for d in range(1, target + 1):
        if n % d == 0 and (d % align == 0):
            best = d
    if best == 1:                        # awkward n: fall back to any divisor <= target
        for d in range(1, target + 1):
            if n % d == 0:
                best = d
    return best


def _vmem_capacity_bytes() -> int:
    try:
        return int(pltpu.get_tpu_info().vmem_capacity_bytes)
    except Exception:
        return 64 * 2**20                # conservative fallback (v7x per-TensorCore VMEM)


def _footprint_bytes(block_b, block_q, n_seq, dim, kv_tile, num_heads, in_itemsize):
    rows_q = block_b * block_q
    rows_kv = block_b * n_seq
    head_dim = max(1, dim // num_heads)
    weights = 2 * 4 * dim * dim * 2 + 2 * dim * 4            # bf16 Wq|Wk|Wv|Wproj (2 bufs) + bias
    io_blk = (2 * block_b * n_seq * dim * in_itemsize        # x block, double buffered
              + 2 * rows_q * dim * in_itemsize)              # out block, double buffered
    scratch = (2 * rows_kv + 2 * rows_q) * dim * 2           # k, v, q, attn bf16 scratch
    transient = (rows_kv * dim * 4                           # f32 projection result pre-cast
                 + 2 * rows_q * kv_tile * 4                  # live score + prob tile (f32)
                 + rows_q * (head_dim + 2) * 4)              # flash acc / m / l
    return weights + io_blk + scratch + transient


# --------------------------------------------------------------------------------------
# Wrapper
# --------------------------------------------------------------------------------------
def attention_pallas(x, w_qkv, w_proj, b_proj, *, num_heads: int, scale: float,
                     target_rows=None, query_block=None, kv_block=None):
    """x: (B, N, C); w_qkv: (C, 3C); w_proj: (C, C); b_proj: (1, C).

    Linear weights are passed pre-transposed as (in_features, out_features) so every
    matmul is a lane-dense `x @ W` on the MXU."""
    B, N, C = x.shape
    assert C % num_heads == 0, "dim must be divisible by num_heads"
    itemsize = x.dtype.itemsize

    # ---- generation-aware VMEM budget (v5e/v6e: 128 MiB, v7x: 64 MiB per TC) ----
    vmem_cap = _vmem_capacity_bytes()
    vmem_budget = int(vmem_cap * 0.8)        # headroom for compiler scratch / semaphores / DMA bufs
    if target_rows is None:
        target_rows = 512 if vmem_cap >= 96 * 2**20 else 256

    # ---- tile selection ----
    kv_target = kv_block or 512
    kv_tile = _pick_tile(N, kv_target)
    if kv_tile < min(N, kv_target) // 4:
        kv_tile = N        # TODO(synk): masked tail key tiles for awkward (prime-ish) N
    q_target = query_block or 256
    block_q = _pick_tile(N, q_target)
    if block_q < min(N, q_target) // 4:
        block_q = N
    block_b = max(1, min(B, target_rows // max(block_q, 1)))

    def _fits(bb, bq):
        return _footprint_bytes(bb, bq, N, C, kv_tile, num_heads, itemsize) <= vmem_budget

    while not _fits(block_b, block_q) and block_b > 1:
        block_b = (block_b + 1) // 2
    while not _fits(block_b, block_q) and block_q > 8:
        nq = _pick_tile(N, max(8, block_q // 2))
        if nq >= block_q:
            break
        block_q = nq
    # TODO(synk): for sequences where even block_b=1 K/V does not fit VMEM, stream K/V tiles
    #             from HBM (manual double-buffer) instead of holding the full sequence.

    grid_b = -(-B // block_b)
    grid_q = N // block_q
    # Give the grid >= 2 "parallel" steps when possible (v7x has 2 TensorCores per chip).
    if grid_b * grid_q < 2:
        if B >= 2:
            block_b = (B + 1) // 2
            grid_b = -(-B // block_b)
        elif block_q > 8:
            nq = _pick_tile(N, block_q // 2)
            if nq < block_q and (nq % 8 == 0 or nq == N):
                block_q = nq
                grid_q = N // block_q

    # Pad the batch instead of demanding an exact divisor (padded rows are dropped at the end).
    b_pad = grid_b * block_b
    x_p = jnp.pad(x, ((0, b_pad - B), (0, 0), (0, 0))) if b_pad != B else x

    est = _footprint_bytes(block_b, block_q, N, C, kv_tile, num_heads, itemsize)
    vmem_limit = int(min(vmem_budget, max(32 * 2**20, int(1.5 * est))))

    # Weights are call-invariant: split W_qkv into three (C, C) bf16 operands (MXU fast path,
    # half the HBM->VMEM bytes, no in-kernel (rows, 3C) f32 slab).  Bias stays f32.
    w_q = w_qkv[:, 0 * C:1 * C].astype(jnp.bfloat16)
    w_k = w_qkv[:, 1 * C:2 * C].astype(jnp.bfloat16)
    w_v = w_qkv[:, 2 * C:3 * C].astype(jnp.bfloat16)
    w_proj_bf = w_proj.astype(jnp.bfloat16)
    b_proj_f32 = b_proj.astype(jnp.float32)

    kernel = functools.partial(_attention_kernel, num_heads=num_heads,
                               scale=float(scale), kv_tile=kv_tile)
    rows_q = block_b * block_q

    def _weight_spec(shape, single_buffer):
        index_map = lambda b, q: (0,) * len(shape)
        if single_buffer and hasattr(pl, "Buffered"):
            try:
                return pl.BlockSpec(shape, index_map, pipeline_mode=pl.Buffered(1))
            except TypeError:           # older BlockSpec without pipeline_mode
                pass
        return pl.BlockSpec(shape, index_map)

    def _build(single_buffer_weights):
        return pl.pallas_call(
            kernel,
            out_shape=jax.ShapeDtypeStruct((b_pad, N, C), x.dtype),
            grid_spec=pltpu.PrefetchScalarGridSpec(
                num_scalar_prefetch=0,
                grid=(grid_b, grid_q),
                in_specs=[
                    pl.BlockSpec((block_b, N, C), lambda b, q: (b, 0, 0)),   # x (full key seq)
                    _weight_spec((C, C), single_buffer_weights),             # W_q
                    _weight_spec((C, C), single_buffer_weights),             # W_k
                    _weight_spec((C, C), single_buffer_weights),             # W_v
                    _weight_spec((C, C), single_buffer_weights),             # W_proj
                    _weight_spec((1, C), single_buffer_weights),             # proj bias
                ],
                out_specs=pl.BlockSpec((block_b, block_q, C), lambda b, q: (b, q, 0)),
                scratch_shapes=[
                    pltpu.VMEM((block_b, block_q, C), jnp.bfloat16),  # scaled q
                    pltpu.VMEM((block_b, N, C), jnp.bfloat16),        # k
                    pltpu.VMEM((block_b, N, C), jnp.bfloat16),        # v
                    pltpu.VMEM((rows_q, C), jnp.bfloat16),            # per-head output slab
                ],
            ),
            compiler_params=pltpu.CompilerParams(
                dimension_semantics=("parallel", "parallel"),
                vmem_limit_bytes=vmem_limit,
            ),
        )

    args = (x_p, w_q, w_k, w_v, w_proj_bf, b_proj_f32)
    try:
        out = _build(True)(*args)
    except Exception:
        # Some builds don't plumb pipeline_mode through pallas_call; fall back to the default
        # (double-buffered) weight specs — everything else is unchanged.
        out = _build(False)(*args)
    return out[:B] if b_pad != B else out


# --------------------------------------------------------------------------------------
# Pure-JAX f32 reference mirroring the PyTorch forward
# --------------------------------------------------------------------------------------
def attention_ref(x, w_qkv, w_proj, b_proj, *, num_heads: int, scale: float):
    B, N, C = x.shape
    Dh = C // num_heads
    qkv = jnp.einsum('bnc,cd->bnd', x, w_qkv)                       # (B, N, 3C)
    qkv = qkv.reshape(B, N, 3, num_heads, Dh).transpose(2, 0, 3, 1, 4)
    q, k, v = qkv[0], qkv[1], qkv[2]                                # (B, H, N, Dh)
    attn = jnp.einsum('bhnd,bhmd->bhnm', q, k) * scale
    attn = jax.nn.softmax(attn, axis=-1)
    out = jnp.einsum('bhnm,bhmd->bhnd', attn, v)
    out = out.transpose(0, 2, 1, 3).reshape(B, N, C)
    return jnp.einsum('bnc,cd->bnd', out, w_proj) + b_proj[0]


if __name__ == "__main__":
    # Small shapes consistent with the module: B=2, N=8 tokens, C=32 dim, 8 heads.
    B, N, C = 2, 8, 32
    num_heads = 8
    head_dim = C // num_heads
    scale = head_dim ** (-0.5)          # qk_scale=None -> head_dim ** -0.5

    key = jax.random.PRNGKey(0)
    kx, kw1, kw2, kb = jax.random.split(key, 4)
    x = jax.random.normal(kx, (B, N, C), dtype=jnp.float32)
    # nn.Linear weights, stored transposed as (in, out); qkv_bias=False.
    w_qkv = jax.random.normal(kw1, (C, 3 * C), dtype=jnp.float32) * 0.1
    w_proj = jax.random.normal(kw2, (C, C), dtype=jnp.float32) * 0.1
    b_proj = jax.random.normal(kb, (1, C), dtype=jnp.float32) * 0.1

    out = jax.block_until_ready(
        attention_pallas(x, w_qkv, w_proj, b_proj, num_heads=num_heads, scale=scale))

    ref = attention_ref(x, w_qkv, w_proj, b_proj, num_heads=num_heads, scale=scale)
    assert out.shape == (B, N, C)
    # bf16 MXU inputs + approx reciprocal -> bf16-level tolerance vs the f32 reference.
    assert jnp.allclose(out, ref, atol=5e-2, rtol=5e-2), "mismatch vs reference"
    print("KERNEL_OK")
</pallas_src>

<mosaic_0001>
module attributes {stable_mosaic.version = 11 : i64} {
  func.func @_attention_kernel(%arg0: i32, %arg1: i32, %arg2: memref<1x8x32xf32, #tpu.memory_space<vmem>>, %arg3: memref<32x32xbf16, #tpu.memory_space<vmem>>, %arg4: memref<32x32xbf16, #tpu.memory_space<vmem>>, %arg5: memref<32x32xbf16, #tpu.memory_space<vmem>>, %arg6: memref<32x32xbf16, #tpu.memory_space<vmem>>, %arg7: memref<1x32xf32, #tpu.memory_space<vmem>>, %arg8: memref<1x8x32xf32, #tpu.memory_space<vmem>>, %arg9: memref<1x8x32xbf16, #tpu.memory_space<vmem>>, %arg10: memref<1x8x32xbf16, #tpu.memory_space<vmem>>, %arg11: memref<1x8x32xbf16, #tpu.memory_space<vmem>>, %arg12: memref<8x32xbf16, #tpu.memory_space<vmem>>) attributes {dimension_semantics = [#tpu.dimension_semantics<parallel>, #tpu.dimension_semantics<parallel>], iteration_bounds = array<i64: 2, 1>, scalar_prefetch = 0 : i64, scratch_operands = 4 : i64, tpu.core_type = #tpu.core_type<tc>, window_params = [{transform_indices = @transform_0, window_bounds = array<i64: 1, 8, 32>}, {pipeline_mode = #tpu.pipeline_mode<synchronous>, transform_indices = @transform_1, window_bounds = array<i64: 32, 32>}, {pipeline_mode = #tpu.pipeline_mode<synchronous>, transform_indices = @transform_2, window_bounds = array<i64: 32, 32>}, {pipeline_mode = #tpu.pipeline_mode<synchronous>, transform_indices = @transform_3, window_bounds = array<i64: 32, 32>}, {pipeline_mode = #tpu.pipeline_mode<synchronous>, transform_indices = @transform_4, window_bounds = array<i64: 32, 32>}, {pipeline_mode = #tpu.pipeline_mode<synchronous>, transform_indices = @transform_5, window_bounds = array<i64: 1, 32>}, {transform_indices = @transform_6, window_bounds = array<i64: 1, 8, 32>}]} {
    %c0 = arith.constant 0 : index
    %c0_0 = arith.constant 0 : index
    %c0_1 = arith.constant 0 : index
    %0 = vector.load %arg2[%c0, %c0_0, %c0_1] : memref<1x8x32xf32, #tpu.memory_space<vmem>>, vector<1x8x32xf32>
    %1 = arith.truncf %0 : vector<1x8x32xf32> to vector<1x8x32xbf16>
    %2 = vector.shape_cast %1 : vector<1x8x32xbf16> to vector<8x32xbf16>
    %c0_2 = arith.constant 0 : index
    %c0_3 = arith.constant 0 : index
    %3 = vector.load %arg4[%c0_2, %c0_3] : memref<32x32xbf16, #tpu.memory_space<vmem>>, vector<32x32xbf16>
    %cst = arith.constant dense<0.000000e+00> : vector<8x32xf32>
    %4 = tpu.matmul %2, %3, %cst {dimension_numbers = #tpu.dot_dimension_numbers<[1], [0], [0], [1], [0, 0, 1, 1], [], []>} : vector<8x32xbf16>, vector<32x32xbf16>, vector<8x32xf32> -> vector<8x32xf32>
    %5 = arith.truncf %4 : vector<8x32xf32> to vector<8x32xbf16>
    %6 = vector.shape_cast %5 : vector<8x32xbf16> to vector<1x8x32xbf16>
    %c0_4 = arith.constant 0 : index
    %c0_5 = arith.constant 0 : index
    %c0_6 = arith.constant 0 : index
    %7 = vector.load %arg10[%c0_4, %c0_5, %c0_6] : memref<1x8x32xbf16, #tpu.memory_space<vmem>>, vector<1x8x32xbf16>
    tpu.vector_store %arg10[%c0_4, %c0_5, %c0_6], %6 {strides = array<i32>} : memref<1x8x32xbf16, #tpu.memory_space<vmem>>, vector<1x8x32xbf16>,
    %c0_7 = arith.constant 0 : index
    %c0_8 = arith.constant 0 : index
    %8 = vector.load %arg5[%c0_7, %c0_8] : memref<32x32xbf16, #tpu.memory_space<vmem>>, vector<32x32xbf16>
    %cst_9 = arith.constant dense<0.000000e+00> : vector<8x32xf32>
    %9 = tpu.matmul %2, %8, %cst_9 {dimension_numbers = #tpu.dot_dimension_numbers<[1], [0], [0], [1], [0, 0, 1, 1], [], []>} : vector<8x32xbf16>, vector<32x32xbf16>, vector<8x32xf32> -> vector<8x32xf32>
    %10 = arith.truncf %9 : vector<8x32xf32> to vector<8x32xbf16>
    %11 = vector.shape_cast %10 : vector<8x32xbf16> to vector<1x8x32xbf16>
    %c0_10 = arith.constant 0 : index
    %c0_11 = arith.constant 0 : index
    %c0_12 = arith.constant 0 : index
    %12 = vector.load %arg11[%c0_10, %c0_11, %c0_12] : memref<1x8x32xbf16, #tpu.memory_space<vmem>>, vector<1x8x32xbf16>
    tpu.vector_store %arg11[%c0_10, %c0_11, %c0_12], %11 {strides = array<i32>} : memref<1x8x32xbf16, #tpu.memory_space<vmem>>, vector<1x8x32xbf16>,
    %c0_13 = arith.constant 0 : index
    %c0_14 = arith.constant 0 : index
    %13 = vector.load %arg3[%c0_13, %c0_14] : memref<32x32xbf16, #tpu.memory_space<vmem>>, vector<32x32xbf16>
    %cst_15 = arith.constant dense<0.000000e+00> : vector<8x32xf32>
    %14 = tpu.matmul %2, %13, %cst_15 {dimension_numbers = #tpu.dot_dimension_numbers<[1], [0], [0], [1], [0, 0, 1, 1], [], []>} : vector<8x32xbf16>, vector<32x32xbf16>, vector<8x32xf32> -> vector<8x32xf32>
    %cst_16 = arith.constant 5.000000e-01 : f32
    %15 = vector.broadcast %cst_16 : f32 to vector<8x32xf32>
    %16 = arith.mulf %14, %15 : vector<8x32xf32>
    %17 = arith.truncf %16 : vector<8x32xf32> to vector<8x32xbf16>
    %18 = vector.shape_cast %17 : vector<8x32xbf16> to vector<1x8x32xbf16>
    %c0_17 = arith.constant 0 : index
    %c0_18 = arith.constant 0 : index
    %c0_19 = arith.constant 0 : index
    %19 = vector.load %arg9[%c0_17, %c0_18, %c0_19] : memref<1x8x32xbf16, #tpu.memory_space<vmem>>, vector<1x8x32xbf16>
    tpu.vector_store %arg9[%c0_17, %c0_18, %c0_19], %18 {strides = array<i32>} : memref<1x8x32xbf16, #tpu.memory_space<vmem>>, vector<1x8x32xbf16>,
    %c0_20 = arith.constant 0 : index
    %c0_21 = arith.constant 0 : index
    %c0_22 = arith.constant 0 : index
    %20 = vector.load %arg9[%c0_20, %c0_21, %c0_22] : memref<1x8x32xbf16, #tpu.memory_space<vmem>>, vector<1x8x4xbf16>
    %c0_23 = arith.constant 0 : index
    %c0_24 = arith.constant 0 : index
    %c0_25 = arith.constant 0 : index
    %21 = vector.load %arg10[%c0_23, %c0_24, %c0_25] : memref<1x8x32xbf16, #tpu.memory_space<vmem>>, vector<1x8x4xbf16>
    "tpu.trace_start"() <{level = 10 : i32, message = "bnd,bmd->bnm"}> : () -> ()
    %cst_26 = arith.constant dense<0.000000e+00> : vector<1x8x8xf32>
    %22 = tpu.matmul %20, %21, %cst_26 {dimension_numbers = #tpu.dot_dimension_numbers<[2], [2], [1], [1], [0, 0, 0, 1, 1, 1], [0], [0]>} : vector<1x8x4xbf16>, vector<1x8x4xbf16>, vector<1x8x8xf32> -> vector<1x8x8xf32>
    "tpu.trace_stop"() : () -> ()
    %cst_27 = arith.constant dense<0xFF800000> : vector<1x8xf32>
    %23 = vector.multi_reduction <maximumf>, %22, %cst_27 [2] : vector<1x8x8xf32> to vector<1x8xf32>
    %24 = vector.shape_cast %23 : vector<1x8xf32> to vector<1x8x1xf32>
    %25 = vector.broadcast %24 : vector<1x8x1xf32> to vector<1x8x8xf32>
    %26 = arith.subf %22, %25 : vector<1x8x8xf32>
    %27 = math.exp %26 : vector<1x8x8xf32>
    %cst_28 = arith.constant dense<0.000000e+00> : vector<1x8xf32>
    %28 = vector.multi_reduction <add>, %27, %cst_28 [2] : vector<1x8x8xf32> to vector<1x8xf32>
    %29 = vector.shape_cast %28 : vector<1x8xf32> to vector<1x8x1xf32>
    %30 = tpu.reciprocal %29 {approx = true} : vector<1x8x1xf32> -> vector<1x8x1xf32>
    %31 = arith.truncf %27 : vector<1x8x8xf32> to vector<1x8x8xbf16>
    %c0_29 = arith.constant 0 : index
    %c0_30 = arith.constant 0 : index
    %c0_31 = arith.constant 0 : index
    %32 = vector.load %arg11[%c0_29, %c0_30, %c0_31] : memref<1x8x32xbf16, #tpu.memory_space<vmem>>, vector<1x8x4xbf16>
    "tpu.trace_start"() <{level = 10 : i32, message = "bnm,bmd->bnd"}> : () -> ()
    %cst_32 = arith.constant dense<0.000000e+00> : vector<1x8x4xf32>
    %33 = tpu.matmul %31, %32, %cst_32 {dimension_numbers = #tpu.dot_dimension_numbers<[2], [1], [1], [2], [0, 0, 0, 1, 1, 2], [0], [0]>} : vector<1x8x8xbf16>, vector<1x8x4xbf16>, vector<1x8x4xf32> -> vector<1x8x4xf32>
    "tpu.trace_stop"() : () -> ()
    %34 = vector.broadcast %30 : vector<1x8x1xf32> to vector<1x8x4xf32>
    %35 = arith.mulf %34, %33 : vector<1x8x4xf32>
    %36 = vector.shape_cast %35 : vector<1x8x4xf32> to vector<8x4xf32>
    %37 = arith.truncf %36 : vector<8x4xf32> to vector<8x4xbf16>
    %c0_33 = arith.constant 0 : index
    %c0_34 = arith.constant 0 : index
    %38 = vector.load %arg12[%c0_33, %c0_34] : memref<8x32xbf16, #tpu.memory_space<vmem>>, vector<8x4xbf16>
    tpu.vector_store %arg12[%c0_33, %c0_34], %37 {strides = array<i32>} : memref<8x32xbf16, #tpu.memory_space<vmem>>, vector<8x4xbf16>,
    %c0_35 = arith.constant 0 : index
    %c0_36 = arith.constant 0 : index
    %c4 = arith.constant 4 : index
    %39 = vector.load %arg9[%c0_35, %c0_36, %c4] : memref<1x8x32xbf16, #tpu.memory_space<vmem>>, vector<1x8x4xbf16>
    %c0_37 = arith.constant 0 : index
    %c0_38 = arith.constant 0 : index
    %c4_39 = arith.constant 4 : index
    %40 = vector.load %arg10[%c0_37, %c0_38, %c4_39] : memref<1x8x32xbf16, #tpu.memory_space<vmem>>, vector<1x8x4xbf16>
    "tpu.trace_start"() <{level = 10 : i32, message = "bnd,bmd->bnm"}> : () -> ()
    %cst_40 = arith.constant dense<0.000000e+00> : vector<1x8x8xf32>
    %41 = tpu.matmul %39, %40, %cst_40 {dimension_numbers = #tpu.dot_dimension_numbers<[2], [2], [1], [1], [0, 0, 0, 1, 1, 1], [0], [0]>} : vector<1x8x4xbf16>, vector<1x8x4xbf16>, vector<1x8x8xf32> -> vector<1x8x8xf32>
    "tpu.trace_stop"() : () -> ()
    %cst_41 = arith.constant dense<0xFF800000> : vector<1x8xf32>
    %42 = vector.multi_reduction <maximumf>, %41, %cst_41 [2] : vector<1x8x8xf32> to vector<1x8xf32>
    %43 = vector.shape_cast %42 : vector<1x8xf32> to vector<1x8x1xf32>
    %44 = vector.broadcast %43 : vector<1x8x1xf32> to vector<1x8x8xf32>
    %45 = arith.subf %41, %44 : vector<1x8x8xf32>
    %46 = math.exp %45 : vector<1x8x8xf32>
    %cst_42 = arith.constant dense<0.000000e+00> : vector<1x8xf32>
    %47 = vector.multi_reduction <add>, %46, %cst_42 [2] : vector<1x8x8xf32> to vector<1x8xf32>
    %48 = vector.shape_cast %47 : vector<1x8xf32> to vector<1x8x1xf32>
    %49 = tpu.reciprocal %48 {approx = true} : vector<1x8x1xf32> -> vector<1x8x1xf32>
    %50 = arith.truncf %46 : vector<1x8x8xf32> to vector<1x8x8xbf16>
    %c0_43 = arith.constant 0 : index
    %c0_44 = arith.constant 0 : index
    %c4_45 = arith.constant 4 : index
    %51 = vector.load %arg11[%c0_43, %c0_44, %c4_45] : memref<1x8x32xbf16, #tpu.memory_space<vmem>>, vector<1x8x4xbf16>
    "tpu.trace_start"() <{level = 10 : i32, message = "bnm,bmd->bnd"}> : () -> ()
    %cst_46 = arith.constant dense<0.000000e+00> : vector<1x8x4xf32>
    %52 = tpu.matmul %50, %51, %cst_46 {dimension_numbers = #tpu.dot_dimension_numbers<[2], [1], [1], [2], [0, 0, 0, 1, 1, 2], [0], [0]>} : vector<1x8x8xbf16>, vector<1x8x4xbf16>, vector<1x8x4xf32> -> vector<1x8x4xf32>
    "tpu.trace_stop"() : () -> ()
    %53 = vector.broadcast %49 : vector<1x8x1xf32> to vector<1x8x4xf32>
    %54 = arith.mulf %53, %52 : vector<1x8x4xf32>
    %55 = vector.shape_cast %54 : vector<1x8x4xf32> to vector<8x4xf32>
    %56 = arith.truncf %55 : vector<8x4xf32> to vector<8x4xbf16>
    %c0_47 = arith.constant 0 : index
    %c4_48 = arith.constant 4 : index
    %57 = vector.load %arg12[%c0_47, %c4_48] : memref<8x32xbf16, #tpu.memory_space<vmem>>, vector<8x4xbf16>
    tpu.vector_store %arg12[%c0_47, %c4_48], %56 {strides = array<i32>} : memref<8x32xbf16, #tpu.memory_space<vmem>>, vector<8x4xbf16>,
    %c0_49 = arith.constant 0 : index
    %c0_50 = arith.constant 0 : index
    %c8 = arith.constant 8 : index
    %58 = vector.load %arg9[%c0_49, %c0_50, %c8] : memref<1x8x32xbf16, #tpu.memory_space<vmem>>, vector<1x8x4xbf16>
    %c0_51 = arith.constant 0 : index
    %c0_52 = arith.constant 0 : index
    %c8_53 = arith.constant 8 : index
    %59 = vector.load %arg10[%c0_51, %c0_52, %c8_53] : memref<1x8x32xbf16, #tpu.memory_space<vmem>>, vector<1x8x4xbf16>
    "tpu.trace_start"() <{level = 10 : i32, message = "bnd,bmd->bnm"}> : () -> ()
    %cst_54 = arith.constant dense<0.000000e+00> : vector<1x8x8xf32>
    %60 = tpu.matmul %58, %59, %cst_54 {dimension_numbers = #tpu.dot_dimension_numbers<[2], [2], [1], [1], [0, 0, 0, 1, 1, 1], [0], [0]>} : vector<1x8x4xbf16>, vector<1x8x4xbf16>, vector<1x8x8xf32> -> vector<1x8x8xf32>
    "tpu.trace_stop"() : () -> ()
    %cst_55 = arith.constant dense<0xFF800000> : vector<1x8xf32>
    %61 = vector.multi_reduction <maximumf>, %60, %cst_55 [2] : vector<1x8x8xf32> to vector<1x8xf32>
    %62 = vector.shape_cast %61 : vector<1x8xf32> to vector<1x8x1xf32>
    %63 = vector.broadcast %62 : vector<1x8x1xf32> to vector<1x8x8xf32>
    %64 = arith.subf %60, %63 : vector<1x8x8xf32>
    %65 = math.exp %64 : vector<1x8x8xf32>
    %cst_56 = arith.constant dense<0.000000e+00> : vector<1x8xf32>
    %66 = vector.multi_reduction <add>, %65, %cst_56 [2] : vector<1x8x8xf32> to vector<1x8xf32>
    %67 = vector.shape_cast %66 : vector<1x8xf32> to vector<1x8x1xf32>
    %68 = tpu.reciprocal %67 {approx = true} : vector<1x8x1xf32> -> vector<1x8x1xf32>
    %69 = arith.truncf %65 : vector<1x8x8xf32> to vector<1x8x8xbf16>
    %c0_57 = arith.constant 0 : index
    %c0_58 = arith.constant 0 : index
    %c8_59 = arith.constant 8 : index
    %70 = vector.load %arg11[%c0_57, %c0_58, %c8_59] : memref<1x8x32xbf16, #tpu.memory_space<vmem>>, vector<1x8x4xbf16>
    "tpu.trace_start"() <{level = 10 : i32, message = "bnm,bmd->bnd"}> : () -> ()
    %cst_60 = arith.constant dense<0.000000e+00> : vector<1x8x4xf32>
    %71 = tpu.matmul %69, %70, %cst_60 {dimension_numbers = #tpu.dot_dimension_numbers<[2], [1], [1], [2], [0, 0, 0, 1, 1, 2], [0], [0]>} : vector<1x8x8xbf16>, vector<1x8x4xbf16>, vector<1x8x4xf32> -> vector<1x8x4xf32>
    "tpu.trace_stop"() : () -> ()
    %72 = vector.broadcast %68 : vector<1x8x1xf32> to vector<1x8x4xf32>
    %73 = arith.mulf %72, %71 : vector<1x8x4xf32>
    %74 = vector.shape_cast %73 : vector<1x8x4xf32> to vector<8x4xf32>
    %75 = arith.truncf %74 : vector<8x4xf32> to vector<8x4xbf16>
    %c0_61 = arith.constant 0 : index
    %c8_62 = arith.constant 8 : index
    %76 = vector.load %arg12[%c0_61, %c8_62] : memref<8x32xbf16, #tpu.memory_space<vmem>>, vector<8x4xbf16>
    tpu.vector_store %arg12[%c0_61, %c8_62], %75 {strides = array<i32>} : memref<8x32xbf16, #tpu.memory_space<vmem>>, vector<8x4xbf16>,
    %c0_63 = arith.constant 0 : index
    %c0_64 = arith.constant 0 : index
    %c12 = arith.constant 12 : index
    %77 = vector.load %arg9[%c0_63, %c0_64, %c12] : memref<1x8x32xbf16, #tpu.memory_space<vmem>>, vector<1x8x4xbf16>
    %c0_65 = arith.constant 0 : index
    %c0_66 = arith.constant 0 : index
    %c12_67 = arith.constant 12 : index
    %78 = vector.load %arg10[%c0_65, %c0_66, %c12_67] : memref<1x8x32xbf16, #tpu.memory_space<vmem>>, vector<1x8x4xbf16>
    "tpu.trace_start"() <{level = 10 : i32, message = "bnd,bmd->bnm"}> : () -> ()
    %cst_68 = arith.constant dense<0.000000e+00> : vector<1x8x8xf32>
    %79 = tpu.matmul %77, %78, %cst_68 {dimension_numbers = #tpu.dot_dimension_numbers<[2], [2], [1], [1], [0, 0, 0, 1, 1, 1], [0], [0]>} : vector<1x8x4xbf16>, vector<1x8x4xbf16>, vector<1x8x8xf32> -> vector<1x8x8xf32>
    "tpu.trace_stop"() : () -> ()
    %cst_69 = arith.constant dense<0xFF800000> : vector<1x8xf32>
    %80 = vector.multi_reduction <maximumf>, %79, %cst_69 [2] : vector<1x8x8xf32> to vector<1x8xf32>
    %81 = vector.shape_cast %80 : vector<1x8xf32> to vector<1x8x1xf32>
    %82 = vector.broadcast %81 : vector<1x8x1xf32> to vector<1x8x8xf32>
    %83 = arith.subf %79, %82 : vector<1x8x8xf32>
    %84 = math.exp %83 : vector<1x8x8xf32>
    %cst_70 = arith.constant dense<0.000000e+00> : vector<1x8xf32>
    %85 = vector.multi_reduction <add>, %84, %cst_70 [2] : vector<1x8x8xf32> to vector<1x8xf32>
    %86 = vector.shape_cast %85 : vector<1x8xf32> to vector<1x8x1xf32>
    %87 = tpu.reciprocal %86 {approx = true} : vector<1x8x1xf32> -> vector<1x8x1xf32>
    %88 = arith.truncf %84 : vector<1x8x8xf32> to vector<1x8x8xbf16>
    %c0_71 = arith.constant 0 : index
    %c0_72 = arith.constant 0 : index
    %c12_73 = arith.constant 12 : index
    %89 = vector.load %arg11[%c0_71, %c0_72, %c12_73] : memref<1x8x32xbf16, #tpu.memory_space<vmem>>, vector<1x8x4xbf16>
    "tpu.trace_start"() <{level = 10 : i32, message = "bnm,bmd->bnd"}> : () -> ()
    %cst_74 = arith.constant dense<0.000000e+00> : vector<1x8x4xf32>
    %90 = tpu.matmul %88, %89, %cst_74 {dimension_numbers = #tpu.dot_dimension_numbers<[2], [1], [1], [2], [0, 0, 0, 1, 1, 2], [0], [0]>} : vector<1x8x8xbf16>, vector<1x8x4xbf16>, vector<1x8x4xf32> -> vector<1x8x4xf32>
    "tpu.trace_stop"() : () -> ()
    %91 = vector.broadcast %87 : vector<1x8x1xf32> to vector<1x8x4xf32>
    %92 = arith.mulf %91, %90 : vector<1x8x4xf32>
    %93 = vector.shape_cast %92 : vector<1x8x4xf32> to vector<8x4xf32>
    %94 = arith.truncf %93 : vector<8x4xf32> to vector<8x4xbf16>
    %c0_75 = arith.constant 0 : index
    %c12_76 = arith.constant 12 : index
    %95 = vector.load %arg12[%c0_75, %c12_76] : memref<8x32xbf16, #tpu.memory_space<vmem>>, vector<8x4xbf16>
    tpu.vector_store %arg12[%c0_75, %c12_76], %94 {strides = array<i32>} : memref<8x32xbf16, #tpu.memory_space<vmem>>, vector<8x4xbf16>,
    %c0_77 = arith.constant 0 : index
    %c0_78 = arith.constant 0 : index
    %c16 = arith.constant 16 : index
    %96 = vector.load %arg9[%c0_77, %c0_78, %c16] : memref<1x8x32xbf16, #tpu.memory_space<vmem>>, vector<1x8x4xbf16>
    %c0_79 = arith.constant 0 : index
    %c0_80 = arith.constant 0 : index
    %c16_81 = arith.constant 16 : index
    %97 = vector.load %arg10[%c0_79, %c0_80, %c16_81] : memref<1x8x32xbf16, #tpu.memory_space<vmem>>, vector<1x8x4xbf16>
    "tpu.trace_start"() <{level = 10 : i32, message = "bnd,bmd->bnm"}> : () -> ()
    %cst_82 = arith.constant dense<0.000000e+00> : vector<1x8x8xf32>
    %98 = tpu.matmul %96, %97, %cst_82 {dimension_numbers = #tpu.dot_dimension_numbers<[2], [2], [1], [1], [0, 0, 0, 1, 1, 1], [0], [0]>} : vector<1x8x4xbf16>, vector<1x8x4xbf16>, vector<1x8x8xf32> -> vector<1x8x8xf32>
    "tpu.trace_stop"() : () -> ()
    %cst_83 = arith.constant dense<0xFF800000> : vector<1x8xf32>
    %99 = vector.multi_reduction <maximumf>, %98, %cst_83 [2] : vector<1x8x8xf32> to vector<1x8xf32>
    %100 = vector.shape_cast %99 : vector<1x8xf32> to vector<1x8x1xf32>
    %101 = vector.broadcast %100 : vector<1x8x1xf32> to vector<1x8x8xf32>
    %102 = arith.subf %98, %101 : vector<1x8x8xf32>
    %103 = math.exp %102 : vector<1x8x8xf32>
    %cst_84 = arith.constant dense<0.000000e+00> : vector<1x8xf32>
    %104 = vector.multi_reduction <add>, %103, %cst_84 [2] : vector<1x8x8xf32> to vector<1x8xf32>
    %105 = vector.shape_cast %104 : vector<1x8xf32> to vector<1x8x1xf32>
    %106 = tpu.reciprocal %105 {approx = true} : vector<1x8x1xf32> -> vector<1x8x1xf32>
    %107 = arith.truncf %103 : vector<1x8x8xf32> to vector<1x8x8xbf16>
    %c0_85 = arith.constant 0 : index
    %c0_86 = arith.constant 0 : index
    %c16_87 = arith.constant 16 : index
    %108 = vector.load %arg11[%c0_85, %c0_86, %c16_87] : memref<1x8x32xbf16, #tpu.memory_space<vmem>>, vector<1x8x4xbf16>
    "tpu.trace_start"() <{level = 10 : i32, message = "bnm,bmd->bnd"}> : () -> ()
    %cst_88 = arith.constant dense<0.000000e+00> : vector<1x8x4xf32>
    %109 = tpu.matmul %107, %108, %cst_88 {dimension_numbers = #tpu.dot_dimension_numbers<[2], [1], [1], [2], [0, 0, 0, 1, 1, 2], [0], [0]>} : vector<1x8x8xbf16>, vector<1x8x4xbf16>, vector<1x8x4xf32> -> vector<1x8x4xf32>
    "tpu.trace_stop"() : () -> ()
    %110 = vector.broadcast %106 : vector<1x8x1xf32> to vector<1x8x4xf32>
    %111 = arith.mulf %110, %109 : vector<1x8x4xf32>
    %112 = vector.shape_cast %111 : vector<1x8x4xf32> to vector<8x4xf32>
    %113 = arith.truncf %112 : vector<8x4xf32> to vector<8x4xbf16>
    %c0_89 = arith.constant 0 : index
    %c16_90 = arith.constant 16 : index
    %114 = vector.load %arg12[%c0_89, %c16_90] : memref<8x32xbf16, #tpu.memory_space<vmem>>, vector<8x4xbf16>
    tpu.vector_store %arg12[%c0_89, %c16_90], %113 {strides = array<i32>} : memref<8x32xbf16, #tpu.memory_space<vmem>>, vector<8x4xbf16>,
    %c0_91 = arith.constant 0 : index
    %c0_92 = arith.constant 0 : index
    %c20 = arith.constant 20 : index
    %115 = vector.load %arg9[%c0_91, %c0_92, %c20] : memref<1x8x32xbf16, #tpu.memory_space<vmem>>, vector<1x8x4xbf16>
    %c0_93 = arith.constant 0 : index
    %c0_94 = arith.constant 0 : index
    %c20_95 = arith.constant 20 : index
    %116 = vector.load %arg10[%c0_93, %c0_94, %c20_95] : memref<1x8x32xbf16, #tpu.memory_space<vmem>>, vector<1x8x4xbf16>
    "tpu.trace_start"() <{level = 10 : i32, message = "bnd,bmd->bnm"}> : () -> ()
    %cst_96 = arith.constant dense<0.000000e+00> : vector<1x8x8xf32>
    %117 = tpu.matmul %115, %116, %cst_96 {dimension_numbers = #tpu.dot_dimension_numbers<[2], [2], [1], [1], [0, 0, 0, 1, 1, 1], [0], [0]>} : vector<1x8x4xbf16>, vector<1x8x4xbf16>, vector<1x8x8xf32> -> vector<1x8x8xf32>
    "tpu.trace_stop"() : () -> ()
    %cst_97 = arith.constant dense<0xFF800000> : vector<1x8xf32>
    %118 = vector.multi_reduction <maximumf>, %117, %cst_97 [2] : vector<1x8x8xf32> to vector<1x8xf32>
    %119 = vector.shape_cast %118 : vector<1x8xf32> to vector<1x8x1xf32>
    %120 = vector.broadcast %119 : vector<1x8x1xf32> to vector<1x8x8xf32>
    %121 = arith.subf %117, %120 : vector<1x8x8xf32>
    %122 = math.exp %121 : vector<1x8x8xf32>
    %cst_98 = arith.constant dense<0.000000e+00> : vector<1x8xf32>
    %123 = vector.multi_reduction <add>, %122, %cst_98 [2] : vector<1x8x8xf32> to vector<1x8xf32>
    %124 = vector.shape_cast %123 : vector<1x8xf32> to vector<1x8x1xf32>
    %125 = tpu.reciprocal %124 {approx = true} : vector<1x8x1xf32> -> vector<1x8x1xf32>
    %126 = arith.truncf %122 : vector<1x8x8xf32> to vector<1x8x8xbf16>
    %c0_99 = arith.constant 0 : index
    %c0_100 = arith.constant 0 : index
    %c20_101 = arith.constant 20 : index
    %127 = vector.load %arg11[%c0_99, %c0_100, %c20_101] : memref<1x8x32xbf16, #tpu.memory_space<vmem>>, vector<1x8x4xbf16>
    "tpu.trace_start"() <{level = 10 : i32, message = "bnm,bmd->bnd"}> : () -> ()
    %cst_102 = arith.constant dense<0.000000e+00> : vector<1x8x4xf32>
    %128 = tpu.matmul %126, %127, %cst_102 {dimension_numbers = #tpu.dot_dimension_numbers<[2], [1], [1], [2], [0, 0, 0, 1, 1, 2], [0], [0]>} : vector<1x8x8xbf16>, vector<1x8x4xbf16>, vector<1x8x4xf32> -> vector<1x8x4xf32>
    "tpu.trace_stop"() : () -> ()
    %129 = vector.broadcast %125 : vector<1x8x1xf32> to vector<1x8x4xf32>
    %130 = arith.mulf %129, %128 : vector<1x8x4xf32>
    %131 = vector.shape_cast %130 : vector<1x8x4xf32> to vector<8x4xf32>
    %132 = arith.truncf %131 : vector<8x4xf32> to vector<8x4xbf16>
    %c0_103 = arith.constant 0 : index
    %c20_104 = arith.constant 20 : index
    %133 = vector.load %arg12[%c0_103, %c20_104] : memref<8x32xbf16, #tpu.memory_space<vmem>>, vector<8x4xbf16>
    tpu.vector_store %arg12[%c0_103, %c20_104], %132 {strides = array<i32>} : memref<8x32xbf16, #tpu.memory_space<vmem>>, vector<8x4xbf16>,
    %c0_105 = arith.constant 0 : index
    %c0_106 = arith.constant 0 : index
    %c24 = arith.constant 24 : index
    %134 = vector.load %arg9[%c0_105, %c0_106, %c24] : memref<1x8x32xbf16, #tpu.memory_space<vmem>>, vector<1x8x4xbf16>
    %c0_107 = arith.constant 0 : index
    %c0_108 = arith.constant 0 : index
    %c24_109 = arith.constant 24 : index
    %135 = vector.load %arg10[%c0_107, %c0_108, %c24_109] : memref<1x8x32xbf16, #tpu.memory_space<vmem>>, vector<1x8x4xbf16>
    "tpu.trace_start"() <{level = 10 : i32, message = "bnd,bmd->bnm"}> : () -> ()
    %cst_110 = arith.constant dense<0.000000e+00> : vector<1x8x8xf32>
    %136 = tpu.matmul %134, %135, %cst_110 {dimension_numbers = #tpu.dot_dimension_numbers<[2], [2], [1], [1], [0, 0, 0, 1, 1, 1], [0], [0]>} : vector<1x8x4xbf16>, vector<1x8x4xbf16>, vector<1x8x8xf32> -> vector<1x8x8xf32>
    "tpu.trace_stop"() : () -> ()
    %cst_111 = arith.constant dense<0xFF800000> : vector<1x8xf32>
    %137 = vector.multi_reduction <maximumf>, %136, %cst_111 [2] : vector<1x8x8xf32> to vector<1x8xf32>
    %138 = vector.shape_cast %137 : vector<1x8xf32> to vector<1x8x1xf32>
    %139 = vector.broadcast %138 : vector<1x8x1xf32> to vector<1x8x8xf32>
    %140 = arith.subf %136, %139 : vector<1x8x8xf32>
    %141 = math.exp %140 : vector<1x8x8xf32>
    %cst_112 = arith.constant dense<0.000000e+00> : vector<1x8xf32>
    %142 = vector.multi_reduction <add>, %141, %cst_112 [2] : vector<1x8x8xf32> to vector<1x8xf32>
    %143 = vector.shape_cast %142 : vector<1x8xf32> to vector<1x8x1xf32>
    %144 = tpu.reciprocal %143 {approx = true} : vector<1x8x1xf32> -> vector<1x8x1xf32>
    %145 = arith.truncf %141 : vector<1x8x8xf32> to vector<1x8x8xbf16>
    %c0_113 = arith.constant 0 : index
    %c0_114 = arith.constant 0 : index
    %c24_115 = arith.constant 24 : index
    %146 = vector.load %arg11[%c0_113, %c0_114, %c24_115] : memref<1x8x32xbf16, #tpu.memory_space<vmem>>, vector<1x8x4xbf16>
    "tpu.trace_start"() <{level = 10 : i32, message = "bnm,bmd->bnd"}> : () -> ()
    %cst_116 = arith.constant dense<0.000000e+00> : vector<1x8x4xf32>
    %147 = tpu.matmul %145, %146, %cst_116 {dimension_numbers = #tpu.dot_dimension_numbers<[2], [1], [1], [2], [0, 0, 0, 1, 1, 2], [0], [0]>} : vector<1x8x8xbf16>, vector<1x8x4xbf16>, vector<1x8x4xf32> -> vector<1x8x4xf32>
    "tpu.trace_stop"() : () -> ()
    %148 = vector.broadcast %144 : vector<1x8x1xf32> to vector<1x8x4xf32>
    %149 = arith.mulf %148, %147 : vector<1x8x4xf32>
    %150 = vector.shape_cast %149 : vector<1x8x4xf32> to vector<8x4xf32>
    %151 = arith.truncf %150 : vector<8x4xf32> to vector<8x4xbf16>
    %c0_117 = arith.constant 0 : index
    %c24_118 = arith.constant 24 : index
    %152 = vector.load %arg12[%c0_117, %c24_118] : memref<8x32xbf16, #tpu.memory_space<vmem>>, vector<8x4xbf16>
    tpu.vector_store %arg12[%c0_117, %c24_118], %151 {strides = array<i32>} : memref<8x32xbf16, #tpu.memory_space<vmem>>, vector<8x4xbf16>,
    %c0_119 = arith.constant 0 : index
    %c0_120 = arith.constant 0 : index
    %c28 = arith.constant 28 : index
    %153 = vector.load %arg9[%c0_119, %c0_120, %c28] : memref<1x8x32xbf16, #tpu.memory_space<vmem>>, vector<1x8x4xbf16>
    %c0_121 = arith.constant 0 : index
    %c0_122 = arith.constant 0 : index
    %c28_123 = arith.constant 28 : index
    %154 = vector.load %arg10[%c0_121, %c0_122, %c28_123] : memref<1x8x32xbf16, #tpu.memory_space<vmem>>, vector<1x8x4xbf16>
    "tpu.trace_start"() <{level = 10 : i32, message = "bnd,bmd->bnm"}> : () -> ()
    %cst_124 = arith.constant dense<0.000000e+00> : vector<1x8x8xf32>
    %155 = tpu.matmul %153, %154, %cst_124 {dimension_numbers = #tpu.dot_dimension_numbers<[2], [2], [1], [1], [0, 0, 0, 1, 1, 1], [0], [0]>} : vector<1x8x4xbf16>, vector<1x8x4xbf16>, vector<1x8x8xf32> -> vector<1x8x8xf32>
    "tpu.trace_stop"() : () -> ()
    %cst_125 = arith.constant dense<0xFF800000> : vector<1x8xf32>
    %156 = vector.multi_reduction <maximumf>, %155, %cst_125 [2] : vector<1x8x8xf32> to vector<1x8xf32>
    %157 = vector.shape_cast %156 : vector<1x8xf32> to vector<1x8x1xf32>
    %158 = vector.broadcast %157 : vector<1x8x1xf32> to vector<1x8x8xf32>
    %159 = arith.subf %155, %158 : vector<1x8x8xf32>
    %160 = math.exp %159 : vector<1x8x8xf32>
    %cst_126 = arith.constant dense<0.000000e+00> : vector<1x8xf32>
    %161 = vector.multi_reduction <add>, %160, %cst_126 [2] : vector<1x8x8xf32> to vector<1x8xf32>
    %162 = vector.shape_cast %161 : vector<1x8xf32> to vector<1x8x1xf32>
    %163 = tpu.reciprocal %162 {approx = true} : vector<1x8x1xf32> -> vector<1x8x1xf32>
    %164 = arith.truncf %160 : vector<1x8x8xf32> to vector<1x8x8xbf16>
    %c0_127 = arith.constant 0 : index
    %c0_128 = arith.constant 0 : index
    %c28_129 = arith.constant 28 : index
    %165 = vector.load %arg11[%c0_127, %c0_128, %c28_129] : memref<1x8x32xbf16, #tpu.memory_space<vmem>>, vector<1x8x4xbf16>
    "tpu.trace_start"() <{level = 10 : i32, message = "bnm,bmd->bnd"}> : () -> ()
    %cst_130 = arith.constant dense<0.000000e+00> : vector<1x8x4xf32>
    %166 = tpu.matmul %164, %165, %cst_130 {dimension_numbers = #tpu.dot_dimension_numbers<[2], [1], [1], [2], [0, 0, 0, 1, 1, 2], [0], [0]>} : vector<1x8x8xbf16>, vector<1x8x4xbf16>, vector<1x8x4xf32> -> vector<1x8x4xf32>
    "tpu.trace_stop"() : () -> ()
    %167 = vector.broadcast %163 : vector<1x8x1xf32> to vector<1x8x4xf32>
    %168 = arith.mulf %167, %166 : vector<1x8x4xf32>
    %169 = vector.shape_cast %168 : vector<1x8x4xf32> to vector<8x4xf32>
    %170 = arith.truncf %169 : vector<8x4xf32> to vector<8x4xbf16>
    %c0_131 = arith.constant 0 : index
    %c28_132 = arith.constant 28 : index
    %171 = vector.load %arg12[%c0_131, %c28_132] : memref<8x32xbf16, #tpu.memory_space<vmem>>, vector<8x4xbf16>
    tpu.vector_store %arg12[%c0_131, %c28_132], %170 {strides = array<i32>} : memref<8x32xbf16, #tpu.memory_space<vmem>>, vector<8x4xbf16>,
    %c0_133 = arith.constant 0 : index
    %c0_134 = arith.constant 0 : index
    %172 = vector.load %arg12[%c0_133, %c0_134] : memref<8x32xbf16, #tpu.memory_space<vmem>>, vector<8x32xbf16>
    %c0_135 = arith.constant 0 : index
    %c0_136 = arith.constant 0 : index
    %173 = vector.load %arg6[%c0_135, %c0_136] : memref<32x32xbf16, #tpu.memory_space<vmem>>, vector<32x32xbf16>
    %cst_137 = arith.constant dense<0.000000e+00> : vector<8x32xf32>
    %174 = tpu.matmul %172, %173, %cst_137 {dimension_numbers = #tpu.dot_dimension_numbers<[1], [0], [0], [1], [0, 0, 1, 1], [], []>} : vector<8x32xbf16>, vector<32x32xbf16>, vector<8x32xf32> -> vector<8x32xf32>
    %c0_138 = arith.constant 0 : index
    %c0_139 = arith.constant 0 : index
    %175 = vector.load %arg7[%c0_138, %c0_139] : memref<1x32xf32, #tpu.memory_space<vmem>>, vector<1x32xf32>
    %176 = vector.broadcast %175 : vector<1x32xf32> to vector<8x32xf32>
    %177 = arith.addf %174, %176 : vector<8x32xf32>
    %178 = vector.shape_cast %177 : vector<8x32xf32> to vector<1x8x32xf32>
    %c0_140 = arith.constant 0 : index
    %c0_141 = arith.constant 0 : index
    %c0_142 = arith.constant 0 : index
    %179 = vector.load %arg8[%c0_140, %c0_141, %c0_142] : memref<1x8x32xf32, #tpu.memory_space<vmem>>, vector<1x8x32xf32>
    tpu.vector_store %arg8[%c0_140, %c0_141, %c0_142], %178 {strides = array<i32>} : memref<1x8x32xf32, #tpu.memory_space<vmem>>, vector<1x8x32xf32>,
    return
  }
  func.func @transform_0(%arg0: i32, %arg1: i32) -> (i32, i32, i32) {
    %c0_i32 = arith.constant 0 : i32
    %c0_i32_0 = arith.constant 0 : i32
    %c0_i32_1 = arith.constant 0 : i32
    return %arg0, %c0_i32, %c0_i32_0 : i32, i32, i32
  }
  func.func @transform_1(%arg0: i32, %arg1: i32) -> (i32, i32) {
    %c0_i32 = arith.constant 0 : i32
    %c0_i32_0 = arith.constant 0 : i32
    %c0_i32_1 = arith.constant 0 : i32
    return %c0_i32, %c0_i32_0 : i32, i32
  }
  func.func @transform_2(%arg0: i32, %arg1: i32) -> (i32, i32) {
    %c0_i32 = arith.constant 0 : i32
    %c0_i32_0 = arith.constant 0 : i32
    %c0_i32_1 = arith.constant 0 : i32
    return %c0_i32, %c0_i32_0 : i32, i32
  }
  func.func @transform_3(%arg0: i32, %arg1: i32) -> (i32, i32) {
    %c0_i32 = arith.constant 0 : i32
    %c0_i32_0 = arith.constant 0 : i32
    %c0_i32_1 = arith.constant 0 : i32
    return %c0_i32, %c0_i32_0 : i32, i32
  }
  func.func @transform_4(%arg0: i32, %arg1: i32) -> (i32, i32) {
    %c0_i32 = arith.constant 0 : i32
    %c0_i32_0 = arith.constant 0 : i32
    %c0_i32_1 = arith.constant 0 : i32
    return %c0_i32, %c0_i32_0 : i32, i32
  }
  func.func @transform_5(%arg0: i32, %arg1: i32) -> (i32, i32) {
    %c0_i32 = arith.constant 0 : i32
    %c0_i32_0 = arith.constant 0 : i32
    %c0_i32_1 = arith.constant 0 : i32
    return %c0_i32, %c0_i32_0 : i32, i32
  }
  func.func @transform_6(%arg0: i32, %arg1: i32) -> (i32, i32, i32) {
    %c0_i32 = arith.constant 0 : i32
    %c0_i32_0 = arith.constant 0 : i32
    return %arg0, %arg1, %c0_i32 : i32, i32, i32
  }
}

module attributes {stable_mosaic.version = 11 : i64} {
  func.func @_attention_kernel(%arg0: i32, %arg1: i32, %arg2: memref<1x8x32xf32, #tpu.memory_space<vmem>>, %arg3: memref<32x32xbf16, #tpu.memory_space<vmem>>, %arg4: memref<32x32xbf16, #tpu.memory_space<vmem>>, %arg5: memref<32x32xbf16, #tpu.memory_space<vmem>>, %arg6: memref<32x32xbf16, #tpu.memory_space<vmem>>, %arg7: memref<1x32xf32, #tpu.memory_space<vmem>>, %arg8: memref<1x8x32xf32, #tpu.memory_space<vmem>>, %arg9: memref<1x8x32xbf16, #tpu.memory_space<vmem>>, %arg10: memref<1x8x32xbf16, #tpu.memory_space<vmem>>, %arg11: memref<1x8x32xbf16, #tpu.memory_space<vmem>>, %arg12: memref<8x32xbf16, #tpu.memory_space<vmem>>) attributes {dimension_semantics = [#tpu.dimension_semantics<parallel>, #tpu.dimension_semantics<parallel>], iteration_bounds = array<i64: 2, 1>, scalar_prefetch = 0 : i64, scratch_operands = 4 : i64, tpu.core_type = #tpu.core_type<tc>, window_params = [{transform_indices = @transform_0, window_bounds = array<i64: 1, 8, 32>}, {pipeline_mode = #tpu.pipeline_mode<synchronous>, transform_indices = @transform_1, window_bounds = array<i64: 32, 32>}, {pipeline_mode = #tpu.pipeline_mode<synchronous>, transform_indices = @transform_2, window_bounds = array<i64: 32, 32>}, {pipeline_mode = #tpu.pipeline_mode<synchronous>, transform_indices = @transform_3, window_bounds = array<i64: 32, 32>}, {pipeline_mode = #tpu.pipeline_mode<synchronous>, transform_indices = @transform_4, window_bounds = array<i64: 32, 32>}, {pipeline_mode = #tpu.pipeline_mode<synchronous>, transform_indices = @transform_5, window_bounds = array<i64: 1, 32>}, {transform_indices = @transform_6, window_bounds = array<i64: 1, 8, 32>}]} {
    %c0 = arith.constant 0 : index
    %c0_0 = arith.constant 0 : index
    %c0_1 = arith.constant 0 : index
    %0 = vector.load %arg2[%c0, %c0_0, %c0_1] : memref<1x8x32xf32, #tpu.memory_space<vmem>>, vector<1x8x32xf32>
    %1 = arith.truncf %0 : vector<1x8x32xf32> to vector<1x8x32xbf16>
    %2 = vector.shape_cast %1 : vector<1x8x32xbf16> to vector<8x32xbf16>
    %c0_2 = arith.constant 0 : index
    %c0_3 = arith.constant 0 : index
    %3 = vector.load %arg4[%c0_2, %c0_3] : memref<32x32xbf16, #tpu.memory_space<vmem>>, vector<32x32xbf16>
    %cst = arith.constant dense<0.000000e+00> : vector<8x32xf32>
    %4 = tpu.matmul %2, %3, %cst {dimension_numbers = #tpu.dot_dimension_numbers<[1], [0], [0], [1], [0, 0, 1, 1], [], []>} : vector<8x32xbf16>, vector<32x32xbf16>, vector<8x32xf32> -> vector<8x32xf32>
    %5 = arith.truncf %4 : vector<8x32xf32> to vector<8x32xbf16>
    %6 = vector.shape_cast %5 : vector<8x32xbf16> to vector<1x8x32xbf16>
    %c0_4 = arith.constant 0 : index
    %c0_5 = arith.constant 0 : index
    %c0_6 = arith.constant 0 : index
    %7 = vector.load %arg10[%c0_4, %c0_5, %c0_6] : memref<1x8x32xbf16, #tpu.memory_space<vmem>>, vector<1x8x32xbf16>
    tpu.vector_store %arg10[%c0_4, %c0_5, %c0_6], %6 {strides = array<i32>} : memref<1x8x32xbf16, #tpu.memory_space<vmem>>, vector<1x8x32xbf16>,
    %c0_7 = arith.constant 0 : index
    %c0_8 = arith.constant 0 : index
    %8 = vector.load %arg5[%c0_7, %c0_8] : memref<32x32xbf16, #tpu.memory_space<vmem>>, vector<32x32xbf16>
    %cst_9 = arith.constant dense<0.000000e+00> : vector<8x32xf32>
    %9 = tpu.matmul %2, %8, %cst_9 {dimension_numbers = #tpu.dot_dimension_numbers<[1], [0], [0], [1], [0, 0, 1, 1], [], []>} : vector<8x32xbf16>, vector<32x32xbf16>, vector<8x32xf32> -> vector<8x32xf32>
    %10 = arith.truncf %9 : vector<8x32xf32> to vector<8x32xbf16>
    %11 = vector.shape_cast %10 : vector<8x32xbf16> to vector<1x8x32xbf16>
    %c0_10 = arith.constant 0 : index
    %c0_11 = arith.constant 0 : index
    %c0_12 = arith.constant 0 : index
    %12 = vector.load %arg11[%c0_10, %c0_11, %c0_12] : memref<1x8x32xbf16, #tpu.memory_space<vmem>>, vector<1x8x32xbf16>
    tpu.vector_store %arg11[%c0_10, %c0_11, %c0_12], %11 {strides = array<i32>} : memref<1x8x32xbf16, #tpu.memory_space<vmem>>, vector<1x8x32xbf16>,
    %c0_13 = arith.constant 0 : index
    %c0_14 = arith.constant 0 : index
    %13 = vector.load %arg3[%c0_13, %c0_14] : memref<32x32xbf16, #tpu.memory_space<vmem>>, vector<32x32xbf16>
    %cst_15 = arith.constant dense<0.000000e+00> : vector<8x32xf32>
    %14 = tpu.matmul %2, %13, %cst_15 {dimension_numbers = #tpu.dot_dimension_numbers<[1], [0], [0], [1], [0, 0, 1, 1], [], []>} : vector<8x32xbf16>, vector<32x32xbf16>, vector<8x32xf32> -> vector<8x32xf32>
    %cst_16 = arith.constant 5.000000e-01 : f32
    %15 = vector.broadcast %cst_16 : f32 to vector<8x32xf32>
    %16 = arith.mulf %14, %15 : vector<8x32xf32>
    %17 = arith.truncf %16 : vector<8x32xf32> to vector<8x32xbf16>
    %18 = vector.shape_cast %17 : vector<8x32xbf16> to vector<1x8x32xbf16>
    %c0_17 = arith.constant 0 : index
    %c0_18 = arith.constant 0 : index
    %c0_19 = arith.constant 0 : index
    %19 = vector.load %arg9[%c0_17, %c0_18, %c0_19] : memref<1x8x32xbf16, #tpu.memory_space<vmem>>, vector<1x8x32xbf16>
    tpu.vector_store %arg9[%c0_17, %c0_18, %c0_19], %18 {strides = array<i32>} : memref<1x8x32xbf16, #tpu.memory_space<vmem>>, vector<1x8x32xbf16>,
    %c0_20 = arith.constant 0 : index
    %c0_21 = arith.constant 0 : index
    %c0_22 = arith.constant 0 : index
    %20 = vector.load %arg9[%c0_20, %c0_21, %c0_22] : memref<1x8x32xbf16, #tpu.memory_space<vmem>>, vector<1x8x4xbf16>
    %c0_23 = arith.constant 0 : index
    %c0_24 = arith.constant 0 : index
    %c0_25 = arith.constant 0 : index
    %21 = vector.load %arg10[%c0_23, %c0_24, %c0_25] : memref<1x8x32xbf16, #tpu.memory_space<vmem>>, vector<1x8x4xbf16>
    "tpu.trace_start"() <{level = 10 : i32, message = "bnd,bmd->bnm"}> : () -> ()
    %cst_26 = arith.constant dense<0.000000e+00> : vector<1x8x8xf32>
    %22 = tpu.matmul %20, %21, %cst_26 {dimension_numbers = #tpu.dot_dimension_numbers<[2], [2], [1], [1], [0, 0, 0, 1, 1, 1], [0], [0]>} : vector<1x8x4xbf16>, vector<1x8x4xbf16>, vector<1x8x8xf32> -> vector<1x8x8xf32>
    "tpu.trace_stop"() : () -> ()
    %cst_27 = arith.constant dense<0xFF800000> : vector<1x8xf32>
    %23 = vector.multi_reduction <maximumf>, %22, %cst_27 [2] : vector<1x8x8xf32> to vector<1x8xf32>
    %24 = vector.shape_cast %23 : vector<1x8xf32> to vector<1x8x1xf32>
    %25 = vector.broadcast %24 : vector<1x8x1xf32> to vector<1x8x8xf32>
    %26 = arith.subf %22, %25 : vector<1x8x8xf32>
    %27 = math.exp %26 : vector<1x8x8xf32>
    %cst_28 = arith.constant dense<0.000000e+00> : vector<1x8xf32>
    %28 = vector.multi_reduction <add>, %27, %cst_28 [2] : vector<1x8x8xf32> to vector<1x8xf32>
    %29 = vector.shape_cast %28 : vector<1x8xf32> to vector<1x8x1xf32>
    %30 = tpu.reciprocal %29 {approx = true} : vector<1x8x1xf32> -> vector<1x8x1xf32>
    %31 = arith.truncf %27 : vector<1x8x8xf32> to vector<1x8x8xbf16>
    %c0_29 = arith.constant 0 : index
    %c0_30 = arith.constant 0 : index
    %c0_31 = arith.constant 0 : index
    %32 = vector.load %arg11[%c0_29, %c0_30, %c0_31] : memref<1x8x32xbf16, #tpu.memory_space<vmem>>, vector<1x8x4xbf16>
    "tpu.trace_start"() <{level = 10 : i32, message = "bnm,bmd->bnd"}> : () -> ()
    %cst_32 = arith.constant dense<0.000000e+00> : vector<1x8x4xf32>
    %33 = tpu.matmul %31, %32, %cst_32 {dimension_numbers = #tpu.dot_dimension_numbers<[2], [1], [1], [2], [0, 0, 0, 1, 1, 2], [0], [0]>} : vector<1x8x8xbf16>, vector<1x8x4xbf16>, vector<1x8x4xf32> -> vector<1x8x4xf32>
    "tpu.trace_stop"() : () -> ()
    %34 = vector.broadcast %30 : vector<1x8x1xf32> to vector<1x8x4xf32>
    %35 = arith.mulf %34, %33 : vector<1x8x4xf32>
    %36 = vector.shape_cast %35 : vector<1x8x4xf32> to vector<8x4xf32>
    %37 = arith.truncf %36 : vector<8x4xf32> to vector<8x4xbf16>
    %c0_33 = arith.constant 0 : index
    %c0_34 = arith.constant 0 : index
    %38 = vector.load %arg12[%c0_33, %c0_34] : memref<8x32xbf16, #tpu.memory_space<vmem>>, vector<8x4xbf16>
    tpu.vector_store %arg12[%c0_33, %c0_34], %37 {strides = array<i32>} : memref<8x32xbf16, #tpu.memory_space<vmem>>, vector<8x4xbf16>,
    %c0_35 = arith.constant 0 : index
    %c0_36 = arith.constant 0 : index
    %c4 = arith.constant 4 : index
    %39 = vector.load %arg9[%c0_35, %c0_36, %c4] : memref<1x8x32xbf16, #tpu.memory_space<vmem>>, vector<1x8x4xbf16>
    %c0_37 = arith.constant 0 : index
    %c0_38 = arith.constant 0 : index
    %c4_39 = arith.constant 4 : index
    %40 = vector.load %arg10[%c0_37, %c0_38, %c4_39] : memref<1x8x32xbf16, #tpu.memory_space<vmem>>, vector<1x8x4xbf16>
    "tpu.trace_start"() <{level = 10 : i32, message = "bnd,bmd->bnm"}> : () -> ()
    %cst_40 = arith.constant dense<0.000000e+00> : vector<1x8x8xf32>
    %41 = tpu.matmul %39, %40, %cst_40 {dimension_numbers = #tpu.dot_dimension_numbers<[2], [2], [1], [1], [0, 0, 0, 1, 1, 1], [0], [0]>} : vector<1x8x4xbf16>, vector<1x8x4xbf16>, vector<1x8x8xf32> -> vector<1x8x8xf32>
    "tpu.trace_stop"() : () -> ()
    %cst_41 = arith.constant dense<0xFF800000> : vector<1x8xf32>
    %42 = vector.multi_reduction <maximumf>, %41, %cst_41 [2] : vector<1x8x8xf32> to vector<1x8xf32>
    %43 = vector.shape_cast %42 : vector<1x8xf32> to vector<1x8x1xf32>
    %44 = vector.broadcast %43 : vector<1x8x1xf32> to vector<1x8x8xf32>
    %45 = arith.subf %41, %44 : vector<1x8x8xf32>
    %46 = math.exp %45 : vector<1x8x8xf32>
    %cst_42 = arith.constant dense<0.000000e+00> : vector<1x8xf32>
    %47 = vector.multi_reduction <add>, %46, %cst_42 [2] : vector<1x8x8xf32> to vector<1x8xf32>
    %48 = vector.shape_cast %47 : vector<1x8xf32> to vector<1x8x1xf32>
    %49 = tpu.reciprocal %48 {approx = true} : vector<1x8x1xf32> -> vector<1x8x1xf32>
    %50 = arith.truncf %46 : vector<1x8x8xf32> to vector<1x8x8xbf16>
    %c0_43 = arith.constant 0 : index
    %c0_44 = arith.constant 0 : index
    %c4_45 = arith.constant 4 : index
    %51 = vector.load %arg11[%c0_43, %c0_44, %c4_45] : memref<1x8x32xbf16, #tpu.memory_space<vmem>>, vector<1x8x4xbf16>
    "tpu.trace_start"() <{level = 10 : i32, message = "bnm,bmd->bnd"}> : () -> ()
    %cst_46 = arith.constant dense<0.000000e+00> : vector<1x8x4xf32>
    %52 = tpu.matmul %50, %51, %cst_46 {dimension_numbers = #tpu.dot_dimension_numbers<[2], [1], [1], [2], [0, 0, 0, 1, 1, 2], [0], [0]>} : vector<1x8x8xbf16>, vector<1x8x4xbf16>, vector<1x8x4xf32> -> vector<1x8x4xf32>
    "tpu.trace_stop"() : () -> ()
    %53 = vector.broadcast %49 : vector<1x8x1xf32> to vector<1x8x4xf32>
    %54 = arith.mulf %53, %52 : vector<1x8x4xf32>
    %55 = vector.shape_cast %54 : vector<1x8x4xf32> to vector<8x4xf32>
    %56 = arith.truncf %55 : vector<8x4xf32> to vector<8x4xbf16>
    %c0_47 = arith.constant 0 : index
    %c4_48 = arith.constant 4 : index
    %57 = vector.load %arg12[%c0_47, %c4_48] : memref<8x32xbf16, #tpu.memory_space<vmem>>, vector<8x4xbf16>
    tpu.vector_store %arg12[%c0_47, %c4_48], %56 {strides = array<i32>} : memref<8x32xbf16, #tpu.memory_space<vmem>>, vector<8x4xbf16>,
    %c0_49 = arith.constant 0 : index
    %c0_50 = arith.constant 0 : index
    %c8 = arith.constant 8 : index
    %58 = vector.load %arg9[%c0_49, %c0_50, %c8] : memref<1x8x32xbf16, #tpu.memory_space<vmem>>, vector<1x8x4xbf16>
    %c0_51 = arith.constant 0 : index
    %c0_52 = arith.constant 0 : index
    %c8_53 = arith.constant 8 : index
    %59 = vector.load %arg10[%c0_51, %c0_52, %c8_53] : memref<1x8x32xbf16, #tpu.memory_space<vmem>>, vector<1x8x4xbf16>
    "tpu.trace_start"() <{level = 10 : i32, message = "bnd,bmd->bnm"}> : () -> ()
    %cst_54 = arith.constant dense<0.000000e+00> : vector<1x8x8xf32>
    %60 = tpu.matmul %58, %59, %cst_54 {dimension_numbers = #tpu.dot_dimension_numbers<[2], [2], [1], [1], [0, 0, 0, 1, 1, 1], [0], [0]>} : vector<1x8x4xbf16>, vector<1x8x4xbf16>, vector<1x8x8xf32> -> vector<1x8x8xf32>
    "tpu.trace_stop"() : () -> ()
    %cst_55 = arith.constant dense<0xFF800000> : vector<1x8xf32>
    %61 = vector.multi_reduction <maximumf>, %60, %cst_55 [2] : vector<1x8x8xf32> to vector<1x8xf32>
    %62 = vector.shape_cast %61 : vector<1x8xf32> to vector<1x8x1xf32>
    %63 = vector.broadcast %62 : vector<1x8x1xf32> to vector<1x8x8xf32>
    %64 = arith.subf %60, %63 : vector<1x8x8xf32>
    %65 = math.exp %64 : vector<1x8x8xf32>
    %cst_56 = arith.constant dense<0.000000e+00> : vector<1x8xf32>
    %66 = vector.multi_reduction <add>, %65, %cst_56 [2] : vector<1x8x8xf32> to vector<1x8xf32>
    %67 = vector.shape_cast %66 : vector<1x8xf32> to vector<1x8x1xf32>
    %68 = tpu.reciprocal %67 {approx = true} : vector<1x8x1xf32> -> vector<1x8x1xf32>
    %69 = arith.truncf %65 : vector<1x8x8xf32> to vector<1x8x8xbf16>
    %c0_57 = arith.constant 0 : index
    %c0_58 = arith.constant 0 : index
    %c8_59 = arith.constant 8 : index
    %70 = vector.load %arg11[%c0_57, %c0_58, %c8_59] : memref<1x8x32xbf16, #tpu.memory_space<vmem>>, vector<1x8x4xbf16>
    "tpu.trace_start"() <{level = 10 : i32, message = "bnm,bmd->bnd"}> : () -> ()
    %cst_60 = arith.constant dense<0.000000e+00> : vector<1x8x4xf32>
    %71 = tpu.matmul %69, %70, %cst_60 {dimension_numbers = #tpu.dot_dimension_numbers<[2], [1], [1], [2], [0, 0, 0, 1, 1, 2], [0], [0]>} : vector<1x8x8xbf16>, vector<1x8x4xbf16>, vector<1x8x4xf32> -> vector<1x8x4xf32>
    "tpu.trace_stop"() : () -> ()
    %72 = vector.broadcast %68 : vector<1x8x1xf32> to vector<1x8x4xf32>
    %73 = arith.mulf %72, %71 : vector<1x8x4xf32>
    %74 = vector.shape_cast %73 : vector<1x8x4xf32> to vector<8x4xf32>
    %75 = arith.truncf %74 : vector<8x4xf32> to vector<8x4xbf16>
    %c0_61 = arith.constant 0 : index
    %c8_62 = arith.constant 8 : index
    %76 = vector.load %arg12[%c0_61, %c8_62] : memref<8x32xbf16, #tpu.memory_space<vmem>>, vector<8x4xbf16>
    tpu.vector_store %arg12[%c0_61, %c8_62], %75 {strides = array<i32>} : memref<8x32xbf16, #tpu.memory_space<vmem>>, vector<8x4xbf16>,
    %c0_63 = arith.constant 0 : index
    %c0_64 = arith.constant 0 : index
    %c12 = arith.constant 12 : index
    %77 = vector.load %arg9[%c0_63, %c0_64, %c12] : memref<1x8x32xbf16, #tpu.memory_space<vmem>>, vector<1x8x4xbf16>
    %c0_65 = arith.constant 0 : index
    %c0_66 = arith.constant 0 : index
    %c12_67 = arith.constant 12 : index
    %78 = vector.load %arg10[%c0_65, %c0_66, %c12_67] : memref<1x8x32xbf16, #tpu.memory_space<vmem>>, vector<1x8x4xbf16>
    "tpu.trace_start"() <{level = 10 : i32, message = "bnd,bmd->bnm"}> : () -> ()
    %cst_68 = arith.constant dense<0.000000e+00> : vector<1x8x8xf32>
    %79 = tpu.matmul %77, %78, %cst_68 {dimension_numbers = #tpu.dot_dimension_numbers<[2], [2], [1], [1], [0, 0, 0, 1, 1, 1], [0], [0]>} : vector<1x8x4xbf16>, vector<1x8x4xbf16>, vector<1x8x8xf32> -> vector<1x8x8xf32>
    "tpu.trace_stop"() : () -> ()
    %cst_69 = arith.constant dense<0xFF800000> : vector<1x8xf32>
    %80 = vector.multi_reduction <maximumf>, %79, %cst_69 [2] : vector<1x8x8xf32> to vector<1x8xf32>
    %81 = vector.shape_cast %80 : vector<1x8xf32> to vector<1x8x1xf32>
    %82 = vector.broadcast %81 : vector<1x8x1xf32> to vector<1x8x8xf32>
    %83 = arith.subf %79, %82 : vector<1x8x8xf32>
    %84 = math.exp %83 : vector<1x8x8xf32>
    %cst_70 = arith.constant dense<0.000000e+00> : vector<1x8xf32>
    %85 = vector.multi_reduction <add>, %84, %cst_70 [2] : vector<1x8x8xf32> to vector<1x8xf32>
    %86 = vector.shape_cast %85 : vector<1x8xf32> to vector<1x8x1xf32>
    %87 = tpu.reciprocal %86 {approx = true} : vector<1x8x1xf32> -> vector<1x8x1xf32>
    %88 = arith.truncf %84 : vector<1x8x8xf32> to vector<1x8x8xbf16>
    %c0_71 = arith.constant 0 : index
    %c0_72 = arith.constant 0 : index
    %c12_73 = arith.constant 12 : index
    %89 = vector.load %arg11[%c0_71, %c0_72, %c12_73] : memref<1x8x32xbf16, #tpu.memory_space<vmem>>, vector<1x8x4xbf16>
    "tpu.trace_start"() <{level = 10 : i32, message = "bnm,bmd->bnd"}> : () -> ()
    %cst_74 = arith.constant dense<0.000000e+00> : vector<1x8x4xf32>
    %90 = tpu.matmul %88, %89, %cst_74 {dimension_numbers = #tpu.dot_dimension_numbers<[2], [1], [1], [2], [0, 0, 0, 1, 1, 2], [0], [0]>} : vector<1x8x8xbf16>, vector<1x8x4xbf16>, vector<1x8x4xf32> -> vector<1x8x4xf32>
    "tpu.trace_stop"() : () -> ()
    %91 = vector.broadcast %87 : vector<1x8x1xf32> to vector<1x8x4xf32>
    %92 = arith.mulf %91, %90 : vector<1x8x4xf32>
    %93 = vector.shape_cast %92 : vector<1x8x4xf32> to vector<8x4xf32>
    %94 = arith.truncf %93 : vector<8x4xf32> to vector<8x4xbf16>
    %c0_75 = arith.constant 0 : index
    %c12_76 = arith.constant 12 : index
    %95 = vector.load %arg12[%c0_75, %c12_76] : memref<8x32xbf16, #tpu.memory_space<vmem>>, vector<8x4xbf16>
    tpu.vector_store %arg12[%c0_75, %c12_76], %94 {strides = array<i32>} : memref<8x32xbf16, #tpu.memory_space<vmem>>, vector<8x4xbf16>,
    %c0_77 = arith.constant 0 : index
    %c0_78 = arith.constant 0 : index
    %c16 = arith.constant 16 : index
    %96 = vector.load %arg9[%c0_77, %c0_78, %c16] : memref<1x8x32xbf16, #tpu.memory_space<vmem>>, vector<1x8x4xbf16>
    %c0_79 = arith.constant 0 : index
    %c0_80 = arith.constant 0 : index
    %c16_81 = arith.constant 16 : index
    %97 = vector.load %arg10[%c0_79, %c0_80, %c16_81] : memref<1x8x32xbf16, #tpu.memory_space<vmem>>, vector<1x8x4xbf16>
    "tpu.trace_start"() <{level = 10 : i32, message = "bnd,bmd->bnm"}> : () -> ()
    %cst_82 = arith.constant dense<0.000000e+00> : vector<1x8x8xf32>
    %98 = tpu.matmul %96, %97, %cst_82 {dimension_numbers = #tpu.dot_dimension_numbers<[2], [2], [1], [1], [0, 0, 0, 1, 1, 1], [0], [0]>} : vector<1x8x4xbf16>, vector<1x8x4xbf16>, vector<1x8x8xf32> -> vector<1x8x8xf32>
    "tpu.trace_stop"() : () -> ()
    %cst_83 = arith.constant dense<0xFF800000> : vector<1x8xf32>
    %99 = vector.multi_reduction <maximumf>, %98, %cst_83 [2] : vector<1x8x8xf32> to vector<1x8xf32>
    %100 = vector.shape_cast %99 : vector<1x8xf32> to vector<1x8x1xf32>
    %101 = vector.broadcast %100 : vector<1x8x1xf32> to vector<1x8x8xf32>
    %102 = arith.subf %98, %101 : vector<1x8x8xf32>
    %103 = math.exp %102 : vector<1x8x8xf32>
    %cst_84 = arith.constant dense<0.000000e+00> : vector<1x8xf32>
    %104 = vector.multi_reduction <add>, %103, %cst_84 [2] : vector<1x8x8xf32> to vector<1x8xf32>
    %105 = vector.shape_cast %104 : vector<1x8xf32> to vector<1x8x1xf32>
    %106 = tpu.reciprocal %105 {approx = true} : vector<1x8x1xf32> -> vector<1x8x1xf32>
    %107 = arith.truncf %103 : vector<1x8x8xf32> to vector<1x8x8xbf16>
    %c0_85 = arith.constant 0 : index
    %c0_86 = arith.constant 0 : index
    %c16_87 = arith.constant 16 : index
    %108 = vector.load %arg11[%c0_85, %c0_86, %c16_87] : memref<1x8x32xbf16, #tpu.memory_space<vmem>>, vector<1x8x4xbf16>
    "tpu.trace_start"() <{level = 10 : i32, message = "bnm,bmd->bnd"}> : () -> ()
    %cst_88 = arith.constant dense<0.000000e+00> : vector<1x8x4xf32>
    %109 = tpu.matmul %107, %108, %cst_88 {dimension_numbers = #tpu.dot_dimension_numbers<[2], [1], [1], [2], [0, 0, 0, 1, 1, 2], [0], [0]>} : vector<1x8x8xbf16>, vector<1x8x4xbf16>, vector<1x8x4xf32> -> vector<1x8x4xf32>
    "tpu.trace_stop"() : () -> ()
    %110 = vector.broadcast %106 : vector<1x8x1xf32> to vector<1x8x4xf32>
    %111 = arith.mulf %110, %109 : vector<1x8x4xf32>
    %112 = vector.shape_cast %111 : vector<1x8x4xf32> to vector<8x4xf32>
    %113 = arith.truncf %112 : vector<8x4xf32> to vector<8x4xbf16>
    %c0_89 = arith.constant 0 : index
    %c16_90 = arith.constant 16 : index
    %114 = vector.load %arg12[%c0_89, %c16_90] : memref<8x32xbf16, #tpu.memory_space<vmem>>, vector<8x4xbf16>
    tpu.vector_store %arg12[%c0_89, %c16_90], %113 {strides = array<i32>} : memref<8x32xbf16, #tpu.memory_space<vmem>>, vector<8x4xbf16>,
    %c0_91 = arith.constant 0 : index
    %c0_92 = arith.constant 0 : index
    %c20 = arith.constant 20 : index
    %115 = vector.load %arg9[%c0_91, %c0_92, %c20] : memref<1x8x32xbf16, #tpu.memory_space<vmem>>, vector<1x8x4xbf16>
    %c0_93 = arith.constant 0 : index
    %c0_94 = arith.constant 0 : index
    %c20_95 = arith.constant 20 : index
    %116 = vector.load %arg10[%c0_93, %c0_94, %c20_95] : memref<1x8x32xbf16, #tpu.memory_space<vmem>>, vector<1x8x4xbf16>
    "tpu.trace_start"() <{level = 10 : i32, message = "bnd,bmd->bnm"}> : () -> ()
    %cst_96 = arith.constant dense<0.000000e+00> : vector<1x8x8xf32>
    %117 = tpu.matmul %115, %116, %cst_96 {dimension_numbers = #tpu.dot_dimension_numbers<[2], [2], [1], [1], [0, 0, 0, 1, 1, 1], [0], [0]>} : vector<1x8x4xbf16>, vector<1x8x4xbf16>, vector<1x8x8xf32> -> vector<1x8x8xf32>
    "tpu.trace_stop"() : () -> ()
    %cst_97 = arith.constant dense<0xFF800000> : vector<1x8xf32>
    %118 = vector.multi_reduction <maximumf>, %117, %cst_97 [2] : vector<1x8x8xf32> to vector<1x8xf32>
    %119 = vector.shape_cast %118 : vector<1x8xf32> to vector<1x8x1xf32>
    %120 = vector.broadcast %119 : vector<1x8x1xf32> to vector<1x8x8xf32>
    %121 = arith.subf %117, %120 : vector<1x8x8xf32>
    %122 = math.exp %121 : vector<1x8x8xf32>
    %cst_98 = arith.constant dense<0.000000e+00> : vector<1x8xf32>
    %123 = vector.multi_reduction <add>, %122, %cst_98 [2] : vector<1x8x8xf32> to vector<1x8xf32>
    %124 = vector.shape_cast %123 : vector<1x8xf32> to vector<1x8x1xf32>
    %125 = tpu.reciprocal %124 {approx = true} : vector<1x8x1xf32> -> vector<1x8x1xf32>
    %126 = arith.truncf %122 : vector<1x8x8xf32> to vector<1x8x8xbf16>
    %c0_99 = arith.constant 0 : index
    %c0_100 = arith.constant 0 : index
    %c20_101 = arith.constant 20 : index
    %127 = vector.load %arg11[%c0_99, %c0_100, %c20_101] : memref<1x8x32xbf16, #tpu.memory_space<vmem>>, vector<1x8x4xbf16>
    "tpu.trace_start"() <{level = 10 : i32, message = "bnm,bmd->bnd"}> : () -> ()
    %cst_102 = arith.constant dense<0.000000e+00> : vector<1x8x4xf32>
    %128 = tpu.matmul %126, %127, %cst_102 {dimension_numbers = #tpu.dot_dimension_numbers<[2], [1], [1], [2], [0, 0, 0, 1, 1, 2], [0], [0]>} : vector<1x8x8xbf16>, vector<1x8x4xbf16>, vector<1x8x4xf32> -> vector<1x8x4xf32>
    "tpu.trace_stop"() : () -> ()
    %129 = vector.broadcast %125 : vector<1x8x1xf32> to vector<1x8x4xf32>
    %130 = arith.mulf %129, %128 : vector<1x8x4xf32>
    %131 = vector.shape_cast %130 : vector<1x8x4xf32> to vector<8x4xf32>
    %132 = arith.truncf %131 : vector<8x4xf32> to vector<8x4xbf16>
    %c0_103 = arith.constant 0 : index
    %c20_104 = arith.constant 20 : index
    %133 = vector.load %arg12[%c0_103, %c20_104] : memref<8x32xbf16, #tpu.memory_space<vmem>>, vector<8x4xbf16>
    tpu.vector_store %arg12[%c0_103, %c20_104], %132 {strides = array<i32>} : memref<8x32xbf16, #tpu.memory_space<vmem>>, vector<8x4xbf16>,
    %c0_105 = arith.constant 0 : index
    %c0_106 = arith.constant 0 : index
    %c24 = arith.constant 24 : index
    %134 = vector.load %arg9[%c0_105, %c0_106, %c24] : memref<1x8x32xbf16, #tpu.memory_space<vmem>>, vector<1x8x4xbf16>
    %c0_107 = arith.constant 0 : index
    %c0_108 = arith.constant 0 : index
    %c24_109 = arith.constant 24 : index
    %135 = vector.load %arg10[%c0_107, %c0_108, %c24_109] : memref<1x8x32xbf16, #tpu.memory_space<vmem>>, vector<1x8x4xbf16>
    "tpu.trace_start"() <{level = 10 : i32, message = "bnd,bmd->bnm"}> : () -> ()
    %cst_110 = arith.constant dense<0.000000e+00> : vector<1x8x8xf32>
    %136 = tpu.matmul %134, %135, %cst_110 {dimension_numbers = #tpu.dot_dimension_numbers<[2], [2], [1], [1], [0, 0, 0, 1, 1, 1], [0], [0]>} : vector<1x8x4xbf16>, vector<1x8x4xbf16>, vector<1x8x8xf32> -> vector<1x8x8xf32>
    "tpu.trace_stop"() : () -> ()
    %cst_111 = arith.constant dense<0xFF800000> : vector<1x8xf32>
    %137 = vector.multi_reduction <maximumf>, %136, %cst_111 [2] : vector<1x8x8xf32> to vector<1x8xf32>
    %138 = vector.shape_cast %137 : vector<1x8xf32> to vector<1x8x1xf32>
    %139 = vector.broadcast %138 : vector<1x8x1xf32> to vector<1x8x8xf32>
    %140 = arith.subf %136, %139 : vector<1x8x8xf32>
    %141 = math.exp %140 : vector<1x8x8xf32>
    %cst_112 = arith.constant dense<0.000000e+00> : vector<1x8xf32>
    %142 = vector.multi_reduction <add>, %141, %cst_112 [2] : vector<1x8x8xf32> to vector<1x8xf32>
    %143 = vector.shape_cast %142 : vector<1x8xf32> to vector<1x8x1xf32>
    %144 = tpu.reciprocal %143 {approx = true} : vector<1x8x1xf32> -> vector<1x8x1xf32>
    %145 = arith.truncf %141 : vector<1x8x8xf32> to vector<1x8x8xbf16>
    %c0_113 = arith.constant 0 : index
    %c0_114 = arith.constant 0 : index
    %c24_115 = arith.constant 24 : index
    %146 = vector.load %arg11[%c0_113, %c0_114, %c24_115] : memref<1x8x32xbf16, #tpu.memory_space<vmem>>, vector<1x8x4xbf16>
    "tpu.trace_start"() <{level = 10 : i32, message = "bnm,bmd->bnd"}> : () -> ()
    %cst_116 = arith.constant dense<0.000000e+00> : vector<1x8x4xf32>
    %147 = tpu.matmul %145, %146, %cst_116 {dimension_numbers = #tpu.dot_dimension_numbers<[2], [1], [1], [2], [0, 0, 0, 1, 1, 2], [0], [0]>} : vector<1x8x8xbf16>, vector<1x8x4xbf16>, vector<1x8x4xf32> -> vector<1x8x4xf32>
    "tpu.trace_stop"() : () -> ()
    %148 = vector.broadcast %144 : vector<1x8x1xf32> to vector<1x8x4xf32>
    %149 = arith.mulf %148, %147 : vector<1x8x4xf32>
    %150 = vector.shape_cast %149 : vector<1x8x4xf32> to vector<8x4xf32>
    %151 = arith.truncf %150 : vector<8x4xf32> to vector<8x4xbf16>
    %c0_117 = arith.constant 0 : index
    %c24_118 = arith.constant 24 : index
    %152 = vector.load %arg12[%c0_117, %c24_118] : memref<8x32xbf16, #tpu.memory_space<vmem>>, vector<8x4xbf16>
    tpu.vector_store %arg12[%c0_117, %c24_118], %151 {strides = array<i32>} : memref<8x32xbf16, #tpu.memory_space<vmem>>, vector<8x4xbf16>,
    %c0_119 = arith.constant 0 : index
    %c0_120 = arith.constant 0 : index
    %c28 = arith.constant 28 : index
    %153 = vector.load %arg9[%c0_119, %c0_120, %c28] : memref<1x8x32xbf16, #tpu.memory_space<vmem>>, vector<1x8x4xbf16>
    %c0_121 = arith.constant 0 : index
    %c0_122 = arith.constant 0 : index
    %c28_123 = arith.constant 28 : index
    %154 = vector.load %arg10[%c0_121, %c0_122, %c28_123] : memref<1x8x32xbf16, #tpu.memory_space<vmem>>, vector<1x8x4xbf16>
    "tpu.trace_start"() <{level = 10 : i32, message = "bnd,bmd->bnm"}> : () -> ()
    %cst_124 = arith.constant dense<0.000000e+00> : vector<1x8x8xf32>
    %155 = tpu.matmul %153, %154, %cst_124 {dimension_numbers = #tpu.dot_dimension_numbers<[2], [2], [1], [1], [0, 0, 0, 1, 1, 1], [0], [0]>} : vector<1x8x4xbf16>, vector<1x8x4xbf16>, vector<1x8x8xf32> -> vector<1x8x8xf32>
    "tpu.trace_stop"() : () -> ()
    %cst_125 = arith.constant dense<0xFF800000> : vector<1x8xf32>
    %156 = vector.multi_reduction <maximumf>, %155, %cst_125 [2] : vector<1x8x8xf32> to vector<1x8xf32>
    %157 = vector.shape_cast %156 : vector<1x8xf32> to vector<1x8x1xf32>
    %158 = vector.broadcast %157 : vector<1x8x1xf32> to vector<1x8x8xf32>
    %159 = arith.subf %155, %158 : vector<1x8x8xf32>
    %160 = math.exp %159 : vector<1x8x8xf32>
    %cst_126 = arith.constant dense<0.000000e+00> : vector<1x8xf32>
    %161 = vector.multi_reduction <add>, %160, %cst_126 [2] : vector<1x8x8xf32> to vector<1x8xf32>
    %162 = vector.shape_cast %161 : vector<1x8xf32> to vector<1x8x1xf32>
    %163 = tpu.reciprocal %162 {approx = true} : vector<1x8x1xf32> -> vector<1x8x1xf32>
    %164 = arith.truncf %160 : vector<1x8x8xf32> to vector<1x8x8xbf16>
    %c0_127 = arith.constant 0 : index
    %c0_128 = arith.constant 0 : index
    %c28_129 = arith.constant 28 : index
    %165 = vector.load %arg11[%c0_127, %c0_128, %c28_129] : memref<1x8x32xbf16, #tpu.memory_space<vmem>>, vector<1x8x4xbf16>
    "tpu.trace_start"() <{level = 10 : i32, message = "bnm,bmd->bnd"}> : () -> ()
    %cst_130 = arith.constant dense<0.000000e+00> : vector<1x8x4xf32>
    %166 = tpu.matmul %164, %165, %cst_130 {dimension_numbers = #tpu.dot_dimension_numbers<[2], [1], [1], [2], [0, 0, 0, 1, 1, 2], [0], [0]>} : vector<1x8x8xbf16>, vector<1x8x4xbf16>, vector<1x8x4xf32> -> vector<1x8x4xf32>
    "tpu.trace_stop"() : () -> ()
    %167 = vector.broadcast %163 : vector<1x8x1xf32> to vector<1x8x4xf32>
    %168 = arith.mulf %167, %166 : vector<1x8x4xf32>
    %169 = vector.shape_cast %168 : vector<1x8x4xf32> to vector<8x4xf32>
    %170 = arith.truncf %169 : vector<8x4xf32> to vector<8x4xbf16>
    %c0_131 = arith.constant 0 : index
    %c28_132 = arith.constant 28 : index
    %171 = vector.load %arg12[%c0_131, %c28_132] : memref<8x32xbf16, #tpu.memory_space<vmem>>, vector<8x4xbf16>
    tpu.vector_store %arg12[%c0_131, %c28_132], %170 {strides = array<i32>} : memref<8x32xbf16, #tpu.memory_space<vmem>>, vector<8x4xbf16>,
    %c0_133 = arith.constant 0 : index
    %c0_134 = arith.constant 0 : index
    %172 = vector.load %arg12[%c0_133, %c0_134] : memref<8x32xbf16, #tpu.memory_space<vmem>>, vector<8x32xbf16>
    %c0_135 = arith.constant 0 : index
    %c0_136 = arith.constant 0 : index
    %173 = vector.load %arg6[%c0_135, %c0_136] : memref<32x32xbf16, #tpu.memory_space<vmem>>, vector<32x32xbf16>
    %cst_137 = arith.constant dense<0.000000e+00> : vector<8x32xf32>
    %174 = tpu.matmul %172, %173, %cst_137 {dimension_numbers = #tpu.dot_dimension_numbers<[1], [0], [0], [1], [0, 0, 1, 1], [], []>} : vector<8x32xbf16>, vector<32x32xbf16>, vector<8x32xf32> -> vector<8x32xf32>
    %c0_138 = arith.constant 0 : index
    %c0_139 = arith.constant 0 : index
    %175 = vector.load %arg7[%c0_138, %c0_139] : memref<1x32xf32, #tpu.memory_space<vmem>>, vector<1x32xf32>
    %176 = vector.broadcast %175 : vector<1x32xf32> to vector<8x32xf32>
    %177 = arith.addf %174, %176 : vector<8x32xf32>
    %178 = vector.shape_cast %177 : vector<8x32xf32> to vector<1x8x32xf32>
    %c0_140 = arith.constant 0 : index
    %c0_141 = arith.constant 0 : index
    %c0_142 = arith.constant 0 : index
    %179 = vector.load %arg8[%c0_140, %c0_141, %c0_142] : memref<1x8x32xf32, #tpu.memory_space<vmem>>, vector<1x8x32xf32>
    tpu.vector_store %arg8[%c0_140, %c0_141, %c0_142], %178 {strides = array<i32>} : memref<1x8x32xf32, #tpu.memory_space<vmem>>, vector<1x8x32xf32>,
    return
  }
  func.func @transform_0(%arg0: i32, %arg1: i32) -> (i32, i32, i32) {
    %c0_i32 = arith.constant 0 : i32
    %c0_i32_0 = arith.constant 0 : i32
    %c0_i32_1 = arith.constant 0 : i32
    return %arg0, %c0_i32, %c0_i32_0 : i32, i32, i32
  }
  func.func @transform_1(%arg0: i32, %arg1: i32) -> (i32, i32) {
    %c0_i32 = arith.constant 0 : i32
    %c0_i32_0 = arith.constant 0 : i32
    %c0_i32_1 = arith.constant 0 : i32
    return %c0_i32, %c0_i32_0 : i32, i32
  }
  func.func @transform_2(%arg0: i32, %arg1: i32) -> (i32, i32) {
    %c0_i32 = arith.constant 0 : i32
    %c0_i32_0 = arith.constant 0 : i32
    %c0_i32_1 = arith.constant 0 : i32
    return %c0_i32, %c0_i32_0 : i32, i32
  }
  func.func @transform_3(%arg0: i32, %arg1: i32) -> (i32, i32) {
    %c0_i32 = arith.constant 0 : i32
    %c0_i32_0 = arith.constant 0 : i32
    %c0_i32_1 = arith.constant 0 : i32
    return %c0_i32, %c0_i32_0 : i32, i32
  }
  func.func @transform_4(%arg0: i32, %arg1: i32) -> (i32, i32) {
    %c0_i32 = arith.constant 0 : i32
    %c0_i32_0 = arith.constant 0 : i32
    %c0_i32_1 = arith.constant 0 : i32
    return %c0_i32, %c0_i32_0 : i32, i32
  }
  func.func @transform_5(%arg0: i32, %arg1: i32) -> (i32, i32) {
    %c0_i32 = arith.constant 0 : i32
    %c0_i32_0 = arith.constant 0 : i32
    %c0_i32_1 = arith.constant 0 : i32
    return %c0_i32, %c0_i32_0 : i32, i32
  }
  func.func @transform_6(%arg0: i32, %arg1: i32) -> (i32, i32, i32) {
    %c0_i32 = arith.constant 0 : i32
    %c0_i32_0 = arith.constant 0 : i32
    return %arg0, %arg1, %c0_i32 : i32, i32, i32
  }
}

</mosaic_0001>

<bundles_post_ra>
// kernel: tpu_custom_call.1
= control target key start
LH: loop header
LB: loop body
LE: loop exit
PB: predicated region body
PF: predicated region fallthrough
CT: control target
= control target key end

     0   :  { %s2873_s0 = inlined_call_operand.hbm [shape: f32[2,8,32], index: 0, kind: input, shape index: {}]   ;;  %s2874_s1 = inlined_call_operand.hbm [shape: bf16[32,32], index: 1, kind: input, shape index: {}]   ;;  %s2875_s2 = inlined_call_operand.hbm [shape: bf16[32,32], index: 2, kind: input, shape index: {}]   ;;  %s2876_s3 = inlined_call_operand.hbm [shape: bf16[32,32], index: 3, kind: input, shape index: {}]   ;;  %s2877_s4 = inlined_call_operand.hbm [shape: bf16[32,32], index: 4, kind: input, shape index: {}]   ;;  %s2878_s5 = inlined_call_operand.vmem [shape: f32[1,32], index: 5, kind: input, shape index: {}]   ;;  %s2879_s6 = inlined_call_operand.hbm [shape: f32[2,8,32], index: 6, kind: output, shape index: {}]  }
   0x1   :  { %2880 = sst [smem:[#allocation20_spill]] %s2874_s1 }
   0x2   :  { %2881 = sst [smem:[#allocation21_spill]] %s2875_s2 }
   0x3   :  { %2882 = sst [smem:[#allocation22_spill]] %s2876_s3 }
   0x4   :  { %11 = vsyncpa [#allocation7], 0 }
   0x5   :  { %13 = vsyncpa [#allocation7 + $0x1], 0 }
   0x6   :  { %14 = vsyncpa [#allocation10], 0 }
   0x7   :  { %15 = vsyncpa [#allocation13], 0 }
   0x8   :  { %16 = vsyncpa [#allocation8], 0 }
   0x9   :  { %18 = vsyncpa [#allocation8 + $0x1], 0  ;;  %s2472_s21 = smov 0   ;;  %s2474_s22 = smov 0  }
   0xa   :  { %s2476_s23 = smov 0   ;;  %s2478_s24 = smov 0  }
   0xb   :  { %s2480_s25 = smov 0   ;;  %s2482_s26 = smov 0  }
   0xc LB: > { %s1752_s27 = sadd.s32 4294967295, %s2411_s26   ;;  %p1754_p0 = scmp.ge.s32.totalorder %s2411_s26, 1  ;;  %s2411_s26 = sphi %s2482_s26, %s24_s26   ;;  %s2407_s25 = sphi %s2480_s25, %s2900_s25   ;;  %s2403_s24 = sphi %s2478_s24, %s2899_s24   ;;  %s2399_s23 = sphi %s2476_s23, %s2898_s23   ;;  %s2395_s22 = sphi %s2474_s22, %s2897_s22   ;;  %s2391_s21 = sphi %s2472_s21, %s2896_s21  }
   0xd   : > { %p2506_p1 = scmp.eq.s32.totalorder %s1752_s27, 0  ;;  %p200_p2 = scmp.lt.s32.totalorder %s2411_s26, 3 }
   0xe   : > { %s2413_s30 = smov [#allocation9]   ;;  %s2414_s9 = smov [#allocation12]  }
   0xf   : > { %p2511_p3 = pnand %p1754_p0, %p200_p2  ;;  %s212_s7 = sshll.u32 %s2413_s30, 4  ;;  %s213_s7 = int_to_ptr.vmem [resolvable:$true] %s212_s7 }
  0x10   : > { %s238_s10 = sshll.u32 %s2414_s9, 4  ;;  %s2415_s11 = smov [#allocation11]   ;;  %s239_s10 = int_to_ptr.vmem [resolvable:$true] %s238_s10 }
  0x11   : > { %p2029_p4 = pneg %p2511_p3  ;;  %s225_s12 = sshll.u32 %s2415_s11, 4  ;;  %s226_s12 = int_to_ptr.vmem [resolvable:$true] %s225_s12 }
  0x12   : > { %s2202_s13 = scalar_lea.vmem %s213_s7, 256  ;;  %p2210_p11 = scmp.lt.s32.totalorder %s213_s7, %s213_s7 }
  0x13   : > { %p2520_p6 = pnand %p2029_p4, %p2506_p1  ;;  %p2203_p8 = scmp.ne.s32.totalorder %s213_s7, %s2202_s13 }
  0x14   : > { %p2211_p12 = scmp.lt.s32.totalorder %s2202_s13, %s2202_s13 }
  0x15   : > { %p2193_p7 = pneg %p2520_p6 }
  0x16   : > { %p2212_p13 = por %p2211_p12, %p2210_p11 }
  0x17   : > { %p2205_p9 = pnand %p2203_p8, %p2193_p7 }
  0x19   : > { %p2206_p10 = pneg %p2205_p9 }
  0x1b   : > { %p2213_p0 = pnand %p2212_p13, %p2206_p10 }
  0x1d   : > { %2216 = shalt.err (!%p2213_p0)
}
  0x1e   : > { %s2416_s14 = smov 64   ;;  %s2417_s15 = smov 4  }
  0x1f   : > { %s2886_s1 = sld [smem:[#allocation20_spill]]  ;;  %s2228_s18 = scalar_lea.vmem %s239_s10, 256 }
  0x20   : > { %p2229_p2 = scmp.ne.s32.totalorder %s239_s10, %s2228_s18  ;;  %p2236_p9 = scmp.lt.s32.totalorder %s239_s10, %s239_s10 }
  0x21   : > { %p2237_p10 = scmp.lt.s32.totalorder %s2228_s18, %s2228_s18 }
  0x22   : > { %p2231_p4 = pnand %p2229_p2, %p2193_p7 }
  0x23   : > { %p2238_p11 = por %p2237_p10, %p2236_p9 }
  0x24   : > { %p2232_p8 = pneg %p2231_p4 }
  0x25   : > { %2032 = dma.hbm_to_vmem [thread:$0]  (!%p2520_p6), %s2886_s1, 256, %s213_s7, [#allocation10], %s2416_s14, %s2416_s14, %s2417_s15  }
  0x26   : > { %p2239_p12 = pnand %p2238_p11, %p2232_p8 }
  0x28   : > { %2242 = shalt.err (!%p2239_p12)
}
  0x29   : > { %s2887_s3 = sld [smem:[#allocation22_spill]]  ;;  %s2254_s30 = scalar_lea.vmem %s226_s12, 256 }
  0x2a   : > { %p2255_p13 = scmp.ne.s32.totalorder %s226_s12, %s2254_s30  ;;  %p2262_p4 = scmp.lt.s32.totalorder %s226_s12, %s226_s12 }
  0x2b   : > { %p2263_p8 = scmp.lt.s32.totalorder %s2254_s30, %s2254_s30 }
  0x2c   : > { %p2257_p0 = pnand %p2255_p13, %p2193_p7 }
  0x2d   : > { %p2264_p9 = por %p2263_p8, %p2262_p4 }
  0x2e   : > { %p2258_p2 = pneg %p2257_p0 }
  0x2f   : > { %2038 = dma.hbm_to_vmem [thread:$0]  (!%p2520_p6), %s2887_s3, 256, %s239_s10, [#allocation13], %s2416_s14, %s2416_s14, %s2417_s15  }
  0x30   : > { %p2265_p10 = pnand %p2264_p9, %p2258_p2 }
  0x32   : > { %2268 = shalt.err (!%p2265_p10)
}
  0x33   : > { %s2888_s2 = sld [smem:[#allocation21_spill]]  ;;  %s2418_s10 = smov [#allocation14]  }
  0x34   : > { %s251_s11 = sshll.u32 %s2418_s10, 4  ;;  %s252_s11 = int_to_ptr.vmem [resolvable:$true] %s251_s11 }
  0x35   : > { %s2280_s13 = scalar_lea.vmem %s252_s11, 256  ;;  %p2288_p0 = scmp.lt.s32.totalorder %s252_s11, %s252_s11 }
  0x36   : > { %p2281_p11 = scmp.ne.s32.totalorder %s252_s11, %s2280_s13  ;;  %p2289_p2 = scmp.lt.s32.totalorder %s2280_s13, %s2280_s13 }
  0x38   : > { %p2283_p12 = pnand %p2281_p11, %p2193_p7  ;;  %p2290_p4 = por %p2289_p2, %p2288_p0 }
  0x39   : > { %2035 = dma.hbm_to_vmem [thread:$0]  (!%p2520_p6), %s2888_s2, 256, %s226_s12, [#allocation10], %s2416_s14, %s2416_s14, %s2417_s15  }
  0x3a   : > { %p2284_p13 = pneg %p2283_p12 }
  0x3c   : > { %p2291_p8 = pnand %p2290_p4, %p2284_p13 }
  0x3e   : > { %2294 = shalt.err (!%p2291_p8)
}
  0x3f   : > { %2041 = dma.hbm_to_vmem [thread:$0]  (!%p2520_p6), %s2877_s4, 256, %s252_s11, [#allocation13], %s2416_s14, %s2416_s14, %s2417_s15  }
  0x40   : > { %s1753_s8 = sadd.s32 4294967294, %s2411_s26   ;;  %s36_s17 = sadd.s32 1, %s2407_s25 }
  0x41   : > { %p38_p7 = scmp.ge.s32.totalorder %s36_s17, 2  ;;  %s43_s18 = sadd.s32 1, %s2399_s23 }
  0x42   : > { %p50_p9 = scmp.ne.s32.totalorder %s2399_s23, %s2395_s22  ;;  %p51_p10 = scmp.eq.s32.totalorder %s2411_s26, 0 }
  0x43   : > { %s2902_s17 = smov (%p38_p7, %s36_s17), 0  ;;  %p56_p12 = scmp.ne.s32.totalorder %s2395_s22, %s2391_s21 }
  0x44   : > { %p2578_p11 = por %p51_p10, %p50_p9  ;;  %s40_s14 = ssub.s32 %s2407_s25, %s2902_s17 }
  0x45   : > { %p187_p6 = scmp.eq.s32.totalorder %s1752_s27, 1  ;;  %p41_p13 = scmp.eq.s32.totalorder %s40_s14, 0 }
  0x46   : > { %p2590_p0 = por %p2506_p1, %p56_p12  ;;  %p193_p4 = scmp.eq.s32.totalorder %s1753_s8, 1 }
  0x47   : > { %p2594_p2 = por %p187_p6, %p50_p9  ;;  %p2054_p7 = scmp.lt.s32.totalorder %s2411_s26, 2 }
  0x48   : > { %s2599_s30 = scalar_select %p41_p13, %s2399_s23, %s43_s18  }
  0x49   : > { %p2601_p8 = por %p193_p4, %p56_p12  ;;  %s268_s9 = sand.u32 1, %s2399_s23  }
  0x4a   : > { %s1761_s27 = sshll.u32 %s2407_s25, 7  ;;  %s1760_s10 = sshll.u32 %s268_s9, 3 }
  0x4b   : > { %s2892_s7 = scalar_select %p2601_p8, 1, 0 }
  0x4c   : > { %s277_s12 = scalar_lea.hbm %s2873_s0, %s1761_s27  ;;  %s272_s16 = scalar_lea.vmem [#allocation6], %s1760_s10 }
  0x4d   : > { %s279_s14 = sshll.u32 %s272_s16, 4  ;;  %p2613_p9 = pnand %p2054_p7, %p2578_p11  ;;  %s280_s14 = int_to_ptr.vmem [resolvable:$true] %s279_s14 }
  0x4e   : > { %s269_s8 = scalar_lea.sflag [#allocation7], %s268_s9  ;;  %s2308_s18 = scalar_lea.vmem %s280_s14, 128 }
  0x4f   : > { %p2297_p10 = pneg %p2613_p9  ;;  %p2309_p12 = scmp.ne.s32.totalorder %s280_s14, %s2308_s18 }
  0x50   : > { %s2419_s2 = smov [#allocation6]  }
  0x51   : > { %p2311_p6 = pnand %p2309_p12, %p2297_p10  ;;  %s2313_s3 = sshll.u32 %s2419_s2, 4  ;;  %s2314_s3 = int_to_ptr.vmem [resolvable:$false] %s2313_s3 }
  0x52   : > { %s2315_s27 = scalar_lea.vmem %s2314_s3, 256  ;;  %p2316_p4 = scmp.lt.s32.totalorder %s280_s14, %s2314_s3 }
  0x53   : > { %p2312_p13 = pneg %p2311_p6  ;;  %p2317_p5 = scmp.lt.s32.totalorder %s2315_s27, %s2308_s18 }
  0x55   : > { %p2318_p8 = por %p2317_p5, %p2316_p4 }
  0x57   : > { %p2319_p11 = pnand %p2318_p8, %p2312_p13 }
  0x59   : > { %2322 = shalt.err (!%p2319_p11)
}
  0x5a   : > { %2045 = dma.hbm_to_vmem [thread:$0]  (!%p2613_p9), %s277_s12, 128, %s280_s14, %s269_s8  }
  0x5b   : > { %288 = sbr.rel (%p2511_p3) target bundleno = 1399 (0x577), region = 44  ;;  %s2624_s19 = sand.u32 (!%p2511_p3), 1, %s2395_s22  }
  0x5c   : > { %s1763_s2 = sshll.u32 (!%p2511_p3), %s2624_s19, 3  ;;  %s291_s9 = scalar_lea.sflag (!%p2511_p3), [#allocation7], %s2624_s19 }
  0x5d   : > { %s294_s3 = scalar_lea.vmem (!%p2511_p3), [#allocation6], %s1763_s2 }
  0x60   : > { %2374 = dma.done.wait (%p2590_p0), %s291_s9, 128  }
  0x61   : > { %2376 = vsyncadd (%p2590_p0), %s291_s9, 4294967168 }
  0x62   : > { %2378 = dma.done.wait (%p2506_p1), [#allocation10], 512  }
  0x63   : > { %2380 = vsyncadd (%p2506_p1), [#allocation10], 4294966784 }
  0x64   : > { %2382 = dma.done.wait (%p2506_p1), [#allocation13], 512  }
  0x65   : > { %2384 = vsyncadd (%p2506_p1), [#allocation13], 4294966784  ;;  %v2420_v0 = vmov 0.0   ;;  %vm2421_vm0 = vmmov 0   ;;  %v2130_v1 = vld [vmem:[#allocation11 + $0x8] sm:$0xff]   ;;  %v2131_v2 = vld [vmem:[#allocation11] sm:$0xff]  }
  0x66   : > { %1881 = vmatprep.subr.bf16.mxu0 %v2420_v0  ;;  %1885 = vmatprep.mubr.msk.bf16.mxu0 %vm2421_vm0, %v2420_v0  ;;  %v340_v3 = vld [vmem:[%s294_s3] sm:$0xff]  ;;  %v2134_v5 = vld [vmem:[#allocation12 + $0x8] sm:$0xff]   ;;  %vm358_vm1 = vcmask 261120   ;;  %v2135_v7 = vld [vmem:[#allocation12] sm:$0xff]   ;;  %vm403_vm2 = vcmask 257024   ;;  %vm524_vm3 = vcmask 31744  }
  0x67   : > { %1889 = vmatprep.subr.bf16.mxu1 %v2420_v0  ;;  %1893 = vmatprep.mubr.msk.bf16.mxu1 %vm2421_vm0, %v2420_v0  ;;  %v341_v4 = vpack.c.bf16 %v340_v3, %v340_v3  ;;  %v2132_v6 = vld [vmem:[#allocation9 + $0x8] sm:$0xff]   ;;  %v2133_v8 = vld [vmem:[#allocation9] sm:$0xff]   ;;  %s2422_s1 = smov 120   ;;  %s2423_s28 = smov 124   ;;  %vm587_vm4 = vcmask 1043456   ;;  %vm571_vm5 = vcmask 64512  }
  0x68   : > { %1882 = vmatpush3.bf16.msra.mxu0 %v2130_v1  ;;  %1890 = vmatpush3.bf16.msra.mxu1 %v2134_v5  ;;  %s2424_s29 = smov 116   ;;  %s2425_s15 = smov 112   ;;  %vm633_vm6 = vcmask 27648   ;;  %vm764_vm7 = vcmask 60448   ;;  %vm895_vm8 = vcmask 93248   ;;  %vm1026_vm9 = vcmask 126048  }
  0x69   : > { %1883 = vmatprep.subr.bf16.mxu0 %v2420_v0  ;;  %1891 = vmatprep.subr.bf16.mxu1 %v2420_v0  ;;  %s2426_s10 = smov 108   ;;  %s2427_s11 = smov 104   ;;  %vm1157_vm10 = vcmask 158848   ;;  %vm1288_vm11 = vcmask 191648   ;;  %vm1419_vm12 = vcmask 224448   ;;  %vm1550_vm13 = vcmask 257248  }
  0x6a   : > { %s2428_s13 = smov 100   ;;  %s2429_s12 = smov 4  }
  0x6b   : > { %s2430_s16 = smov 8   ;;  %s2431_s14 = smov 12  }
  0x6c   : > { %1884 = vmatpush3.bf16.msra.mxu0 %v2131_v2  ;;  %1892 = vmatpush3.bf16.msra.mxu1 %v2135_v7  ;;  %s2432_s8 = smov 16   ;;  %s2433_s18 = smov 20  }
  0x6d   : > { %1897 = vmatprep.subr.bf16.mxu0 %v2420_v0  ;;  %1905 = vmatprep.subr.bf16.mxu1 %v2420_v0  ;;  %s2434_s27 = smov 24   ;;  %s2435_s9 = smov 28  }
  0x6f   : > { %1886 = vmatmul.mubr.msk.bf16.vlgmr.msra.gmra.mxu0 %vm358_vm1, %v341_v4  ;;  %1894 = vmatmul.mubr.msk.bf16.vlgmr.msra.gmra.mxu1 %vm358_vm1, %v341_v4 }
  0x70   : > { %1898 = vmatpush3.bf16.msra.mxu0 %v2132_v6  ;;  %1901 = vmatprep.mubr.msk.bf16.mxu0 %vm2421_vm0, %v2420_v0 }
  0x71   : > { %1899 = vmatprep.subr.bf16.mxu0 %v2420_v0  ;;  %1907 = vmatprep.mubr.msk.bf16.mxu1 %vm2421_vm0, %v2420_v0 }
  0x74   : > { %1900 = vmatpush3.bf16.msra.mxu0 %v2133_v8 }
  0x75   : > { %1911 = vmatprep.subr.bf16.mxu0 %v2420_v0 }
  0x77   : > { %1902 = vmatmul.mubr.msk.bf16.vlgmr.msra.gmra.mxu0 %vm358_vm1, %v341_v4 }
  0x78   : > { %1913 = vmatprep.mubr.msk.bf16.mxu0 %vm2421_vm0, %v2420_v0 }
 0x12f   : > { %v396_v9 = vpop.f32.mrf.mxu0  ;;  %v455_v37 = vpop.f32.mrf.mxu1 }
 0x130   : > { %v402_v10 = vpack.c.bf16 %v396_v9, %v396_v9  ;;  %v461_v38 = vpack.c.bf16 %v455_v37, %v455_v37 }
 0x131   : > { %v1887_v11 = vpop.f32.mrf.mxu0  ;;  %v1895_v39 = vpop.f32.mrf.mxu1 }
 0x132   : > { %404 = vst.msk [vmem:[#allocation3] sm:$0xf] %vm403_vm2, %v402_v10  ;;  %462 = vst.msk [vmem:[#allocation4] sm:$0xf] %vm403_vm2, %v461_v38 }
 0x133   : > { %v399_v12 = vpop.f32.mrf.mxu0  ;;  %v458_v40 = vpop.f32.mrf.mxu1 }
 0x135   : > { %v1888_v13 = vpop.f32.mrf.mxu0  ;;  %v1896_v41 = vpop.f32.mrf.mxu1 }
 0x137   : > { %v513_v14 = vpop.f32.mrf.mxu0 }
 0x138   : > { %v519_v15 = vmul.f32 0.5, %v513_v14 }
 0x139   : > { %v1903_v16 = vpop.f32.mrf.mxu0  ;;  %v523_v17 = vld [vmem:[#allocation3] sm:$0xf]  ;;  %v2150_v42 = vld [vmem:[#allocation4] ss:$0 sps:$4 sm:$0xff]  }
 0x13a   : > { %v2136_v18 = vld [vmem:[#allocation3] ss:$0 sps:$4 sm:$0xff]   ;;  %v520_v19 = vpack.c.bf16 %v519_v15, %v519_v15  ;;  %v529_v20 = vsel %vm524_vm3, %v523_v17, 0  ;;  %v583_v43 = vld [vmem:[#allocation4] sm:$0xf] }
 0x13b   : > { %v2137_v21 = vld [vmem:[#allocation3] ss:$0 sps:$4 sm:$0xff]   ;;  %v516_v22 = vpop.f32.mrf.mxu0  ;;  %1906 = vmatpush3.bf16.xpose.msra.mxu1 %v529_v20  ;;  %776 = vrot.lane.b32.xlu1 %v2136_v18, %s2422_s1  ;;  %v2151_v44 = vld [vmem:[#allocation4] ss:$0 sps:$4 sm:$0xff]   ;;  %v589_v45 = vsel %vm587_vm4, %v583_v43, 0 }
 0x13c   : > { %521 = vst.msk [vmem:[#allocation2] sm:$0xf] %vm403_vm2, %v520_v19  ;;  %645 = vrot.lane.b32.xlu0 %v2137_v21, %s2423_s28  ;;  %1917 = vmatprep.subr.bf16.mxu1 %v2420_v0  ;;  %v2141_v28 = vld [vmem:[#allocation3] ss:$0 sps:$4 sm:$0xff]   ;;  %v2152_v22 = vld [vmem:[#allocation4] ss:$0 sps:$4 sm:$0xff]  }
 0x13d   : > { %v1904_v23 = vpop.f32.mrf.mxu0  ;;  %v2143_v30 = vld [vmem:[#allocation3] ss:$0 sps:$4 sm:$0xff]   ;;  %1912 = vmatpush3.bf16.msra.mxu0 %v589_v45  ;;  %v2153_v37 = vld [vmem:[#allocation4] ss:$0 sps:$4 sm:$0xff]  }
 0x13e   : > { %v2145_v32 = vld [vmem:[#allocation3] ss:$0 sps:$4 sm:$0xff]   ;;  %1923 = vmatprep.subr.bf16.mxu0 %v2420_v0 }
 0x13f   : > { %v2147_v34 = vld [vmem:[#allocation3] ss:$0 sps:$4 sm:$0xff]  }
 0x140   : > { %v2149_v36 = vld [vmem:[#allocation3] ss:$0 sps:$4 sm:$0xff]  }
 0x143   : > { %v522_v24 = vld [vmem:[#allocation2] sm:$0xf] }
 0x144   : > { %v2138_v25 = vld [vmem:[#allocation2] ss:$0 sps:$4 sm:$0xff]   ;;  %1908 = vmatmul.mubr.msk.bf16.vlgmr.msra.gmra.mxu1 %vm524_vm3, %v522_v24 }
 0x145   : > { %v2139_v26 = vld [vmem:[#allocation2] ss:$0 sps:$4 sm:$0xff]   ;;  %771 = vrot.lane.b32.xlu1 %v2138_v25, %s2422_s1  ;;  %1919 = vmatprep.mubr.msk.bf16.mxu1 %vm2421_vm0, %v2420_v0 }
 0x146   : > { %640 = vrot.lane.b32.xlu0 %v2139_v26, %s2423_s28  ;;  %v2140_v27 = vld [vmem:[#allocation2] ss:$0 sps:$4 sm:$0xff]  }
 0x147   : > { %v2142_v29 = vld [vmem:[#allocation2] ss:$0 sps:$4 sm:$0xff]  }
 0x148   : > { %v2144_v31 = vld [vmem:[#allocation2] ss:$0 sps:$4 sm:$0xff]  }
 0x149   : > { %902 = vrot.lane.b32.xlu1 %v2140_v27, %s2424_s29  ;;  %v2146_v33 = vld [vmem:[#allocation2] ss:$0 sps:$4 sm:$0xff]  }
 0x14a   : > { %907 = vrot.lane.b32.xlu0 %v2141_v28, %s2424_s29  ;;  %v2148_v35 = vld [vmem:[#allocation2] ss:$0 sps:$4 sm:$0xff]  }
 0x14d   : > { %1033 = vrot.lane.b32.xlu1 %v2142_v29, %s2425_s15 }
 0x14e   : > { %1038 = vrot.lane.b32.xlu0 %v2143_v30, %s2425_s15 }
 0x151   : > { %1164 = vrot.lane.b32.xlu1 %v2144_v31, %s2426_s10 }
 0x152   : > { %1169 = vrot.lane.b32.xlu0 %v2145_v32, %s2426_s10 }
 0x155   : > { %1295 = vrot.lane.b32.xlu1 %v2146_v33, %s2427_s11 }
 0x156   : > { %1300 = vrot.lane.b32.xlu0 %v2147_v34, %s2427_s11 }
 0x159   : > { %1426 = vrot.lane.b32.xlu1 %v2148_v35, %s2428_s13 }
 0x15a   : > { %1431 = vrot.lane.b32.xlu0 %v2149_v36, %s2428_s13 }
 0x15d   : > { %839 = vrot.lane.b32.xlu1 %v2151_v44, %s2422_s1 }
 0x15e   : > { %708 = vrot.lane.b32.xlu0 %v2150_v42, %s2423_s28  ;;  %s1827_s28 = sshll.u32 %s2403_s24, 7  ;;  %s1621_s24 = scalar_lea.sflag [#allocation8], %s2624_s19 }
 0x1ad   : > { %v777_v48 = vpop.permute.xlu1 %776 }
 0x1ae   : > { %v646_v46 = vpop.permute.xlu0 %645  ;;  %v782_v50 = vsel %vm524_vm3, %v777_v48, 0 }
 0x1af   : > { %v651_v47 = vsel %vm524_vm3, %v646_v46, 0 }
 0x1b0   : > { %1918 = vmatpush3.bf16.xpose.msra.mxu1 %v651_v47 }
 0x1b1   : > { %1929 = vmatprep.subr.bf16.mxu1 %v2420_v0 }
 0x1b7   : > { %v772_v52 = vpop.permute.xlu1 %771 }
 0x1b8   : > { %v641_v49 = vpop.permute.xlu0 %640 }
 0x1b9   : > { %1920 = vmatmul.mubr.msk.bf16.vlgmr.msra.gmra.mxu1 %vm524_vm3, %v641_v49 }
 0x1ba   : > { %1930 = vmatpush3.bf16.xpose.msra.mxu1 %v782_v50  ;;  %1931 = vmatprep.mubr.msk.bf16.mxu1 %vm2421_vm0, %v2420_v0 }
 0x1bb   : > { %1941 = vmatprep.subr.bf16.mxu1 %v2420_v0  ;;  %v903_v55 = vpop.permute.xlu1 %902 }
 0x1bc   : > { %v908_v51 = vpop.permute.xlu0 %907 }
 0x1bd   : > { %v913_v53 = vsel %vm524_vm3, %v908_v51, 0 }
 0x1bf   : > { %v1034_v58 = vpop.permute.xlu1 %1033 }
 0x1c0   : > { %v1039_v54 = vpop.permute.xlu0 %1038 }
 0x1c1   : > { %1932 = vmatmul.mubr.msk.bf16.vlgmr.msra.gmra.mxu1 %vm524_vm3, %v772_v52  ;;  %v1044_v56 = vsel %vm524_vm3, %v1039_v54, 0  ;;  %v2155_v54 = vld [vmem:[#allocation4] ss:$0 sps:$4 sm:$0xff]  }
 0x1c2   : > { %1942 = vmatpush3.bf16.xpose.msra.mxu1 %v913_v53  ;;  %1943 = vmatprep.mubr.msk.bf16.mxu1 %vm2421_vm0, %v2420_v0  ;;  %v2154_v53 = vld [vmem:[#allocation4] ss:$0 sps:$4 sm:$0xff]  }
 0x1c3   : > { %1953 = vmatprep.subr.bf16.mxu1 %v2420_v0  ;;  %v1165_v61 = vpop.permute.xlu1 %1164 }
 0x1c4   : > { %v1170_v57 = vpop.permute.xlu0 %1169 }
 0x1c5   : > { %v1175_v59 = vsel %vm524_vm3, %v1170_v57, 0 }
 0x1c7   : > { %v1296_v1 = vpop.permute.xlu1 %1295 }
 0x1c8   : > { %v1301_v60 = vpop.permute.xlu0 %1300 }
 0x1c9   : > { %1944 = vmatmul.mubr.msk.bf16.vlgmr.msra.gmra.mxu1 %vm524_vm3, %v903_v55  ;;  %v1306_v62 = vsel %vm524_vm3, %v1301_v60, 0  ;;  %v2156_v55 = vld [vmem:[#allocation4] ss:$0 sps:$4 sm:$0xff]  }
 0x1ca   : > { %1954 = vmatpush3.bf16.xpose.msra.mxu1 %v1044_v56  ;;  %1955 = vmatprep.mubr.msk.bf16.mxu1 %vm2421_vm0, %v2420_v0 }
 0x1cb   : > { %1965 = vmatprep.subr.bf16.mxu1 %v2420_v0  ;;  %v1427_v3 = vpop.permute.xlu1 %1426 }
 0x1cc   : > { %v1432_v63 = vpop.permute.xlu0 %1431 }
 0x1cd   : > { %v1437_v2 = vsel %vm524_vm3, %v1432_v63, 0 }
 0x1cf   : > { %v840_v56 = vpop.permute.xlu1 %839 }
 0x1d0   : > { %v709_v20 = vpop.permute.xlu0 %708 }
 0x1d1   : > { %1956 = vmatmul.mubr.msk.bf16.vlgmr.msra.gmra.mxu1 %vm524_vm3, %v1034_v58  ;;  %v714_v40 = vsel %vm587_vm4, %v709_v20, 0 }
 0x1d2   : > { %1966 = vmatpush3.bf16.xpose.msra.mxu1 %v1175_v59  ;;  %1967 = vmatprep.mubr.msk.bf16.mxu1 %vm2421_vm0, %v2420_v0 }
 0x1d3   : > { %1977 = vmatprep.subr.bf16.mxu1 %v2420_v0 }
 0x1d9   : > { %1968 = vmatmul.mubr.msk.bf16.vlgmr.msra.gmra.mxu1 %vm524_vm3, %v1165_v61 }
 0x1da   : > { %1978 = vmatpush3.bf16.xpose.msra.mxu1 %v1306_v62  ;;  %1979 = vmatprep.mubr.msk.bf16.mxu1 %vm2421_vm0, %v2420_v0 }
 0x1db   : > { %1989 = vmatprep.subr.bf16.mxu1 %v2420_v0 }
 0x1e1   : > { %1980 = vmatmul.mubr.msk.bf16.vlgmr.msra.gmra.mxu1 %vm524_vm3, %v1296_v1 }
 0x1e2   : > { %1990 = vmatpush3.bf16.xpose.msra.mxu1 %v1437_v2  ;;  %1991 = vmatprep.mubr.msk.bf16.mxu1 %vm2421_vm0, %v2420_v0 }
 0x1e3   : > { %2001 = vmatprep.subr.bf16.mxu1 %v2420_v0 }
 0x1e9   : > { %1992 = vmatmul.mubr.msk.bf16.vlgmr.msra.gmra.mxu1 %vm524_vm3, %v1427_v3 }
 0x1ea   : > { %2005 = vmatprep.mubr.msk.bf16.mxu1 %vm2421_vm0, %v2420_v0 }
 0x204   : > { %v565_v4 = vpop.f32.mrf.mxu1 }
 0x205   : > { %v572_v5 = vsel %vm571_vm5, %v565_v4, -inf }
 0x206   : > { %573 = vmax.xlane.f32.xlu0 %v572_v5  ;;  %v1909_v6 = vpop.f32.mrf.mxu1 }
 0x207   : > { %v845_v6 = vsel %vm587_vm4, %v840_v56, 0 }
 0x208   : > { %v568_v7 = vpop.f32.mrf.mxu1 }
 0x20a   : > { %v1910_v8 = vpop.f32.mrf.mxu1 }
 0x279   : > { %v2725_v9 = vpop.f32.mrf.mxu1 }
 0x27a   : > { %v693_v10 = vsel %vm571_vm5, %v2725_v9, -inf }
 0x27b   : > { %694 = vmax.xlane.f32.xlu1 %v693_v10  ;;  %v1921_v11 = vpop.f32.mrf.mxu1 }
 0x27d   : > { %v690_v12 = vpop.f32.mrf.mxu1 }
 0x27f   : > { %v1922_v13 = vpop.f32.mrf.mxu1 }
 0x281   : > { %v2729_v14 = vpop.f32.mrf.mxu1 }
 0x282   : > { %v824_v15 = vsel %vm571_vm5, %v2729_v14, -inf }
 0x283   : > { %825 = vmax.xlane.f32.xlu0 %v824_v15  ;;  %v1933_v16 = vpop.f32.mrf.mxu1 }
 0x285   : > { %v821_v17 = vpop.f32.mrf.mxu1 }
 0x287   : > { %v1934_v18 = vpop.f32.mrf.mxu1 }
 0x289   : > { %v2733_v19 = vpop.f32.mrf.mxu1 }
 0x28a   : > { %v955_v21 = vsel %vm571_vm5, %v2733_v19, -inf }
 0x28b   : > { %956 = vmax.xlane.f32.xlu0 %v955_v21  ;;  %v1945_v23 = vpop.f32.mrf.mxu1 }
 0x28c   : > { %970 = vrot.lane.b32.xlu1 %v2152_v22, %s2424_s29  ;;  %s338_s29 = scalar_lea.vmem [#allocation15], %s1763_s2  ;;  %s2436_s2 = smov [#allocation15]  }
 0x28d   : > { %v952_v24 = vpop.f32.mrf.mxu1 }
 0x28f   : > { %v574_v25 = vpop.xlane.xlu0 %573  ;;  %v1946_v26 = vpop.f32.mrf.mxu1 }
 0x290   : > { %v575_v27 = vsub.f32 %v565_v4, %v574_v25 }
 0x291   : > { %v2738_v28 = vpop.f32.mrf.mxu1 }
 0x292   : > { %v576_v29 = vmul.f32 1.442695, %v575_v27  ;;  %v1086_v49 = vsel %vm571_vm5, %v2738_v28, -inf }
 0x293   : > { %v1957_v30 = vpop.f32.mrf.mxu1 }
 0x294   : > { %2159 = vpow2.f32 %v576_v29 }
 0x295   : > { %v1083_v31 = vpop.f32.mrf.mxu1 }
 0x297   : > { %v1958_v32 = vpop.f32.mrf.mxu1 }
 0x299   : > { %v2740_v33 = vpop.f32.mrf.mxu1 }
 0x29a   : > { %v1217_v50 = vsel %vm571_vm5, %v2740_v33, -inf }
 0x29b   : > { %v1969_v34 = vpop.f32.mrf.mxu1 }
 0x29d   : > { %v1214_v35 = vpop.f32.mrf.mxu1 }
 0x29f   : > { %v1970_v36 = vpop.f32.mrf.mxu1 }
 0x2a1   : > { %v2742_v38 = vpop.eup %2159  ;;  %1101 = vrot.lane.b32.xlu0 %v2153_v37, %s2425_s15  ;;  %v2745_v39 = vpop.f32.mrf.mxu1  ;;  %s1635_s15 = sshll.u32 %s338_s29, 4  ;;  %s2826_s15 = int_to_ptr.vmem [resolvable:$true] %s1635_s15 }
 0x2a2   : > { %v582_v41 = vpack.c.bf16 %v2742_v38, %v2742_v38  ;;  %v1348_v52 = vsel %vm571_vm5, %v2745_v39, -inf }
 0x2a3   : > { %v1981_v42 = vpop.f32.mrf.mxu1 }
 0x2a4   : > { %1914 = vmatmul.mubr.msk.bf16.vlgmr.msra.gmra.mxu0 %vm571_vm5, %v582_v41 }
 0x2a5   : > { %v1345_v43 = vpop.f32.mrf.mxu1  ;;  %1924 = vmatpush3.bf16.msra.mxu0 %v714_v40  ;;  %1925 = vmatprep.mubr.msk.bf16.mxu0 %vm2421_vm0, %v2420_v0 }
 0x2a6   : > { %1935 = vmatprep.subr.bf16.mxu0 %v2420_v0 }
 0x2a7   : > { %v1982_v44 = vpop.f32.mrf.mxu1 }
 0x2a9   : > { %v2754_v45 = vpop.f32.mrf.mxu1 }
 0x2aa   : > { %v1479_v51 = vsel %vm571_vm5, %v2754_v45, -inf }
 0x2ab   : > { %v1993_v46 = vpop.f32.mrf.mxu1 }
 0x2ad   : > { %v1476_v47 = vpop.f32.mrf.mxu1 }
 0x2ae   : > { %v578_v47 = vsel %vm571_vm5, %v2742_v38, 0.0 }
 0x2af   : > { %v1994_v48 = vpop.f32.mrf.mxu1 }
 0x2b0   : > { %1087 = vmax.xlane.f32.xlu1 %v1086_v49 }
 0x2b4   : > { %1218 = vmax.xlane.f32.xlu1 %v1217_v50 }
 0x2b8   : > { %1480 = vmax.xlane.f32.xlu1 %v1479_v51 }
 0x2c0   : > { %1349 = vmax.xlane.f32.xlu0 %v1348_v52 }
 0x2c9   : > { %1232 = vrot.lane.b32.xlu1 %v2154_v53, %s2426_s10 }
 0x2d6   : > { %1363 = vrot.lane.b32.xlu0 %v2155_v54, %s2427_s11 }
 0x2da   : > { %1494 = vrot.lane.b32.xlu0 %v2156_v55, %s2428_s13  ;;  %s2824_s13 = scalar_lea.hbm %s2879_s6, %s1827_s28 }
 0x304   : > { %v695_v57 = vpop.xlane.xlu1 %694 }
 0x305   : > { %v696_v58 = vsub.f32 %v2725_v9, %v695_v57 }
 0x307   : > { %v697_v59 = vmul.f32 1.442695, %v696_v58 }
 0x308   : > { %v971_v8 = vpop.permute.xlu1 %970 }
 0x309   : > { %2161 = vpow2.f32 %v697_v59  ;;  %v976_v11 = vsel %vm587_vm4, %v971_v8, 0 }
 0x30c   : > { %v826_v60 = vpop.xlane.xlu0 %825 }
 0x30d   : > { %v827_v61 = vsub.f32 %v2729_v14, %v826_v60 }
 0x30f   : > { %v828_v62 = vmul.f32 1.442695, %v827_v61 }
 0x311   : > { %2163 = vpow2.f32 %v828_v62 }
 0x314   : > { %v957_v63 = vpop.xlane.xlu0 %956 }
 0x315   : > { %v958_v1 = vsub.f32 %v2733_v19, %v957_v63 }
 0x316   : > { %v2162_v2 = vpop.eup %2161 }
 0x317   : > { %v959_v3 = vmul.f32 1.442695, %v958_v1  ;;  %v699_v4 = vsel %vm571_vm5, %v2162_v2, 0.0  ;;  %v703_v5 = vpack.c.bf16 %v2162_v2, %v2162_v2 }
 0x318   : > { %700 = vadd.xlane.f32.xlu1 %v699_v4  ;;  %v1102_v13 = vpop.permute.xlu0 %1101 }
 0x319   : > { %2165 = vpow2.f32 %v959_v3  ;;  %1926 = vmatmul.mubr.msk.bf16.vlgmr.msra.gmra.mxu0 %vm571_vm5, %v703_v5  ;;  %v1107_v16 = vsel %vm587_vm4, %v1102_v13, 0 }
 0x31a   : > { %1936 = vmatpush3.bf16.msra.mxu0 %v845_v6  ;;  %1937 = vmatprep.mubr.msk.bf16.mxu0 %vm2421_vm0, %v2420_v0 }
 0x31b   : > { %1947 = vmatprep.subr.bf16.mxu0 %v2420_v0 }
 0x31e   : > { %v2164_v7 = vpop.eup %2163 }
 0x31f   : > { %v830_v9 = vsel %vm571_vm5, %v2164_v7, 0.0  ;;  %v834_v10 = vpack.c.bf16 %v2164_v7, %v2164_v7 }
 0x320   : > { %831 = vadd.xlane.f32.xlu0 %v830_v9 }
 0x321   : > { %1938 = vmatmul.mubr.msk.bf16.vlgmr.msra.gmra.mxu0 %vm571_vm5, %v834_v10 }
 0x322   : > { %1948 = vmatpush3.bf16.msra.mxu0 %v976_v11  ;;  %1949 = vmatprep.mubr.msk.bf16.mxu0 %vm2421_vm0, %v2420_v0 }
 0x323   : > { %1959 = vmatprep.subr.bf16.mxu0 %v2420_v0 }
 0x326   : > { %v2166_v12 = vpop.eup %2165 }
 0x327   : > { %v961_v14 = vsel %vm571_vm5, %v2166_v12, 0.0  ;;  %v965_v15 = vpack.c.bf16 %v2166_v12, %v2166_v12 }
 0x328   : > { %962 = vadd.xlane.f32.xlu0 %v961_v14 }
 0x329   : > { %1950 = vmatmul.mubr.msk.bf16.vlgmr.msra.gmra.mxu0 %vm571_vm5, %v965_v15 }
 0x32a   : > { %1960 = vmatpush3.bf16.msra.mxu0 %v1107_v16  ;;  %1961 = vmatprep.mubr.msk.bf16.mxu0 %vm2421_vm0, %v2420_v0 }
 0x32b   : > { %1971 = vmatprep.subr.bf16.mxu0 %v2420_v0 }
 0x339   : > { %v1088_v17 = vpop.xlane.xlu1 %1087 }
 0x33a   : > { %v1089_v18 = vsub.f32 %v2738_v28, %v1088_v17 }
 0x33c   : > { %v1090_v19 = vmul.f32 1.442695, %v1089_v18 }
 0x33d   : > { %v1219_v20 = vpop.xlane.xlu1 %1218 }
 0x33e   : > { %2167 = vpow2.f32 %v1090_v19  ;;  %v1220_v21 = vsub.f32 %v2740_v33, %v1219_v20 }
 0x340   : > { %v1221_v22 = vmul.f32 1.442695, %v1220_v21 }
 0x341   : > { %v1481_v23 = vpop.xlane.xlu1 %1480 }
 0x342   : > { %2169 = vpow2.f32 %v1221_v22  ;;  %v1482_v24 = vsub.f32 %v2754_v45, %v1481_v23 }
 0x344   : > { %v1483_v25 = vmul.f32 1.442695, %v1482_v24 }
 0x345   : > { %v1233_v30 = vpop.permute.xlu1 %1232 }
 0x346   : > { %2171 = vpow2.f32 %v1483_v25  ;;  %v1238_v34 = vsel %vm587_vm4, %v1233_v30, 0 }
 0x349   : > { %v1350_v26 = vpop.xlane.xlu0 %1349 }
 0x34a   : > { %v1351_v27 = vsub.f32 %v2745_v39, %v1350_v26 }
 0x34b   : > { %v2168_v29 = vpop.eup %2167 }
 0x34c   : > { %v1352_v31 = vmul.f32 1.442695, %v1351_v27  ;;  %v1092_v28 = vsel %vm571_vm5, %v2168_v29, 0.0  ;;  %v1096_v32 = vpack.c.bf16 %v2168_v29, %v2168_v29 }
 0x34d   : > { %1093 = vadd.xlane.f32.xlu1 %v1092_v28  ;;  %v1364_v37 = vpop.permute.xlu0 %1363 }
 0x34e   : > { %2173 = vpow2.f32 %v1352_v31  ;;  %1962 = vmatmul.mubr.msk.bf16.vlgmr.msra.gmra.mxu0 %vm571_vm5, %v1096_v32  ;;  %v1369_v41 = vsel %vm587_vm4, %v1364_v37, 0  ;;  %v2157_v37 = vld [vmem:[#allocation14 + $0x8] sm:$0xff]  }
 0x34f   : > { %v2170_v33 = vpop.eup %2169  ;;  %1972 = vmatpush3.bf16.msra.mxu0 %v1238_v34  ;;  %1973 = vmatprep.mubr.msk.bf16.mxu0 %vm2421_vm0, %v2420_v0 }
 0x350   : > { %v1223_v35 = vsel %vm571_vm5, %v2170_v33, 0.0  ;;  %1983 = vmatprep.subr.bf16.mxu0 %v2420_v0  ;;  %v1227_v40 = vpack.c.bf16 %v2170_v33, %v2170_v33  ;;  %2002 = vmatpush3.bf16.msra.mxu1 %v2157_v37 }
 0x351   : > { %1224 = vadd.xlane.f32.xlu0 %v1223_v35  ;;  %v1495_v43 = vpop.permute.xlu0 %1494  ;;  %2003 = vmatprep.subr.bf16.mxu1 %v2420_v0 }
 0x352   : > { %v1500_v46 = vsel %vm587_vm4, %v1495_v43, 0 }
 0x353   : > { %v2172_v36 = vpop.eup %2171 }
 0x354   : > { %v1485_v39 = vsel %vm571_vm5, %v2172_v36, 0.0  ;;  %v1489_v49 = vpack.c.bf16 %v2172_v36, %v2172_v36 }
 0x355   : > { %1486 = vadd.xlane.f32.xlu0 %v1485_v39 }
 0x356   : > { %1974 = vmatmul.mubr.msk.bf16.vlgmr.msra.gmra.mxu0 %vm571_vm5, %v1227_v40 }
 0x357   : > { %1984 = vmatpush3.bf16.msra.mxu0 %v1369_v41  ;;  %1985 = vmatprep.mubr.msk.bf16.mxu0 %vm2421_vm0, %v2420_v0  ;;  %v2158_v41 = vld [vmem:[#allocation14] sm:$0xff]  }
 0x358   : > { %1995 = vmatprep.subr.bf16.mxu0 %v2420_v0  ;;  %2004 = vmatpush3.bf16.msra.mxu1 %v2158_v41 }
 0x35b   : > { %v2174_v42 = vpop.eup %2173 }
 0x35c   : > { %v1354_v44 = vsel %vm571_vm5, %v2174_v42, 0.0  ;;  %v1358_v45 = vpack.c.bf16 %v2174_v42, %v2174_v42 }
 0x35d   : > { %1355 = vadd.xlane.f32.xlu1 %v1354_v44 }
 0x35e   : > { %1986 = vmatmul.mubr.msk.bf16.vlgmr.msra.gmra.mxu0 %vm571_vm5, %v1358_v45 }
 0x35f   : > { %1996 = vmatpush3.bf16.msra.mxu0 %v1500_v46  ;;  %1997 = vmatprep.mubr.msk.bf16.mxu0 %vm2421_vm0, %v2420_v0 }
 0x361   : > { %579 = vadd.xlane.f32.xlu1 %v578_v47 }
 0x364   : > { %v625_v48 = vpop.f32.mrf.mxu0 }
 0x366   : > { %v1915_v50 = vpop.f32.mrf.mxu0  ;;  %1998 = vmatmul.mubr.msk.bf16.vlgmr.msra.gmra.mxu0 %vm571_vm5, %v1489_v49 }
 0x368   : > { %v628_v51 = vpop.f32.mrf.mxu0 }
 0x36a   : > { %v1916_v52 = vpop.f32.mrf.mxu0 }
 0x3a1   : > { %v701_v53 = vpop.xlane.xlu1 %700 }
 0x3a2   : > { %2175 = vrcp.f32 %v701_v53 }
 0x3a9   : > { %v832_v54 = vpop.xlane.xlu0 %831 }
 0x3aa   : > { %2177 = vrcp.f32 %v832_v54 }
 0x3af   : > { %v2176_v55 = vpop.eup %2175 }
 0x3b1   : > { %v963_v56 = vpop.xlane.xlu0 %962 }
 0x3b2   : > { %2179 = vrcp.f32 %v963_v56 }
 0x3b7   : > { %v2178_v62 = vpop.eup %2177 }
 0x3bf   : > { %v2180_v8 = vpop.eup %2179 }
 0x3d6   : > { %v1094_v1 = vpop.xlane.xlu1 %1093 }
 0x3d9   : > { %v750_v57 = vpop.f32.mrf.mxu0 }
 0x3da   : > { %v756_v58 = vmul.f32 %v2176_v55, %v750_v57  ;;  %v1225_v19 = vpop.xlane.xlu0 %1224 }
 0x3db   : > { %v1927_v59 = vpop.f32.mrf.mxu0 }
 0x3dc   : > { %v1830_v60 = vpack.c.bf16 %v756_v58, %v756_v58  ;;  %v1822_v59 = vld [vmem:[%s2878_s5] ss:$0 sm:$0xff] }
 0x3dd   : > { %v753_v38 = vpop.f32.mrf.mxu0 }
 0x3de   : > { %761 = vrot.lane.b32.xlu0 %v1830_v60, %s2429_s12  ;;  %v1487_v29 = vpop.xlane.xlu0 %1486  ;;  %s2323_s12 = scalar_lea.vmem %s2826_s15, 128 }
 0x3df   : > { %v1928_v61 = vpop.f32.mrf.mxu0  ;;  %p2324_p1 = scmp.ne.s32.totalorder %s2826_s15, %s2323_s12 }
 0x3e1   : > { %v881_v63 = vpop.f32.mrf.mxu0  ;;  %p2325_p3 = pnand %p2324_p1, %p2594_p2 }
 0x3e2   : > { %v887_v2 = vmul.f32 %v2178_v62, %v881_v63 }
 0x3e3   : > { %v1939_v3 = vpop.f32.mrf.mxu0  ;;  %p2326_p5 = pneg %p2325_p3 }
 0x3e4   : > { %v1831_v4 = vpack.c.bf16 %v887_v2, %v887_v2 }
 0x3e5   : > { %v884_v5 = vpop.f32.mrf.mxu0 }
 0x3e6   : > { %v1356_v6 = vpop.xlane.xlu1 %1355  ;;  %892 = vrot.lane.b32.xlu1 %v1831_v4, %s2430_s16  ;;  %s2327_s16 = sshll.u32 %s2436_s2, 4  ;;  %s2328_s16 = int_to_ptr.vmem [resolvable:$false] %s2327_s16 }
 0x3e7   : > { %v1940_v7 = vpop.f32.mrf.mxu0  ;;  %p2330_p0 = scmp.lt.s32.totalorder %s2826_s15, %s2328_s16 }
 0x3e9   : > { %v1012_v9 = vpop.f32.mrf.mxu0 }
 0x3ea   : > { %v1018_v10 = vmul.f32 %v2180_v8, %v1012_v9  ;;  %v580_v11 = vpop.xlane.xlu1 %579 }
 0x3eb   : > { %2181 = vrcp.f32 %v580_v11  ;;  %v1951_v12 = vpop.f32.mrf.mxu0 }
 0x3ec   : > { %v1832_v13 = vpack.c.bf16 %v1018_v10, %v1018_v10  ;;  %2183 = vrcp.f32 %v1094_v1 }
 0x3ed   : > { %v1015_v14 = vpop.f32.mrf.mxu0  ;;  %2185 = vrcp.f32 %v1225_v19 }
 0x3ee   : > { %1023 = vrot.lane.b32.xlu1 %v1832_v13, %s2431_s14  ;;  %2187 = vrcp.f32 %v1356_v6  ;;  %s2329_s14 = scalar_lea.vmem %s2328_s16, 256 }
 0x3ef   : > { %v1952_v15 = vpop.f32.mrf.mxu0  ;;  %2189 = vrcp.f32 %v1487_v29  ;;  %p2331_p8 = scmp.lt.s32.totalorder %s2329_s14, %s2323_s12 }
 0x3f1   : > { %p2332_p7 = por %p2331_p8, %p2330_p0 }
 0x3f3   : > { %p2333_p9 = pnand %p2332_p7, %p2326_p5 }
 0x3f8   : > { %v2182_v16 = vpop.eup %2181 }
 0x3f9   : > { %v631_v17 = vmul.f32 %v2182_v16, %v625_v48  ;;  %v2184_v20 = vpop.eup %2183 }
 0x3fa   : > { %v2186_v27 = vpop.eup %2185 }
 0x3fb   : > { %v632_v18 = vpack.c.bf16 %v631_v17, %v631_v17  ;;  %v2188_v35 = vpop.eup %2187 }
 0x3fc   : > { %v2190_v45 = vpop.eup %2189 }
 0x3fd   : > { %634 = vst.msk [vmem:[#allocation5] sm:$0xf] %vm633_vm6, %v632_v18 }
 0x40e   : > { %v1143_v21 = vpop.f32.mrf.mxu0 }
 0x40f   : > { %v1149_v22 = vmul.f32 %v2184_v20, %v1143_v21 }
 0x410   : > { %v1963_v23 = vpop.f32.mrf.mxu0 }
 0x411   : > { %v1833_v24 = vpack.c.bf16 %v1149_v22, %v1149_v22 }
 0x412   : > { %v1146_v25 = vpop.f32.mrf.mxu0 }
 0x413   : > { %1154 = vrot.lane.b32.xlu0 %v1833_v24, %s2432_s8 }
 0x414   : > { %v1964_v26 = vpop.f32.mrf.mxu0 }
 0x416   : > { %v1274_v30 = vpop.f32.mrf.mxu0 }
 0x417   : > { %v1280_v31 = vmul.f32 %v2186_v27, %v1274_v30 }
 0x418   : > { %v1975_v28 = vpop.f32.mrf.mxu0 }
 0x419   : > { %v1834_v32 = vpack.c.bf16 %v1280_v31, %v1280_v31 }
 0x41a   : > { %v1277_v34 = vpop.f32.mrf.mxu0 }
 0x41b   : > { %1285 = vrot.lane.b32.xlu1 %v1834_v32, %s2433_s18 }
 0x41c   : > { %v1976_v33 = vpop.f32.mrf.mxu0 }
 0x41e   : > { %v1405_v36 = vpop.f32.mrf.mxu0 }
 0x41f   : > { %v1411_v39 = vmul.f32 %v2188_v35, %v1405_v36 }
 0x420   : > { %v1987_v40 = vpop.f32.mrf.mxu0 }
 0x421   : > { %v1835_v42 = vpack.c.bf16 %v1411_v39, %v1411_v39 }
 0x422   : > { %v1408_v43 = vpop.f32.mrf.mxu0 }
 0x423   : > { %1416 = vrot.lane.b32.xlu0 %v1835_v42, %s2434_s27 }
 0x424   : > { %v1988_v44 = vpop.f32.mrf.mxu0 }
 0x426   : > { %v1536_v46 = vpop.f32.mrf.mxu0 }
 0x427   : > { %v1542_v47 = vmul.f32 %v2190_v45, %v1536_v46 }
 0x428   : > { %v1999_v48 = vpop.f32.mrf.mxu0 }
 0x429   : > { %v1836_v49 = vpack.c.bf16 %v1542_v47, %v1542_v47 }
 0x42a   : > { %v1539_v50 = vpop.f32.mrf.mxu0 }
 0x42b   : > { %1547 = vrot.lane.b32.xlu1 %v1836_v49, %s2435_s9 }
 0x42c   : > { %v2000_v51 = vpop.f32.mrf.mxu0 }
 0x450   : > { %v762_v52 = vpop.permute.xlu0 %761 }
 0x451   : > { %765 = vst.msk [vmem:[#allocation5] sm:$0xf] %vm764_vm7, %v762_v52 }
 0x458   : > { %v893_v53 = vpop.permute.xlu1 %892 }
 0x459   : > { %896 = vst.msk [vmem:[#allocation5] sm:$0xf] %vm895_vm8, %v893_v53 }
 0x460   : > { %v1024_v0 = vpop.permute.xlu1 %1023 }
 0x461   : > { %1027 = vst.msk [vmem:[#allocation5] sm:$0xf] %vm1026_vm9, %v1024_v0 }
 0x485   : > { %v1155_v54 = vpop.permute.xlu0 %1154 }
 0x486   : > { %1158 = vst.msk [vmem:[#allocation5] sm:$0xf] %vm1157_vm10, %v1155_v54 }
 0x48d   : > { %v1286_v55 = vpop.permute.xlu1 %1285 }
 0x48e   : > { %1289 = vst.msk [vmem:[#allocation5] sm:$0xf] %vm1288_vm11, %v1286_v55 }
 0x495   : > { %v1417_v56 = vpop.permute.xlu0 %1416 }
 0x496   : > { %1420 = vst.msk [vmem:[#allocation5] sm:$0xf] %vm1419_vm12, %v1417_v56 }
 0x49d   : > { %v1548_v57 = vpop.permute.xlu1 %1547 }
 0x49e   : > { %1551 = vst.msk [vmem:[#allocation5] sm:$0xf] %vm1550_vm13, %v1548_v57 }
 0x4a5   : > { %v1552_v58 = vld [vmem:[#allocation5] sm:$0xf] }
 0x4a6   : > { %2006 = vmatmul.mubr.msk.bf16.vlgmr.msra.gmra.mxu1 %vm358_vm1, %v1552_v58 }
 0x566   : > { %v1613_v60 = vpop.f32.mrf.mxu1 }
 0x567   : > { %v1614_v38 = vadd.f32 %v1822_v59, %v1613_v60 }
 0x568   : > { %v2007_v61 = vpop.f32.mrf.mxu1 }
 0x569   : > { %1619 = vst.msk [vmem:[%s338_s29] sm:$0xff] %vm358_vm1, %v1614_v38 }
 0x56a   : > { %v1616_v62 = vpop.f32.mrf.mxu1 }
 0x56b   : > { %2336 = shalt.err (!%p2333_p9)
}
 0x56c   : > { %s2337_s8 = scalar_lea.hbm %s2824_s13, 128  ;;  %s2341_s27 = scalar_lea.hbm %s2879_s6, 256 }
 0x56d   : > { %p2338_p10 = scmp.ne.s32.totalorder %s2824_s13, %s2337_s8  ;;  %p2342_p13 = scmp.lt.s32.totalorder %s2824_s13, %s2879_s6 }
 0x56e   : > { %p2343_p4 = scmp.lt.s32.totalorder %s2341_s27, %s2337_s8 }
 0x56f   : > { %p2339_p12 = pnand %p2338_p10, %p2594_p2 }
 0x570   : > { %p2344_p11 = por %p2343_p4, %p2342_p13 }
 0x571   : > { %p2340_p6 = pneg %p2339_p12 }
 0x573   : > { %p2345_p1 = pnand %p2344_p11, %p2340_p6 }
 0x575   : > { %2348 = shalt.err (!%p2345_p1)
}
 0x576   : > { %2027 = dma.vmem_to_hbm [thread:$0]  (%p2594_p2), %s2826_s15, 128, %s2824_s13, %s1621_s24   ;;  %v2008_v63 = vpop.f32.mrf.mxu1 }
 0x577 PF: > { %s1647_s1 = sand.u32 1, %s2391_s21   ;;  %p2894_p3 = scmp.ne.s32.totalorder %s2892_s7, 0 }
 0x578   : > { %p2895_p5 = scmp.ge.s32.totalorder %s2411_s26, 2  ;;  %s1648_s28 = scalar_lea.sflag [#allocation8], %s1647_s1 }
 0x57a   : > { %p2047_p0 = pnand %p2895_p5, %p2894_p3 }
 0x57c   : > { %p2048_p8 = pneg %p2047_p0 }
 0x57e   : > { %2386 = dma.done.wait (%p2048_p8), %s1648_s28, 128  }
 0x57f   : > { %2388 = vsyncadd (%p2048_p8), %s1648_s28, 4294967168  ;;  %s24_s26 = sadd.s32 1, %s2411_s26   ;;  %s2896_s21 = smov %s2395_s22 }
 0x580   : > { %p21_p7 = scmp.ge.s32.totalorder %s24_s26, 4   ;;  %s2897_s22 = smov %s2399_s23 }
 0x581   : > { %s2898_s23 = smov %s2599_s30  ;;  %s2899_s24 = smov %s2407_s25 }
 0x582   : > { %s2900_s25 = smov %s2902_s17  ;;  %23 = sbr.rel (!%p21_p7) target bundleno = 12 (0xc), region = 105 }
 0x587   :  { %1653 = vsyncpa [#allocation7], 1 }
 0x588   :  { %1655 = vsyncpa [#allocation7 + $0x1], 1 }
 0x589   :  { %1656 = vsyncpa [#allocation10], 1 }
 0x58a   :  { %1657 = vsyncpa [#allocation13], 1 }
 0x58b   :  { %1658 = vsyncpa [#allocation8], 1 }
 0x58c   :  { %1660 = vsyncpa [#allocation8 + $0x1], 1 }

// kernel: tpu_custom_call.1
= control target key start
LH: loop header
LB: loop body
LE: loop exit
PB: predicated region body
PF: predicated region fallthrough
CT: control target
= control target key end

     0   :  { %s2873_s0 = inlined_call_operand.hbm [shape: f32[2,8,32], index: 0, kind: input, shape index: {}]   ;;  %s2874_s1 = inlined_call_operand.hbm [shape: bf16[32,32], index: 1, kind: input, shape index: {}]   ;;  %s2875_s2 = inlined_call_operand.hbm [shape: bf16[32,32], index: 2, kind: input, shape index: {}]   ;;  %s2876_s3 = inlined_call_operand.hbm [shape: bf16[32,32], index: 3, kind: input, shape index: {}]   ;;  %s2877_s4 = inlined_call_operand.hbm [shape: bf16[32,32], index: 4, kind: input, shape index: {}]   ;;  %s2878_s5 = inlined_call_operand.vmem [shape: f32[1,32], index: 5, kind: input, shape index: {}]   ;;  %s2879_s6 = inlined_call_operand.hbm [shape: f32[2,8,32], index: 6, kind: output, shape index: {}]  }
   0x1   :  { %2880 = sst [smem:[#allocation20_spill]] %s2874_s1 }
   0x2   :  { %2881 = sst [smem:[#allocation21_spill]] %s2875_s2 }
   0x3   :  { %2882 = sst [smem:[#allocation22_spill]] %s2876_s3 }
   0x4   :  { %11 = vsyncpa [#allocation7], 0 }
   0x5   :  { %13 = vsyncpa [#allocation7 + $0x1], 0 }
   0x6   :  { %14 = vsyncpa [#allocation10], 0 }
   0x7   :  { %15 = vsyncpa [#allocation13], 0 }
   0x8   :  { %16 = vsyncpa [#allocation8], 0 }
   0x9   :  { %18 = vsyncpa [#allocation8 + $0x1], 0  ;;  %s2472_s21 = smov 0   ;;  %s2474_s22 = smov 0  }
   0xa   :  { %s2476_s23 = smov 0   ;;  %s2478_s24 = smov 0  }
   0xb   :  { %s2480_s25 = smov 0   ;;  %s2482_s26 = smov 0  }
   0xc LB: > { %s1752_s27 = sadd.s32 4294967295, %s2411_s26   ;;  %p1754_p0 = scmp.ge.s32.totalorder %s2411_s26, 1  ;;  %s2411_s26 = sphi %s2482_s26, %s24_s26   ;;  %s2407_s25 = sphi %s2480_s25, %s2900_s25   ;;  %s2403_s24 = sphi %s2478_s24, %s2899_s24   ;;  %s2399_s23 = sphi %s2476_s23, %s2898_s23   ;;  %s2395_s22 = sphi %s2474_s22, %s2897_s22   ;;  %s2391_s21 = sphi %s2472_s21, %s2896_s21  }
   0xd   : > { %p2506_p1 = scmp.eq.s32.totalorder %s1752_s27, 0  ;;  %p200_p2 = scmp.lt.s32.totalorder %s2411_s26, 3 }
   0xe   : > { %s2413_s30 = smov [#allocation9]   ;;  %s2414_s9 = smov [#allocation12]  }
   0xf   : > { %p2511_p3 = pnand %p1754_p0, %p200_p2  ;;  %s212_s7 = sshll.u32 %s2413_s30, 4  ;;  %s213_s7 = int_to_ptr.vmem [resolvable:$true] %s212_s7 }
  0x10   : > { %s238_s10 = sshll.u32 %s2414_s9, 4  ;;  %s2415_s11 = smov [#allocation11]   ;;  %s239_s10 = int_to_ptr.vmem [resolvable:$true] %s238_s10 }
  0x11   : > { %p2029_p4 = pneg %p2511_p3  ;;  %s225_s12 = sshll.u32 %s2415_s11, 4  ;;  %s226_s12 = int_to_ptr.vmem [resolvable:$true] %s225_s12 }
  0x12   : > { %s2202_s13 = scalar_lea.vmem %s213_s7, 256  ;;  %p2210_p11 = scmp.lt.s32.totalorder %s213_s7, %s213_s7 }
  0x13   : > { %p2520_p6 = pnand %p2029_p4, %p2506_p1  ;;  %p2203_p8 = scmp.ne.s32.totalorder %s213_s7, %s2202_s13 }
  0x14   : > { %p2211_p12 = scmp.lt.s32.totalorder %s2202_s13, %s2202_s13 }
  0x15   : > { %p2193_p7 = pneg %p2520_p6 }
  0x16   : > { %p2212_p13 = por %p2211_p12, %p2210_p11 }
  0x17   : > { %p2205_p9 = pnand %p2203_p8, %p2193_p7 }
  0x19   : > { %p2206_p10 = pneg %p2205_p9 }
  0x1b   : > { %p2213_p0 = pnand %p2212_p13, %p2206_p10 }
  0x1d   : > { %2216 = shalt.err (!%p2213_p0)
}
  0x1e   : > { %s2416_s14 = smov 64   ;;  %s2417_s15 = smov 4  }
  0x1f   : > { %s2886_s1 = sld [smem:[#allocation20_spill]]  ;;  %s2228_s18 = scalar_lea.vmem %s239_s10, 256 }
  0x20   : > { %p2229_p2 = scmp.ne.s32.totalorder %s239_s10, %s2228_s18  ;;  %p2236_p9 = scmp.lt.s32.totalorder %s239_s10, %s239_s10 }
  0x21   : > { %p2237_p10 = scmp.lt.s32.totalorder %s2228_s18, %s2228_s18 }
  0x22   : > { %p2231_p4 = pnand %p2229_p2, %p2193_p7 }
  0x23   : > { %p2238_p11 = por %p2237_p10, %p2236_p9 }
  0x24   : > { %p2232_p8 = pneg %p2231_p4 }
  0x25   : > { %2032 = dma.hbm_to_vmem [thread:$0]  (!%p2520_p6), %s2886_s1, 256, %s213_s7, [#allocation10], %s2416_s14, %s2416_s14, %s2417_s15  }
  0x26   : > { %p2239_p12 = pnand %p2238_p11, %p2232_p8 }
  0x28   : > { %2242 = shalt.err (!%p2239_p12)
}
  0x29   : > { %s2887_s3 = sld [smem:[#allocation22_spill]]  ;;  %s2254_s30 = scalar_lea.vmem %s226_s12, 256 }
  0x2a   : > { %p2255_p13 = scmp.ne.s32.totalorder %s226_s12, %s2254_s30  ;;  %p2262_p4 = scmp.lt.s32.totalorder %s226_s12, %s226_s12 }
  0x2b   : > { %p2263_p8 = scmp.lt.s32.totalorder %s2254_s30, %s2254_s30 }
  0x2c   : > { %p2257_p0 = pnand %p2255_p13, %p2193_p7 }
  0x2d   : > { %p2264_p9 = por %p2263_p8, %p2262_p4 }
  0x2e   : > { %p2258_p2 = pneg %p2257_p0 }
  0x2f   : > { %2038 = dma.hbm_to_vmem [thread:$0]  (!%p2520_p6), %s2887_s3, 256, %s239_s10, [#allocation13], %s2416_s14, %s2416_s14, %s2417_s15  }
  0x30   : > { %p2265_p10 = pnand %p2264_p9, %p2258_p2 }
  0x32   : > { %2268 = shalt.err (!%p2265_p10)
}
  0x33   : > { %s2888_s2 = sld [smem:[#allocation21_spill]]  ;;  %s2418_s10 = smov [#allocation14]  }
  0x34   : > { %s251_s11 = sshll.u32 %s2418_s10, 4  ;;  %s252_s11 = int_to_ptr.vmem [resolvable:$true] %s251_s11 }
  0x35   : > { %s2280_s13 = scalar_lea.vmem %s252_s11, 256  ;;  %p2288_p0 = scmp.lt.s32.totalorder %s252_s11, %s252_s11 }
  0x36   : > { %p2281_p11 = scmp.ne.s32.totalorder %s252_s11, %s2280_s13  ;;  %p2289_p2 = scmp.lt.s32.totalorder %s2280_s13, %s2280_s13 }
  0x38   : > { %p2283_p12 = pnand %p2281_p11, %p2193_p7  ;;  %p2290_p4 = por %p2289_p2, %p2288_p0 }
  0x39   : > { %2035 = dma.hbm_to_vmem [thread:$0]  (!%p2520_p6), %s2888_s2, 256, %s226_s12, [#allocation10], %s2416_s14, %s2416_s14, %s2417_s15  }
  0x3a   : > { %p2284_p13 = pneg %p2283_p12 }
  0x3c   : > { %p2291_p8 = pnand %p2290_p4, %p2284_p13 }
  0x3e   : > { %2294 = shalt.err (!%p2291_p8)
}
  0x3f   : > { %2041 = dma.hbm_to_vmem [thread:$0]  (!%p2520_p6), %s2877_s4, 256, %s252_s11, [#allocation13], %s2416_s14, %s2416_s14, %s2417_s15  }
  0x40   : > { %s1753_s8 = sadd.s32 4294967294, %s2411_s26   ;;  %s36_s17 = sadd.s32 1, %s2407_s25 }
  0x41   : > { %p38_p7 = scmp.ge.s32.totalorder %s36_s17, 2  ;;  %s43_s18 = sadd.s32 1, %s2399_s23 }
  0x42   : > { %p50_p9 = scmp.ne.s32.totalorder %s2399_s23, %s2395_s22  ;;  %p51_p10 = scmp.eq.s32.totalorder %s2411_s26, 0 }
  0x43   : > { %s2902_s17 = smov (%p38_p7, %s36_s17), 0  ;;  %p56_p12 = scmp.ne.s32.totalorder %s2395_s22, %s2391_s21 }
  0x44   : > { %p2578_p11 = por %p51_p10, %p50_p9  ;;  %s40_s14 = ssub.s32 %s2407_s25, %s2902_s17 }
  0x45   : > { %p187_p6 = scmp.eq.s32.totalorder %s1752_s27, 1  ;;  %p41_p13 = scmp.eq.s32.totalorder %s40_s14, 0 }
  0x46   : > { %p2590_p0 = por %p2506_p1, %p56_p12  ;;  %p193_p4 = scmp.eq.s32.totalorder %s1753_s8, 1 }
  0x47   : > { %p2594_p2 = por %p187_p6, %p50_p9  ;;  %p2054_p7 = scmp.lt.s32.totalorder %s2411_s26, 2 }
  0x48   : > { %s2599_s30 = scalar_select %p41_p13, %s2399_s23, %s43_s18  }
  0x49   : > { %p2601_p8 = por %p193_p4, %p56_p12  ;;  %s268_s9 = sand.u32 1, %s2399_s23  }
  0x4a   : > { %s1761_s27 = sshll.u32 %s2407_s25, 7  ;;  %s1760_s10 = sshll.u32 %s268_s9, 3 }
  0x4b   : > { %s2892_s7 = scalar_select %p2601_p8, 1, 0 }
  0x4c   : > { %s277_s12 = scalar_lea.hbm %s2873_s0, %s1761_s27  ;;  %s272_s16 = scalar_lea.vmem [#allocation6], %s1760_s10 }
  0x4d   : > { %s279_s14 = sshll.u32 %s272_s16, 4  ;;  %p2613_p9 = pnand %p2054_p7, %p2578_p11  ;;  %s280_s14 = int_to_ptr.vmem [resolvable:$true] %s279_s14 }
  0x4e   : > { %s269_s8 = scalar_lea.sflag [#allocation7], %s268_s9  ;;  %s2308_s18 = scalar_lea.vmem %s280_s14, 128 }
  0x4f   : > { %p2297_p10 = pneg %p2613_p9  ;;  %p2309_p12 = scmp.ne.s32.totalorder %s280_s14, %s2308_s18 }
  0x50   : > { %s2419_s2 = smov [#allocation6]  }
  0x51   : > { %p2311_p6 = pnand %p2309_p12, %p2297_p10  ;;  %s2313_s3 = sshll.u32 %s2419_s2, 4  ;;  %s2314_s3 = int_to_ptr.vmem [resolvable:$false] %s2313_s3 }
  0x52   : > { %s2315_s27 = scalar_lea.vmem %s2314_s3, 256  ;;  %p2316_p4 = scmp.lt.s32.totalorder %s280_s14, %s2314_s3 }
  0x53   : > { %p2312_p13 = pneg %p2311_p6  ;;  %p2317_p5 = scmp.lt.s32.totalorder %s2315_s27, %s2308_s18 }
  0x55   : > { %p2318_p8 = por %p2317_p5, %p2316_p4 }
  0x57   : > { %p2319_p11 = pnand %p2318_p8, %p2312_p13 }
  0x59   : > { %2322 = shalt.err (!%p2319_p11)
}
  0x5a   : > { %2045 = dma.hbm_to_vmem [thread:$0]  (!%p2613_p9), %s277_s12, 128, %s280_s14, %s269_s8  }
  0x5b   : > { %288 = sbr.rel (%p2511_p3) target bundleno = 1399 (0x577), region = 44  ;;  %s2624_s19 = sand.u32 (!%p2511_p3), 1, %s2395_s22  }
  0x5c   : > { %s1763_s2 = sshll.u32 (!%p2511_p3), %s2624_s19, 3  ;;  %s291_s9 = scalar_lea.sflag (!%p2511_p3), [#allocation7], %s2624_s19 }
  0x5d   : > { %s294_s3 = scalar_lea.vmem (!%p2511_p3), [#allocation6], %s1763_s2 }
  0x60   : > { %2374 = dma.done.wait (%p2590_p0), %s291_s9, 128  }
  0x61   : > { %2376 = vsyncadd (%p2590_p0), %s291_s9, 4294967168 }
  0x62   : > { %2378 = dma.done.wait (%p2506_p1), [#allocation10], 512  }
  0x63   : > { %2380 = vsyncadd (%p2506_p1), [#allocation10], 4294966784 }
  0x64   : > { %2382 = dma.done.wait (%p2506_p1), [#allocation13], 512  }
  0x65   : > { %2384 = vsyncadd (%p2506_p1), [#allocation13], 4294966784  ;;  %v2420_v0 = vmov 0.0   ;;  %vm2421_vm0 = vmmov 0   ;;  %v2130_v1 = vld [vmem:[#allocation11 + $0x8] sm:$0xff]   ;;  %v2131_v2 = vld [vmem:[#allocation11] sm:$0xff]  }
  0x66   : > { %1881 = vmatprep.subr.bf16.mxu0 %v2420_v0  ;;  %1885 = vmatprep.mubr.msk.bf16.mxu0 %vm2421_vm0, %v2420_v0  ;;  %v340_v3 = vld [vmem:[%s294_s3] sm:$0xff]  ;;  %v2134_v5 = vld [vmem:[#allocation12 + $0x8] sm:$0xff]   ;;  %vm358_vm1 = vcmask 261120   ;;  %v2135_v7 = vld [vmem:[#allocation12] sm:$0xff]   ;;  %vm403_vm2 = vcmask 257024   ;;  %vm524_vm3 = vcmask 31744  }
  0x67   : > { %1889 = vmatprep.subr.bf16.mxu1 %v2420_v0  ;;  %1893 = vmatprep.mubr.msk.bf16.mxu1 %vm2421_vm0, %v2420_v0  ;;  %v341_v4 = vpack.c.bf16 %v340_v3, %v340_v3  ;;  %v2132_v6 = vld [vmem:[#allocation9 + $0x8] sm:$0xff]   ;;  %v2133_v8 = vld [vmem:[#allocation9] sm:$0xff]   ;;  %s2422_s1 = smov 120   ;;  %s2423_s28 = smov 124   ;;  %vm587_vm4 = vcmask 1043456   ;;  %vm571_vm5 = vcmask 64512  }
  0x68   : > { %1882 = vmatpush3.bf16.msra.mxu0 %v2130_v1  ;;  %1890 = vmatpush3.bf16.msra.mxu1 %v2134_v5  ;;  %s2424_s29 = smov 116   ;;  %s2425_s15 = smov 112   ;;  %vm633_vm6 = vcmask 27648   ;;  %vm764_vm7 = vcmask 60448   ;;  %vm895_vm8 = vcmask 93248   ;;  %vm1026_vm9 = vcmask 126048  }
  0x69   : > { %1883 = vmatprep.subr.bf16.mxu0 %v2420_v0  ;;  %1891 = vmatprep.subr.bf16.mxu1 %v2420_v0  ;;  %s2426_s10 = smov 108   ;;  %s2427_s11 = smov 104   ;;  %vm1157_vm10 = vcmask 158848   ;;  %vm1288_vm11 = vcmask 191648   ;;  %vm1419_vm12 = vcmask 224448   ;;  %vm1550_vm13 = vcmask 257248  }
  0x6a   : > { %s2428_s13 = smov 100   ;;  %s2429_s12 = smov 4  }
  0x6b   : > { %s2430_s16 = smov 8   ;;  %s2431_s14 = smov 12  }
  0x6c   : > { %1884 = vmatpush3.bf16.msra.mxu0 %v2131_v2  ;;  %1892 = vmatpush3.bf16.msra.mxu1 %v2135_v7  ;;  %s2432_s8 = smov 16   ;;  %s2433_s18 = smov 20  }
  0x6d   : > { %1897 = vmatprep.subr.bf16.mxu0 %v2420_v0  ;;  %1905 = vmatprep.subr.bf16.mxu1 %v2420_v0  ;;  %s2434_s27 = smov 24   ;;  %s2435_s9 = smov 28  }
  0x6f   : > { %1886 = vmatmul.mubr.msk.bf16.vlgmr.msra.gmra.mxu0 %vm358_vm1, %v341_v4  ;;  %1894 = vmatmul.mubr.msk.bf16.vlgmr.msra.gmra.mxu1 %vm358_vm1, %v341_v4 }
  0x70   : > { %1898 = vmatpush3.bf16.msra.mxu0 %v2132_v6  ;;  %1901 = vmatprep.mubr.msk.bf16.mxu0 %vm2421_vm0, %v2420_v0 }
  0x71   : > { %1899 = vmatprep.subr.bf16.mxu0 %v2420_v0  ;;  %1907 = vmatprep.mubr.msk.bf16.mxu1 %vm2421_vm0, %v2420_v0 }
  0x74   : > { %1900 = vmatpush3.bf16.msra.mxu0 %v2133_v8 }
  0x75   : > { %1911 = vmatprep.subr.bf16.mxu0 %v2420_v0 }
  0x77   : > { %1902 = vmatmul.mubr.msk.bf16.vlgmr.msra.gmra.mxu0 %vm358_vm1, %v341_v4 }
  0x78   : > { %1913 = vmatprep.mubr.msk.bf16.mxu0 %vm2421_vm0, %v2420_v0 }
 0x12f   : > { %v396_v9 = vpop.f32.mrf.mxu0  ;;  %v455_v37 = vpop.f32.mrf.mxu1 }
 0x130   : > { %v402_v10 = vpack.c.bf16 %v396_v9, %v396_v9  ;;  %v461_v38 = vpack.c.bf16 %v455_v37, %v455_v37 }
 0x131   : > { %v1887_v11 = vpop.f32.mrf.mxu0  ;;  %v1895_v39 = vpop.f32.mrf.mxu1 }
 0x132   : > { %404 = vst.msk [vmem:[#allocation3] sm:$0xf] %vm403_vm2, %v402_v10  ;;  %462 = vst.msk [vmem:[#allocation4] sm:$0xf] %vm403_vm2, %v461_v38 }
 0x133   : > { %v399_v12 = vpop.f32.mrf.mxu0  ;;  %v458_v40 = vpop.f32.mrf.mxu1 }
 0x135   : > { %v1888_v13 = vpop.f32.mrf.mxu0  ;;  %v1896_v41 = vpop.f32.mrf.mxu1 }
 0x137   : > { %v513_v14 = vpop.f32.mrf.mxu0 }
 0x138   : > { %v519_v15 = vmul.f32 0.5, %v513_v14 }
 0x139   : > { %v1903_v16 = vpop.f32.mrf.mxu0  ;;  %v523_v17 = vld [vmem:[#allocation3] sm:$0xf]  ;;  %v2150_v42 = vld [vmem:[#allocation4] ss:$0 sps:$4 sm:$0xff]  }
 0x13a   : > { %v2136_v18 = vld [vmem:[#allocation3] ss:$0 sps:$4 sm:$0xff]   ;;  %v520_v19 = vpack.c.bf16 %v519_v15, %v519_v15  ;;  %v529_v20 = vsel %vm524_vm3, %v523_v17, 0  ;;  %v583_v43 = vld [vmem:[#allocation4] sm:$0xf] }
 0x13b   : > { %v2137_v21 = vld [vmem:[#allocation3] ss:$0 sps:$4 sm:$0xff]   ;;  %v516_v22 = vpop.f32.mrf.mxu0  ;;  %1906 = vmatpush3.bf16.xpose.msra.mxu1 %v529_v20  ;;  %776 = vrot.lane.b32.xlu1 %v2136_v18, %s2422_s1  ;;  %v2151_v44 = vld [vmem:[#allocation4] ss:$0 sps:$4 sm:$0xff]   ;;  %v589_v45 = vsel %vm587_vm4, %v583_v43, 0 }
 0x13c   : > { %521 = vst.msk [vmem:[#allocation2] sm:$0xf] %vm403_vm2, %v520_v19  ;;  %645 = vrot.lane.b32.xlu0 %v2137_v21, %s2423_s28  ;;  %1917 = vmatprep.subr.bf16.mxu1 %v2420_v0  ;;  %v2141_v28 = vld [vmem:[#allocation3] ss:$0 sps:$4 sm:$0xff]   ;;  %v2152_v22 = vld [vmem:[#allocation4] ss:$0 sps:$4 sm:$0xff]  }
 0x13d   : > { %v1904_v23 = vpop.f32.mrf.mxu0  ;;  %v2143_v30 = vld [vmem:[#allocation3] ss:$0 sps:$4 sm:$0xff]   ;;  %1912 = vmatpush3.bf16.msra.mxu0 %v589_v45  ;;  %v2153_v37 = vld [vmem:[#allocation4] ss:$0 sps:$4 sm:$0xff]  }
 0x13e   : > { %v2145_v32 = vld [vmem:[#allocation3] ss:$0 sps:$4 sm:$0xff]   ;;  %1923 = vmatprep.subr.bf16.mxu0 %v2420_v0 }
 0x13f   : > { %v2147_v34 = vld [vmem:[#allocation3] ss:$0 sps:$4 sm:$0xff]  }
 0x140   : > { %v2149_v36 = vld [vmem:[#allocation3] ss:$0 sps:$4 sm:$0xff]  }
 0x143   : > { %v522_v24 = vld [vmem:[#allocation2] sm:$0xf] }
 0x144   : > { %v2138_v25 = vld [vmem:[#allocation2] ss:$0 sps:$4 sm:$0xff]   ;;  %1908 = vmatmul.mubr.msk.bf16.vlgmr.msra.gmra.mxu1 %vm524_vm3, %v522_v24 }
 0x145   : > { %v2139_v26 = vld [vmem:[#allocation2] ss:$0 sps:$4 sm:$0xff]   ;;  %771 = vrot.lane.b32.xlu1 %v2138_v25, %s2422_s1  ;;  %1919 = vmatprep.mubr.msk.bf16.mxu1 %vm2421_vm0, %v2420_v0 }
 0x146   : > { %640 = vrot.lane.b32.xlu0 %v2139_v26, %s2423_s28  ;;  %v2140_v27 = vld [vmem:[#allocation2] ss:$0 sps:$4 sm:$0xff]  }
 0x147   : > { %v2142_v29 = vld [vmem:[#allocation2] ss:$0 sps:$4 sm:$0xff]  }
 0x148   : > { %v2144_v31 = vld [vmem:[#allocation2] ss:$0 sps:$4 sm:$0xff]  }
 0x149   : > { %902 = vrot.lane.b32.xlu1 %v2140_v27, %s2424_s29  ;;  %v2146_v33 = vld [vmem:[#allocation2] ss:$0 sps:$4 sm:$0xff]  }
 0x14a   : > { %907 = vrot.lane.b32.xlu0 %v2141_v28, %s2424_s29  ;;  %v2148_v35 = vld [vmem:[#allocation2] ss:$0 sps:$4 sm:$0xff]  }
 0x14d   : > { %1033 = vrot.lane.b32.xlu1 %v2142_v29, %s2425_s15 }
 0x14e   : > { %1038 = vrot.lane.b32.xlu0 %v2143_v30, %s2425_s15 }
 0x151   : > { %1164 = vrot.lane.b32.xlu1 %v2144_v31, %s2426_s10 }
 0x152   : > { %1169 = vrot.lane.b32.xlu0 %v2145_v32, %s2426_s10 }
 0x155   : > { %1295 = vrot.lane.b32.xlu1 %v2146_v33, %s2427_s11 }
 0x156   : > { %1300 = vrot.lane.b32.xlu0 %v2147_v34, %s2427_s11 }
 0x159   : > { %1426 = vrot.lane.b32.xlu1 %v2148_v35, %s2428_s13 }
 0x15a   : > { %1431 = vrot.lane.b32.xlu0 %v2149_v36, %s2428_s13 }
 0x15d   : > { %839 = vrot.lane.b32.xlu1 %v2151_v44, %s2422_s1 }
 0x15e   : > { %708 = vrot.lane.b32.xlu0 %v2150_v42, %s2423_s28  ;;  %s1827_s28 = sshll.u32 %s2403_s24, 7  ;;  %s1621_s24 = scalar_lea.sflag [#allocation8], %s2624_s19 }
 0x1ad   : > { %v777_v48 = vpop.permute.xlu1 %776 }
 0x1ae   : > { %v646_v46 = vpop.permute.xlu0 %645  ;;  %v782_v50 = vsel %vm524_vm3, %v777_v48, 0 }
 0x1af   : > { %v651_v47 = vsel %vm524_vm3, %v646_v46, 0 }
 0x1b0   : > { %1918 = vmatpush3.bf16.xpose.msra.mxu1 %v651_v47 }
 0x1b1   : > { %1929 = vmatprep.subr.bf16.mxu1 %v2420_v0 }
 0x1b7   : > { %v772_v52 = vpop.permute.xlu1 %771 }
 0x1b8   : > { %v641_v49 = vpop.permute.xlu0 %640 }
 0x1b9   : > { %1920 = vmatmul.mubr.msk.bf16.vlgmr.msra.gmra.mxu1 %vm524_vm3, %v641_v49 }
 0x1ba   : > { %1930 = vmatpush3.bf16.xpose.msra.mxu1 %v782_v50  ;;  %1931 = vmatprep.mubr.msk.bf16.mxu1 %vm2421_vm0, %v2420_v0 }
 0x1bb   : > { %1941 = vmatprep.subr.bf16.mxu1 %v2420_v0  ;;  %v903_v55 = vpop.permute.xlu1 %902 }
 0x1bc   : > { %v908_v51 = vpop.permute.xlu0 %907 }
 0x1bd   : > { %v913_v53 = vsel %vm524_vm3, %v908_v51, 0 }
 0x1bf   : > { %v1034_v58 = vpop.permute.xlu1 %1033 }
 0x1c0   : > { %v1039_v54 = vpop.permute.xlu0 %1038 }
 0x1c1   : > { %1932 = vmatmul.mubr.msk.bf16.vlgmr.msra.gmra.mxu1 %vm524_vm3, %v772_v52  ;;  %v1044_v56 = vsel %vm524_vm3, %v1039_v54, 0  ;;  %v2155_v54 = vld [vmem:[#allocation4] ss:$0 sps:$4 sm:$0xff]  }
 0x1c2   : > { %1942 = vmatpush3.bf16.xpose.msra.mxu1 %v913_v53  ;;  %1943 = vmatprep.mubr.msk.bf16.mxu1 %vm2421_vm0, %v2420_v0  ;;  %v2154_v53 = vld [vmem:[#allocation4] ss:$0 sps:$4 sm:$0xff]  }
 0x1c3   : > { %1953 = vmatprep.subr.bf16.mxu1 %v2420_v0  ;;  %v1165_v61 = vpop.permute.xlu1 %1164 }
 0x1c4   : > { %v1170_v57 = vpop.permute.xlu0 %1169 }
 0x1c5   : > { %v1175_v59 = vsel %vm524_vm3, %v1170_v57, 0 }
 0x1c7   : > { %v1296_v1 = vpop.permute.xlu1 %1295 }
 0x1c8   : > { %v1301_v60 = vpop.permute.xlu0 %1300 }
 0x1c9   : > { %1944 = vmatmul.mubr.msk.bf16.vlgmr.msra.gmra.mxu1 %vm524_vm3, %v903_v55  ;;  %v1306_v62 = vsel %vm524_vm3, %v1301_v60, 0  ;;  %v2156_v55 = vld [vmem:[#allocation4] ss:$0 sps:$4 sm:$0xff]  }
 0x1ca   : > { %1954 = vmatpush3.bf16.xpose.msra.mxu1 %v1044_v56  ;;  %1955 = vmatprep.mubr.msk.bf16.mxu1 %vm2421_vm0, %v2420_v0 }
 0x1cb   : > { %1965 = vmatprep.subr.bf16.mxu1 %v2420_v0  ;;  %v1427_v3 = vpop.permute.xlu1 %1426 }
 0x1cc   : > { %v1432_v63 = vpop.permute.xlu0 %1431 }
 0x1cd   : > { %v1437_v2 = vsel %vm524_vm3, %v1432_v63, 0 }
 0x1cf   : > { %v840_v56 = vpop.permute.xlu1 %839 }
 0x1d0   : > { %v709_v20 = vpop.permute.xlu0 %708 }
 0x1d1   : > { %1956 = vmatmul.mubr.msk.bf16.vlgmr.msra.gmra.mxu1 %vm524_vm3, %v1034_v58  ;;  %v714_v40 = vsel %vm587_vm4, %v709_v20, 0 }
 0x1d2   : > { %1966 = vmatpush3.bf16.xpose.msra.mxu1 %v1175_v59  ;;  %1967 = vmatprep.mubr.msk.bf16.mxu1 %vm2421_vm0, %v2420_v0 }
 0x1d3   : > { %1977 = vmatprep.subr.bf16.mxu1 %v2420_v0 }
 0x1d9   : > { %1968 = vmatmul.mubr.msk.bf16.vlgmr.msra.gmra.mxu1 %vm524_vm3, %v1165_v61 }
 0x1da   : > { %1978 = vmatpush3.bf16.xpose.msra.mxu1 %v1306_v62  ;;  %1979 = vmatprep.mubr.msk.bf16.mxu1 %vm2421_vm0, %v2420_v0 }
 0x1db   : > { %1989 = vmatprep.subr.bf16.mxu1 %v2420_v0 }
 0x1e1   : > { %1980 = vmatmul.mubr.msk.bf16.vlgmr.msra.gmra.mxu1 %vm524_vm3, %v1296_v1 }
 0x1e2   : > { %1990 = vmatpush3.bf16.xpose.msra.mxu1 %v1437_v2  ;;  %1991 = vmatprep.mubr.msk.bf16.mxu1 %vm2421_vm0, %v2420_v0 }
 0x1e3   : > { %2001 = vmatprep.subr.bf16.mxu1 %v2420_v0 }
 0x1e9   : > { %1992 = vmatmul.mubr.msk.bf16.vlgmr.msra.gmra.mxu1 %vm524_vm3, %v1427_v3 }
 0x1ea   : > { %2005 = vmatprep.mubr.msk.bf16.mxu1 %vm2421_vm0, %v2420_v0 }
 0x204   : > { %v565_v4 = vpop.f32.mrf.mxu1 }
 0x205   : > { %v572_v5 = vsel %vm571_vm5, %v565_v4, -inf }
 0x206   : > { %573 = vmax.xlane.f32.xlu0 %v572_v5  ;;  %v1909_v6 = vpop.f32.mrf.mxu1 }
 0x207   : > { %v845_v6 = vsel %vm587_vm4, %v840_v56, 0 }
 0x208   : > { %v568_v7 = vpop.f32.mrf.mxu1 }
 0x20a   : > { %v1910_v8 = vpop.f32.mrf.mxu1 }
 0x279   : > { %v2725_v9 = vpop.f32.mrf.mxu1 }
 0x27a   : > { %v693_v10 = vsel %vm571_vm5, %v2725_v9, -inf }
 0x27b   : > { %694 = vmax.xlane.f32.xlu1 %v693_v10  ;;  %v1921_v11 = vpop.f32.mrf.mxu1 }
 0x27d   : > { %v690_v12 = vpop.f32.mrf.mxu1 }
 0x27f   : > { %v1922_v13 = vpop.f32.mrf.mxu1 }
 0x281   : > { %v2729_v14 = vpop.f32.mrf.mxu1 }
 0x282   : > { %v824_v15 = vsel %vm571_vm5, %v2729_v14, -inf }
 0x283   : > { %825 = vmax.xlane.f32.xlu0 %v824_v15  ;;  %v1933_v16 = vpop.f32.mrf.mxu1 }
 0x285   : > { %v821_v17 = vpop.f32.mrf.mxu1 }
 0x287   : > { %v1934_v18 = vpop.f32.mrf.mxu1 }
 0x289   : > { %v2733_v19 = vpop.f32.mrf.mxu1 }
 0x28a   : > { %v955_v21 = vsel %vm571_vm5, %v2733_v19, -inf }
 0x28b   : > { %956 = vmax.xlane.f32.xlu0 %v955_v21  ;;  %v1945_v23 = vpop.f32.mrf.mxu1 }
 0x28c   : > { %970 = vrot.lane.b32.xlu1 %v2152_v22, %s2424_s29  ;;  %s338_s29 = scalar_lea.vmem [#allocation15], %s1763_s2  ;;  %s2436_s2 = smov [#allocation15]  }
 0x28d   : > { %v952_v24 = vpop.f32.mrf.mxu1 }
 0x28f   : > { %v574_v25 = vpop.xlane.xlu0 %573  ;;  %v1946_v26 = vpop.f32.mrf.mxu1 }
 0x290   : > { %v575_v27 = vsub.f32 %v565_v4, %v574_v25 }
 0x291   : > { %v2738_v28 = vpop.f32.mrf.mxu1 }
 0x292   : > { %v576_v29 = vmul.f32 1.442695, %v575_v27  ;;  %v1086_v49 = vsel %vm571_vm5, %v2738_v28, -inf }
 0x293   : > { %v1957_v30 = vpop.f32.mrf.mxu1 }
 0x294   : > { %2159 = vpow2.f32 %v576_v29 }
 0x295   : > { %v1083_v31 = vpop.f32.mrf.mxu1 }
 0x297   : > { %v1958_v32 = vpop.f32.mrf.mxu1 }
 0x299   : > { %v2740_v33 = vpop.f32.mrf.mxu1 }
 0x29a   : > { %v1217_v50 = vsel %vm571_vm5, %v2740_v33, -inf }
 0x29b   : > { %v1969_v34 = vpop.f32.mrf.mxu1 }
 0x29d   : > { %v1214_v35 = vpop.f32.mrf.mxu1 }
 0x29f   : > { %v1970_v36 = vpop.f32.mrf.mxu1 }
 0x2a1   : > { %v2742_v38 = vpop.eup %2159  ;;  %1101 = vrot.lane.b32.xlu0 %v2153_v37, %s2425_s15  ;;  %v2745_v39 = vpop.f32.mrf.mxu1  ;;  %s1635_s15 = sshll.u32 %s338_s29, 4  ;;  %s2826_s15 = int_to_ptr.vmem [resolvable:$true] %s1635_s15 }
 0x2a2   : > { %v582_v41 = vpack.c.bf16 %v2742_v38, %v2742_v38  ;;  %v1348_v52 = vsel %vm571_vm5, %v2745_v39, -inf }
 0x2a3   : > { %v1981_v42 = vpop.f32.mrf.mxu1 }
 0x2a4   : > { %1914 = vmatmul.mubr.msk.bf16.vlgmr.msra.gmra.mxu0 %vm571_vm5, %v582_v41 }
 0x2a5   : > { %v1345_v43 = vpop.f32.mrf.mxu1  ;;  %1924 = vmatpush3.bf16.msra.mxu0 %v714_v40  ;;  %1925 = vmatprep.mubr.msk.bf16.mxu0 %vm2421_vm0, %v2420_v0 }
 0x2a6   : > { %1935 = vmatprep.subr.bf16.mxu0 %v2420_v0 }
 0x2a7   : > { %v1982_v44 = vpop.f32.mrf.mxu1 }
 0x2a9   : > { %v2754_v45 = vpop.f32.mrf.mxu1 }
 0x2aa   : > { %v1479_v51 = vsel %vm571_vm5, %v2754_v45, -inf }
 0x2ab   : > { %v1993_v46 = vpop.f32.mrf.mxu1 }
 0x2ad   : > { %v1476_v47 = vpop.f32.mrf.mxu1 }
 0x2ae   : > { %v578_v47 = vsel %vm571_vm5, %v2742_v38, 0.0 }
 0x2af   : > { %v1994_v48 = vpop.f32.mrf.mxu1 }
 0x2b0   : > { %1087 = vmax.xlane.f32.xlu1 %v1086_v49 }
 0x2b4   : > { %1218 = vmax.xlane.f32.xlu1 %v1217_v50 }
 0x2b8   : > { %1480 = vmax.xlane.f32.xlu1 %v1479_v51 }
 0x2c0   : > { %1349 = vmax.xlane.f32.xlu0 %v1348_v52 }
 0x2c9   : > { %1232 = vrot.lane.b32.xlu1 %v2154_v53, %s2426_s10 }
 0x2d6   : > { %1363 = vrot.lane.b32.xlu0 %v2155_v54, %s2427_s11 }
 0x2da   : > { %1494 = vrot.lane.b32.xlu0 %v2156_v55, %s2428_s13  ;;  %s2824_s13 = scalar_lea.hbm %s2879_s6, %s1827_s28 }
 0x304   : > { %v695_v57 = vpop.xlane.xlu1 %694 }
 0x305   : > { %v696_v58 = vsub.f32 %v2725_v9, %v695_v57 }
 0x307   : > { %v697_v59 = vmul.f32 1.442695, %v696_v58 }
 0x308   : > { %v971_v8 = vpop.permute.xlu1 %970 }
 0x309   : > { %2161 = vpow2.f32 %v697_v59  ;;  %v976_v11 = vsel %vm587_vm4, %v971_v8, 0 }
 0x30c   : > { %v826_v60 = vpop.xlane.xlu0 %825 }
 0x30d   : > { %v827_v61 = vsub.f32 %v2729_v14, %v826_v60 }
 0x30f   : > { %v828_v62 = vmul.f32 1.442695, %v827_v61 }
 0x311   : > { %2163 = vpow2.f32 %v828_v62 }
 0x314   : > { %v957_v63 = vpop.xlane.xlu0 %956 }
 0x315   : > { %v958_v1 = vsub.f32 %v2733_v19, %v957_v63 }
 0x316   : > { %v2162_v2 = vpop.eup %2161 }
 0x317   : > { %v959_v3 = vmul.f32 1.442695, %v958_v1  ;;  %v699_v4 = vsel %vm571_vm5, %v2162_v2, 0.0  ;;  %v703_v5 = vpack.c.bf16 %v2162_v2, %v2162_v2 }
 0x318   : > { %700 = vadd.xlane.f32.xlu1 %v699_v4  ;;  %v1102_v13 = vpop.permute.xlu0 %1101 }
 0x319   : > { %2165 = vpow2.f32 %v959_v3  ;;  %1926 = vmatmul.mubr.msk.bf16.vlgmr.msra.gmra.mxu0 %vm571_vm5, %v703_v5  ;;  %v1107_v16 = vsel %vm587_vm4, %v1102_v13, 0 }
 0x31a   : > { %1936 = vmatpush3.bf16.msra.mxu0 %v845_v6  ;;  %1937 = vmatprep.mubr.msk.bf16.mxu0 %vm2421_vm0, %v2420_v0 }
 0x31b   : > { %1947 = vmatprep.subr.bf16.mxu0 %v2420_v0 }
 0x31e   : > { %v2164_v7 = vpop.eup %2163 }
 0x31f   : > { %v830_v9 = vsel %vm571_vm5, %v2164_v7, 0.0  ;;  %v834_v10 = vpack.c.bf16 %v2164_v7, %v2164_v7 }
 0x320   : > { %831 = vadd.xlane.f32.xlu0 %v830_v9 }
 0x321   : > { %1938 = vmatmul.mubr.msk.bf16.vlgmr.msra.gmra.mxu0 %vm571_vm5, %v834_v10 }
 0x322   : > { %1948 = vmatpush3.bf16.msra.mxu0 %v976_v11  ;;  %1949 = vmatprep.mubr.msk.bf16.mxu0 %vm2421_vm0, %v2420_v0 }
 0x323   : > { %1959 = vmatprep.subr.bf16.mxu0 %v2420_v0 }
 0x326   : > { %v2166_v12 = vpop.eup %2165 }
 0x327   : > { %v961_v14 = vsel %vm571_vm5, %v2166_v12, 0.0  ;;  %v965_v15 = vpack.c.bf16 %v2166_v12, %v2166_v12 }
 0x328   : > { %962 = vadd.xlane.f32.xlu0 %v961_v14 }
 0x329   : > { %1950 = vmatmul.mubr.msk.bf16.vlgmr.msra.gmra.mxu0 %vm571_vm5, %v965_v15 }
 0x32a   : > { %1960 = vmatpush3.bf16.msra.mxu0 %v1107_v16  ;;  %1961 = vmatprep.mubr.msk.bf16.mxu0 %vm2421_vm0, %v2420_v0 }
 0x32b   : > { %1971 = vmatprep.subr.bf16.mxu0 %v2420_v0 }
 0x339   : > { %v1088_v17 = vpop.xlane.xlu1 %1087 }
 0x33a   : > { %v1089_v18 = vsub.f32 %v2738_v28, %v1088_v17 }
 0x33c   : > { %v1090_v19 = vmul.f32 1.442695, %v1089_v18 }
 0x33d   : > { %v1219_v20 = vpop.xlane.xlu1 %1218 }
 0x33e   : > { %2167 = vpow2.f32 %v1090_v19  ;;  %v1220_v21 = vsub.f32 %v2740_v33, %v1219_v20 }
 0x340   : > { %v1221_v22 = vmul.f32 1.442695, %v1220_v21 }
 0x341   : > { %v1481_v23 = vpop.xlane.xlu1 %1480 }
 0x342   : > { %2169 = vpow2.f32 %v1221_v22  ;;  %v1482_v24 = vsub.f32 %v2754_v45, %v1481_v23 }
 0x344   : > { %v1483_v25 = vmul.f32 1.442695, %v1482_v24 }
 0x345   : > { %v1233_v30 = vpop.permute.xlu1 %1232 }
 0x346   : > { %2171 = vpow2.f32 %v1483_v25  ;;  %v1238_v34 = vsel %vm587_vm4, %v1233_v30, 0 }
 0x349   : > { %v1350_v26 = vpop.xlane.xlu0 %1349 }
 0x34a   : > { %v1351_v27 = vsub.f32 %v2745_v39, %v1350_v26 }
 0x34b   : > { %v2168_v29 = vpop.eup %2167 }
 0x34c   : > { %v1352_v31 = vmul.f32 1.442695, %v1351_v27  ;;  %v1092_v28 = vsel %vm571_vm5, %v2168_v29, 0.0  ;;  %v1096_v32 = vpack.c.bf16 %v2168_v29, %v2168_v29 }
 0x34d   : > { %1093 = vadd.xlane.f32.xlu1 %v1092_v28  ;;  %v1364_v37 = vpop.permute.xlu0 %1363 }
 0x34e   : > { %2173 = vpow2.f32 %v1352_v31  ;;  %1962 = vmatmul.mubr.msk.bf16.vlgmr.msra.gmra.mxu0 %vm571_vm5, %v1096_v32  ;;  %v1369_v41 = vsel %vm587_vm4, %v1364_v37, 0  ;;  %v2157_v37 = vld [vmem:[#allocation14 + $0x8] sm:$0xff]  }
 0x34f   : > { %v2170_v33 = vpop.eup %2169  ;;  %1972 = vmatpush3.bf16.msra.mxu0 %v1238_v34  ;;  %1973 = vmatprep.mubr.msk.bf16.mxu0 %vm2421_vm0, %v2420_v0 }
 0x350   : > { %v1223_v35 = vsel %vm571_vm5, %v2170_v33, 0.0  ;;  %1983 = vmatprep.subr.bf16.mxu0 %v2420_v0  ;;  %v1227_v40 = vpack.c.bf16 %v2170_v33, %v2170_v33  ;;  %2002 = vmatpush3.bf16.msra.mxu1 %v2157_v37 }
 0x351   : > { %1224 = vadd.xlane.f32.xlu0 %v1223_v35  ;;  %v1495_v43 = vpop.permute.xlu0 %1494  ;;  %2003 = vmatprep.subr.bf16.mxu1 %v2420_v0 }
 0x352   : > { %v1500_v46 = vsel %vm587_vm4, %v1495_v43, 0 }
 0x353   : > { %v2172_v36 = vpop.eup %2171 }
 0x354   : > { %v1485_v39 = vsel %vm571_vm5, %v2172_v36, 0.0  ;;  %v1489_v49 = vpack.c.bf16 %v2172_v36, %v2172_v36 }
 0x355   : > { %1486 = vadd.xlane.f32.xlu0 %v1485_v39 }
 0x356   : > { %1974 = vmatmul.mubr.msk.bf16.vlgmr.msra.gmra.mxu0 %vm571_vm5, %v1227_v40 }
 0x357   : > { %1984 = vmatpush3.bf16.msra.mxu0 %v1369_v41  ;;  %1985 = vmatprep.mubr.msk.bf16.mxu0 %vm2421_vm0, %v2420_v0  ;;  %v2158_v41 = vld [vmem:[#allocation14] sm:$0xff]  }
 0x358   : > { %1995 = vmatprep.subr.bf16.mxu0 %v2420_v0  ;;  %2004 = vmatpush3.bf16.msra.mxu1 %v2158_v41 }
 0x35b   : > { %v2174_v42 = vpop.eup %2173 }
 0x35c   : > { %v1354_v44 = vsel %vm571_vm5, %v2174_v42, 0.0  ;;  %v1358_v45 = vpack.c.bf16 %v2174_v42, %v2174_v42 }
 0x35d   : > { %1355 = vadd.xlane.f32.xlu1 %v1354_v44 }
 0x35e   : > { %1986 = vmatmul.mubr.msk.bf16.vlgmr.msra.gmra.mxu0 %vm571_vm5, %v1358_v45 }
 0x35f   : > { %1996 = vmatpush3.bf16.msra.mxu0 %v1500_v46  ;;  %1997 = vmatprep.mubr.msk.bf16.mxu0 %vm2421_vm0, %v2420_v0 }
 0x361   : > { %579 = vadd.xlane.f32.xlu1 %v578_v47 }
 0x364   : > { %v625_v48 = vpop.f32.mrf.mxu0 }
 0x366   : > { %v1915_v50 = vpop.f32.mrf.mxu0  ;;  %1998 = vmatmul.mubr.msk.bf16.vlgmr.msra.gmra.mxu0 %vm571_vm5, %v1489_v49 }
 0x368   : > { %v628_v51 = vpop.f32.mrf.mxu0 }
 0x36a   : > { %v1916_v52 = vpop.f32.mrf.mxu0 }
 0x3a1   : > { %v701_v53 = vpop.xlane.xlu1 %700 }
 0x3a2   : > { %2175 = vrcp.f32 %v701_v53 }
 0x3a9   : > { %v832_v54 = vpop.xlane.xlu0 %831 }
 0x3aa   : > { %2177 = vrcp.f32 %v832_v54 }
 0x3af   : > { %v2176_v55 = vpop.eup %2175 }
 0x3b1   : > { %v963_v56 = vpop.xlane.xlu0 %962 }
 0x3b2   : > { %2179 = vrcp.f32 %v963_v56 }
 0x3b7   : > { %v2178_v62 = vpop.eup %2177 }
 0x3bf   : > { %v2180_v8 = vpop.eup %2179 }
 0x3d6   : > { %v1094_v1 = vpop.xlane.xlu1 %1093 }
 0x3d9   : > { %v750_v57 = vpop.f32.mrf.mxu0 }
 0x3da   : > { %v756_v58 = vmul.f32 %v2176_v55, %v750_v57  ;;  %v1225_v19 = vpop.xlane.xlu0 %1224 }
 0x3db   : > { %v1927_v59 = vpop.f32.mrf.mxu0 }
 0x3dc   : > { %v1830_v60 = vpack.c.bf16 %v756_v58, %v756_v58  ;;  %v1822_v59 = vld [vmem:[%s2878_s5] ss:$0 sm:$0xff] }
 0x3dd   : > { %v753_v38 = vpop.f32.mrf.mxu0 }
 0x3de   : > { %761 = vrot.lane.b32.xlu0 %v1830_v60, %s2429_s12  ;;  %v1487_v29 = vpop.xlane.xlu0 %1486  ;;  %s2323_s12 = scalar_lea.vmem %s2826_s15, 128 }
 0x3df   : > { %v1928_v61 = vpop.f32.mrf.mxu0  ;;  %p2324_p1 = scmp.ne.s32.totalorder %s2826_s15, %s2323_s12 }
 0x3e1   : > { %v881_v63 = vpop.f32.mrf.mxu0  ;;  %p2325_p3 = pnand %p2324_p1, %p2594_p2 }
 0x3e2   : > { %v887_v2 = vmul.f32 %v2178_v62, %v881_v63 }
 0x3e3   : > { %v1939_v3 = vpop.f32.mrf.mxu0  ;;  %p2326_p5 = pneg %p2325_p3 }
 0x3e4   : > { %v1831_v4 = vpack.c.bf16 %v887_v2, %v887_v2 }
 0x3e5   : > { %v884_v5 = vpop.f32.mrf.mxu0 }
 0x3e6   : > { %v1356_v6 = vpop.xlane.xlu1 %1355  ;;  %892 = vrot.lane.b32.xlu1 %v1831_v4, %s2430_s16  ;;  %s2327_s16 = sshll.u32 %s2436_s2, 4  ;;  %s2328_s16 = int_to_ptr.vmem [resolvable:$false] %s2327_s16 }
 0x3e7   : > { %v1940_v7 = vpop.f32.mrf.mxu0  ;;  %p2330_p0 = scmp.lt.s32.totalorder %s2826_s15, %s2328_s16 }
 0x3e9   : > { %v1012_v9 = vpop.f32.mrf.mxu0 }
 0x3ea   : > { %v1018_v10 = vmul.f32 %v2180_v8, %v1012_v9  ;;  %v580_v11 = vpop.xlane.xlu1 %579 }
 0x3eb   : > { %2181 = vrcp.f32 %v580_v11  ;;  %v1951_v12 = vpop.f32.mrf.mxu0 }
 0x3ec   : > { %v1832_v13 = vpack.c.bf16 %v1018_v10, %v1018_v10  ;;  %2183 = vrcp.f32 %v1094_v1 }
 0x3ed   : > { %v1015_v14 = vpop.f32.mrf.mxu0  ;;  %2185 = vrcp.f32 %v1225_v19 }
 0x3ee   : > { %1023 = vrot.lane.b32.xlu1 %v1832_v13, %s2431_s14  ;;  %2187 = vrcp.f32 %v1356_v6  ;;  %s2329_s14 = scalar_lea.vmem %s2328_s16, 256 }
 0x3ef   : > { %v1952_v15 = vpop.f32.mrf.mxu0  ;;  %2189 = vrcp.f32 %v1487_v29  ;;  %p2331_p8 = scmp.lt.s32.totalorder %s2329_s14, %s2323_s12 }
 0x3f1   : > { %p2332_p7 = por %p2331_p8, %p2330_p0 }
 0x3f3   : > { %p2333_p9 = pnand %p2332_p7, %p2326_p5 }
 0x3f8   : > { %v2182_v16 = vpop.eup %2181 }
 0x3f9   : > { %v631_v17 = vmul.f32 %v2182_v16, %v625_v48  ;;  %v2184_v20 = vpop.eup %2183 }
 0x3fa   : > { %v2186_v27 = vpop.eup %2185 }
 0x3fb   : > { %v632_v18 = vpack.c.bf16 %v631_v17, %v631_v17  ;;  %v2188_v35 = vpop.eup %2187 }
 0x3fc   : > { %v2190_v45 = vpop.eup %2189 }
 0x3fd   : > { %634 = vst.msk [vmem:[#allocation5] sm:$0xf] %vm633_vm6, %v632_v18 }
 0x40e   : > { %v1143_v21 = vpop.f32.mrf.mxu0 }
 0x40f   : > { %v1149_v22 = vmul.f32 %v2184_v20, %v1143_v21 }
 0x410   : > { %v1963_v23 = vpop.f32.mrf.mxu0 }
 0x411   : > { %v1833_v24 = vpack.c.bf16 %v1149_v22, %v1149_v22 }
 0x412   : > { %v1146_v25 = vpop.f32.mrf.mxu0 }
 0x413   : > { %1154 = vrot.lane.b32.xlu0 %v1833_v24, %s2432_s8 }
 0x414   : > { %v1964_v26 = vpop.f32.mrf.mxu0 }
 0x416   : > { %v1274_v30 = vpop.f32.mrf.mxu0 }
 0x417   : > { %v1280_v31 = vmul.f32 %v2186_v27, %v1274_v30 }
 0x418   : > { %v1975_v28 = vpop.f32.mrf.mxu0 }
 0x419   : > { %v1834_v32 = vpack.c.bf16 %v1280_v31, %v1280_v31 }
 0x41a   : > { %v1277_v34 = vpop.f32.mrf.mxu0 }
 0x41b   : > { %1285 = vrot.lane.b32.xlu1 %v1834_v32, %s2433_s18 }
 0x41c   : > { %v1976_v33 = vpop.f32.mrf.mxu0 }
 0x41e   : > { %v1405_v36 = vpop.f32.mrf.mxu0 }
 0x41f   : > { %v1411_v39 = vmul.f32 %v2188_v35, %v1405_v36 }
 0x420   : > { %v1987_v40 = vpop.f32.mrf.mxu0 }
 0x421   : > { %v1835_v42 = vpack.c.bf16 %v1411_v39, %v1411_v39 }
 0x422   : > { %v1408_v43 = vpop.f32.mrf.mxu0 }
 0x423   : > { %1416 = vrot.lane.b32.xlu0 %v1835_v42, %s2434_s27 }
 0x424   : > { %v1988_v44 = vpop.f32.mrf.mxu0 }
 0x426   : > { %v1536_v46 = vpop.f32.mrf.mxu0 }
 0x427   : > { %v1542_v47 = vmul.f32 %v2190_v45, %v1536_v46 }
 0x428   : > { %v1999_v48 = vpop.f32.mrf.mxu0 }
 0x429   : > { %v1836_v49 = vpack.c.bf16 %v1542_v47, %v1542_v47 }
 0x42a   : > { %v1539_v50 = vpop.f32.mrf.mxu0 }
 0x42b   : > { %1547 = vrot.lane.b32.xlu1 %v1836_v49, %s2435_s9 }
 0x42c   : > { %v2000_v51 = vpop.f32.mrf.mxu0 }
 0x450   : > { %v762_v52 = vpop.permute.xlu0 %761 }
 0x451   : > { %765 = vst.msk [vmem:[#allocation5] sm:$0xf] %vm764_vm7, %v762_v52 }
 0x458   : > { %v893_v53 = vpop.permute.xlu1 %892 }
 0x459   : > { %896 = vst.msk [vmem:[#allocation5] sm:$0xf] %vm895_vm8, %v893_v53 }
 0x460   : > { %v1024_v0 = vpop.permute.xlu1 %1023 }
 0x461   : > { %1027 = vst.msk [vmem:[#allocation5] sm:$0xf] %vm1026_vm9, %v1024_v0 }
 0x485   : > { %v1155_v54 = vpop.permute.xlu0 %1154 }
 0x486   : > { %1158 = vst.msk [vmem:[#allocation5] sm:$0xf] %vm1157_vm10, %v1155_v54 }
 0x48d   : > { %v1286_v55 = vpop.permute.xlu1 %1285 }
 0x48e   : > { %1289 = vst.msk [vmem:[#allocation5] sm:$0xf] %vm1288_vm11, %v1286_v55 }
 0x495   : > { %v1417_v56 = vpop.permute.xlu0 %1416 }
 0x496   : > { %1420 = vst.msk [vmem:[#allocation5] sm:$0xf] %vm1419_vm12, %v1417_v56 }
 0x49d   : > { %v1548_v57 = vpop.permute.xlu1 %1547 }
 0x49e   : > { %1551 = vst.msk [vmem:[#allocation5] sm:$0xf] %vm1550_vm13, %v1548_v57 }
 0x4a5   : > { %v1552_v58 = vld [vmem:[#allocation5] sm:$0xf] }
 0x4a6   : > { %2006 = vmatmul.mubr.msk.bf16.vlgmr.msra.gmra.mxu1 %vm358_vm1, %v1552_v58 }
 0x566   : > { %v1613_v60 = vpop.f32.mrf.mxu1 }
 0x567   : > { %v1614_v38 = vadd.f32 %v1822_v59, %v1613_v60 }
 0x568   : > { %v2007_v61 = vpop.f32.mrf.mxu1 }
 0x569   : > { %1619 = vst.msk [vmem:[%s338_s29] sm:$0xff] %vm358_vm1, %v1614_v38 }
 0x56a   : > { %v1616_v62 = vpop.f32.mrf.mxu1 }
 0x56b   : > { %2336 = shalt.err (!%p2333_p9)
}
 0x56c   : > { %s2337_s8 = scalar_lea.hbm %s2824_s13, 128  ;;  %s2341_s27 = scalar_lea.hbm %s2879_s6, 256 }
 0x56d   : > { %p2338_p10 = scmp.ne.s32.totalorder %s2824_s13, %s2337_s8  ;;  %p2342_p13 = scmp.lt.s32.totalorder %s2824_s13, %s2879_s6 }
 0x56e   : > { %p2343_p4 = scmp.lt.s32.totalorder %s2341_s27, %s2337_s8 }
 0x56f   : > { %p2339_p12 = pnand %p2338_p10, %p2594_p2 }
 0x570   : > { %p2344_p11 = por %p2343_p4, %p2342_p13 }
 0x571   : > { %p2340_p6 = pneg %p2339_p12 }
 0x573   : > { %p2345_p1 = pnand %p2344_p11, %p2340_p6 }
 0x575   : > { %2348 = shalt.err (!%p2345_p1)
}
 0x576   : > { %2027 = dma.vmem_to_hbm [thread:$0]  (%p2594_p2), %s2826_s15, 128, %s2824_s13, %s1621_s24   ;;  %v2008_v63 = vpop.f32.mrf.mxu1 }
 0x577 PF: > { %s1647_s1 = sand.u32 1, %s2391_s21   ;;  %p2894_p3 = scmp.ne.s32.totalorder %s2892_s7, 0 }
 0x578   : > { %p2895_p5 = scmp.ge.s32.totalorder %s2411_s26, 2  ;;  %s1648_s28 = scalar_lea.sflag [#allocation8], %s1647_s1 }
 0x57a   : > { %p2047_p0 = pnand %p2895_p5, %p2894_p3 }
 0x57c   : > { %p2048_p8 = pneg %p2047_p0 }
 0x57e   : > { %2386 = dma.done.wait (%p2048_p8), %s1648_s28, 128  }
 0x57f   : > { %2388 = vsyncadd (%p2048_p8), %s1648_s28, 4294967168  ;;  %s24_s26 = sadd.s32 1, %s2411_s26   ;;  %s2896_s21 = smov %s2395_s22 }
 0x580   : > { %p21_p7 = scmp.ge.s32.totalorder %s24_s26, 4   ;;  %s2897_s22 = smov %s2399_s23 }
 0x581   : > { %s2898_s23 = smov %s2599_s30  ;;  %s2899_s24 = smov %s2407_s25 }
 0x582   : > { %s2900_s25 = smov %s2902_s17  ;;  %23 = sbr.rel (!%p21_p7) target bundleno = 12 (0xc), region = 105 }
 0x587   :  { %1653 = vsyncpa [#allocation7], 1 }
 0x588   :  { %1655 = vsyncpa [#allocation7 + $0x1], 1 }
 0x589   :  { %1656 = vsyncpa [#allocation10], 1 }
 0x58a   :  { %1657 = vsyncpa [#allocation13], 1 }
 0x58b   :  { %1658 = vsyncpa [#allocation8], 1 }
 0x58c   :  { %1660 = vsyncpa [#allocation8 + $0x1], 1 }

</bundles_post_ra>
